<compile_context>
chip_gen: v7x
topology: tpu7x:2x2x1
jax: 0.10.0
libtpu: 0.0.40
codegen_flags: <defaults>
</compile_context>

<pallas_src>
import jax
import jax.numpy as jnp
from jax.experimental import pallas as pl
from jax.experimental.pallas import tpu as pltpu


def _round_up(x, m):
    return ((x + m - 1) // m) * m


def mlp_kernel(x_ref, w1_ref, b1_ref, w2_ref, b2_ref, w3e_ref, b3e_ref,
               o_ref, acc_ref):
    k = pl.program_id(1)

    @pl.when(k == 0)
    def _():
        # Seed the layer-1 accumulator with the (broadcast) bias — exact, and
        # removes the bias add from the last-step epilogue.
        acc_ref[...] = jnp.broadcast_to(b1_ref[...], acc_ref.shape)

    # Layer-1 partial matmul over this K tile (bf16 operands, f32 accumulate).
    acc_ref[...] += jnp.dot(x_ref[...], w1_ref[...],
                            preferred_element_type=jnp.float32)

    @pl.when(k == pl.num_programs(1) - 1)
    def _():
        # layer1 epilogue: ReLU (bias already folded into the accumulator)
        h1 = jnp.maximum(acc_ref[...], 0.0)
        # layer2: Linear(1024, 1024) + ReLU   (bf16 MXU, f32 accumulate)
        h2 = jnp.dot(h1.astype(jnp.bfloat16), w2_ref[...],
                     preferred_element_type=jnp.float32) + b2_ref[...]
        h2 = jnp.maximum(h2, 0.0)
        # fused layer3 + embedding projection:  h2 @ (w3 @ ebd) + (b3 @ ebd)
        o_ref[...] = (jnp.dot(h2.astype(jnp.bfloat16), w3e_ref[...],
                              preferred_element_type=jnp.float32)
                      + b3e_ref[...]).astype(o_ref.dtype)


def mlp_forward(x_nchw, params, ebd, *, bm=256, tk_max=1024):
    """x_nchw: [B, C, H, W] float32. Returns [B, ebd.shape[1]] float32."""
    w1, b1, w2, b2, w3, b3 = params
    B = x_nchw.shape[0]
    x = x_nchw.reshape(B, -1).astype(jnp.float32)   # flatten(1) (glue, plain JAX)
    size = x.shape[1]
    E = ebd.shape[1]

    # --- fold layer3 into the embedding projection (exact: associativity) ---
    w3e = (w3.astype(jnp.float32) @ ebd.astype(jnp.float32))        # (1024, E)
    b3e = (b3.astype(jnp.float32) @ ebd.astype(jnp.float32))        # (1,    E)

    # --- adaptive batch tile: don't pad tiny batches up to a huge bm, and
    #     keep >= 2 batch tiles when possible (v7x has 2 TensorCores). -------
    bm = min(bm, _round_up(B, 8))
    if _round_up(B, bm) // bm < 2 and bm >= 16:
        bm = _round_up(bm // 2, 8)
    Bp = _round_up(B, bm)
    if Bp != B:
        x = jnp.pad(x, ((0, Bp - B), (0, 0)))

    # --- K-tile the first matmul; zero-pad the flattened dim if needed ------
    size_p = _round_up(size, 128)
    tk = min(tk_max, size_p)
    size_p = _round_up(size_p, tk)
    if size_p != size:
        x = jnp.pad(x, ((0, 0), (0, size_p - size)))
        w1 = jnp.pad(w1, ((0, size_p - size), (0, 0)))

    # --- bf16 matmul operands (f32 accumulation stays in the kernel) --------
    x_bf = x.astype(jnp.bfloat16)
    w1_bf = w1.astype(jnp.bfloat16)
    w2_bf = w2.astype(jnp.bfloat16)
    w3e_bf = w3e.astype(jnp.bfloat16)
    b1_f = b1.astype(jnp.float32)
    b2_f = b2.astype(jnp.float32)

    grid = (Bp // bm, size_p // tk)

    def x_map(i, k):
        return (i, k)

    def w1_map(i, k):
        return (k, 0)

    def rep_map(i, k):
        return (0, 0)

    def out_map(i, k):
        return (i, 0)

    out = pl.pallas_call(
        mlp_kernel,
        out_shape=jax.ShapeDtypeStruct((Bp, E), jnp.float32),
        grid_spec=pltpu.PrefetchScalarGridSpec(
            num_scalar_prefetch=0,
            grid=grid,
            in_specs=[
                # x tile: streamed over batch and K (bf16, double-buffered)
                pl.BlockSpec((bm, tk), x_map),
                # w1 tile: streamed over K (bf16, double-buffered)
                pl.BlockSpec((tk, 1024), w1_map),
                # grid-invariant operands: fetched once, single-buffered
                pl.BlockSpec((1, 1024), rep_map, pipeline_mode=pl.Buffered(1)),    # b1 (f32)
                pl.BlockSpec((1024, 1024), rep_map, pipeline_mode=pl.Buffered(1)),  # w2 (bf16)
                pl.BlockSpec((1, 1024), rep_map, pipeline_mode=pl.Buffered(1)),    # b2 (f32)
                pl.BlockSpec((1024, E), rep_map, pipeline_mode=pl.Buffered(1)),    # w3e (bf16)
                pl.BlockSpec((1, E), rep_map, pipeline_mode=pl.Buffered(1)),       # b3e (f32)
            ],
            out_specs=pl.BlockSpec((bm, E), out_map),
            scratch_shapes=[pltpu.VMEM((bm, 1024), jnp.float32)],   # layer-1 acc
        ),
        compiler_params=pltpu.CompilerParams(
            dimension_semantics=("parallel", "arbitrary"),
            vmem_limit_bytes=48 << 20,
        ),
    )(x_bf, w1_bf, b1_f, w2_bf, b2_f, w3e_bf, b3e)
    return out[:B]


def init_params(key, size, embed_out):
    """Deterministic synthetic init (shapes match the torch module)."""
    ks = jax.random.split(key, 7)
    scale = 0.02
    w1 = scale * jax.random.normal(ks[0], (size, 1024), jnp.float32)
    b1 = scale * jax.random.normal(ks[1], (1, 1024), jnp.float32)
    w2 = scale * jax.random.normal(ks[2], (1024, 1024), jnp.float32)
    b2 = scale * jax.random.normal(ks[3], (1, 1024), jnp.float32)
    w3 = scale * jax.random.normal(ks[4], (1024, 512), jnp.float32)
    b3 = scale * jax.random.normal(ks[5], (1, 512), jnp.float32)
    ebd = jax.random.normal(ks[6], (512, embed_out), jnp.float32)  # self.ebd.float()
    return (w1, b1, w2, b2, w3, b3), ebd


def reference_forward(x_nchw, params, ebd):
    w1, b1, w2, b2, w3, b3 = params
    x = x_nchw.reshape(x_nchw.shape[0], -1).astype(jnp.float32)
    h1 = jnp.maximum(x @ w1 + b1, 0.0)
    h2 = jnp.maximum(h1 @ w2 + b2, 0.0)
    h3 = h2 @ w3 + b3
    return h3 @ ebd


if __name__ == "__main__":
    key = jax.random.PRNGKey(0)
    kx, kp = jax.random.split(key)

    # Small example consistent with the module: flatten(1) on a NCHW tensor.
    B, C, H, W = 8, 4, 8, 8          # size = C*H*W = 256
    size = C * H * W
    embed_out = 128                  # ebd: [512, 128]

    x = jax.random.normal(kx, (B, C, H, W), jnp.float32)
    params, ebd = init_params(kp, size, embed_out)

    out = mlp_forward(x, params, ebd)
    out = jax.block_until_ready(out)

    ref = reference_forward(x, params, ebd)
    assert out.shape == (B, embed_out)
    # bf16 matmul operands + f32 accumulation -> loosened tolerance vs f32 ref.
    assert jnp.allclose(out, ref, atol=5e-2, rtol=5e-2), "mismatch vs reference"

    print("KERNEL_OK")
</pallas_src>

<mosaic_0001>
module attributes {stable_mosaic.version = 11 : i64} {
  func.func @mlp_kernel(%arg0: i32, %arg1: i32, %arg2: memref<8x256xbf16, #tpu.memory_space<vmem>>, %arg3: memref<256x1024xbf16, #tpu.memory_space<vmem>>, %arg4: memref<1x1024xf32, #tpu.memory_space<vmem>>, %arg5: memref<1024x1024xbf16, #tpu.memory_space<vmem>>, %arg6: memref<1x1024xf32, #tpu.memory_space<vmem>>, %arg7: memref<1024x128xbf16, #tpu.memory_space<vmem>>, %arg8: memref<1x128xf32, #tpu.memory_space<vmem>>, %arg9: memref<8x128xf32, #tpu.memory_space<vmem>>, %arg10: memref<8x1024xf32, #tpu.memory_space<vmem>>) attributes {dimension_semantics = [#tpu.dimension_semantics<parallel>, #tpu.dimension_semantics<arbitrary>], iteration_bounds = array<i64: 1, 1>, scalar_prefetch = 0 : i64, scratch_operands = 1 : i64, tpu.core_type = #tpu.core_type<tc>, window_params = [{transform_indices = @transform_0, window_bounds = array<i64: 8, 256>}, {transform_indices = @transform_1, window_bounds = array<i64: 256, 1024>}, {pipeline_mode = #tpu.pipeline_mode<synchronous>, transform_indices = @transform_2, window_bounds = array<i64: 1, 1024>}, {pipeline_mode = #tpu.pipeline_mode<synchronous>, transform_indices = @transform_3, window_bounds = array<i64: 1024, 1024>}, {pipeline_mode = #tpu.pipeline_mode<synchronous>, transform_indices = @transform_4, window_bounds = array<i64: 1, 1024>}, {pipeline_mode = #tpu.pipeline_mode<synchronous>, transform_indices = @transform_5, window_bounds = array<i64: 1024, 128>}, {pipeline_mode = #tpu.pipeline_mode<synchronous>, transform_indices = @transform_6, window_bounds = array<i64: 1, 128>}, {transform_indices = @transform_7, window_bounds = array<i64: 8, 128>}]} {
    %c0_i32 = arith.constant 0 : i32
    %0 = arith.cmpi eq, %arg1, %c0_i32 : i32
    %1 = arith.extui %0 : i1 to i32
    %c0_i32_0 = arith.constant 0 : i32
    %2 = arith.cmpi ne, %1, %c0_i32_0 : i32
    scf.if %2 {
      %c0_10 = arith.constant 0 : index
      %c0_11 = arith.constant 0 : index
      %12 = vector.load %arg4[%c0_10, %c0_11] : memref<1x1024xf32, #tpu.memory_space<vmem>>, vector<1x1024xf32>
      %13 = vector.shape_cast %12 : vector<1x1024xf32> to vector<1x1024xf32>
      %14 = vector.broadcast %13 : vector<1x1024xf32> to vector<8x1024xf32>
      %c0_12 = arith.constant 0 : index
      %c0_13 = arith.constant 0 : index
      %15 = vector.load %arg10[%c0_12, %c0_13] : memref<8x1024xf32, #tpu.memory_space<vmem>>, vector<8x1024xf32>
      tpu.vector_store %arg10[%c0_12, %c0_13], %14 {strides = array<i32>} : memref<8x1024xf32, #tpu.memory_space<vmem>>, vector<8x1024xf32>,
    } else {
    }
    %c0 = arith.constant 0 : index
    %c0_1 = arith.constant 0 : index
    %3 = vector.load %arg10[%c0, %c0_1] : memref<8x1024xf32, #tpu.memory_space<vmem>>, vector<8x1024xf32>
    %c0_2 = arith.constant 0 : index
    %c0_3 = arith.constant 0 : index
    %4 = vector.load %arg2[%c0_2, %c0_3] : memref<8x256xbf16, #tpu.memory_space<vmem>>, vector<8x256xbf16>
    %c0_4 = arith.constant 0 : index
    %c0_5 = arith.constant 0 : index
    %5 = vector.load %arg3[%c0_4, %c0_5] : memref<256x1024xbf16, #tpu.memory_space<vmem>>, vector<256x1024xbf16>
    %cst = arith.constant dense<0.000000e+00> : vector<8x1024xf32>
    %6 = tpu.matmul %4, %5, %cst {dimension_numbers = #tpu.dot_dimension_numbers<[1], [0], [0], [1], [0, 0, 1, 1], [], []>} : vector<8x256xbf16>, vector<256x1024xbf16>, vector<8x1024xf32> -> vector<8x1024xf32>
    %7 = arith.addf %3, %6 : vector<8x1024xf32>
    %c0_6 = arith.constant 0 : index
    %c0_7 = arith.constant 0 : index
    %8 = vector.load %arg10[%c0_6, %c0_7] : memref<8x1024xf32, #tpu.memory_space<vmem>>, vector<8x1024xf32>
    tpu.vector_store %arg10[%c0_6, %c0_7], %7 {strides = array<i32>} : memref<8x1024xf32, #tpu.memory_space<vmem>>, vector<8x1024xf32>,
    %c0_i32_8 = arith.constant 0 : i32
    %9 = arith.cmpi eq, %arg1, %c0_i32_8 : i32
    %10 = arith.extui %9 : i1 to i32
    %c0_i32_9 = arith.constant 0 : i32
    %11 = arith.cmpi ne, %10, %c0_i32_9 : i32
    scf.if %11 {
      %c0_10 = arith.constant 0 : index
      %c0_11 = arith.constant 0 : index
      %12 = vector.load %arg10[%c0_10, %c0_11] : memref<8x1024xf32, #tpu.memory_space<vmem>>, vector<8x1024xf32>
      %cst_12 = arith.constant 0.000000e+00 : f32
      %13 = vector.broadcast %cst_12 : f32 to vector<8x1024xf32>
      %14 = arith.maximumf %12, %13 : vector<8x1024xf32>
      %15 = arith.truncf %14 : vector<8x1024xf32> to vector<8x1024xbf16>
      %c0_13 = arith.constant 0 : index
      %c0_14 = arith.constant 0 : index
      %16 = vector.load %arg5[%c0_13, %c0_14] : memref<1024x1024xbf16, #tpu.memory_space<vmem>>, vector<1024x1024xbf16>
      %cst_15 = arith.constant dense<0.000000e+00> : vector<8x1024xf32>
      %17 = tpu.matmul %15, %16, %cst_15 {dimension_numbers = #tpu.dot_dimension_numbers<[1], [0], [0], [1], [0, 0, 1, 1], [], []>} : vector<8x1024xbf16>, vector<1024x1024xbf16>, vector<8x1024xf32> -> vector<8x1024xf32>
      %c0_16 = arith.constant 0 : index
      %c0_17 = arith.constant 0 : index
      %18 = vector.load %arg6[%c0_16, %c0_17] : memref<1x1024xf32, #tpu.memory_space<vmem>>, vector<1x1024xf32>
      %19 = vector.broadcast %18 : vector<1x1024xf32> to vector<8x1024xf32>
      %20 = arith.addf %17, %19 : vector<8x1024xf32>
      %cst_18 = arith.constant 0.000000e+00 : f32
      %21 = vector.broadcast %cst_18 : f32 to vector<8x1024xf32>
      %22 = arith.maximumf %20, %21 : vector<8x1024xf32>
      %23 = arith.truncf %22 : vector<8x1024xf32> to vector<8x1024xbf16>
      %c0_19 = arith.constant 0 : index
      %c0_20 = arith.constant 0 : index
      %24 = vector.load %arg7[%c0_19, %c0_20] : memref<1024x128xbf16, #tpu.memory_space<vmem>>, vector<1024x128xbf16>
      %cst_21 = arith.constant dense<0.000000e+00> : vector<8x128xf32>
      %25 = tpu.matmul %23, %24, %cst_21 {dimension_numbers = #tpu.dot_dimension_numbers<[1], [0], [0], [1], [0, 0, 1, 1], [], []>} : vector<8x1024xbf16>, vector<1024x128xbf16>, vector<8x128xf32> -> vector<8x128xf32>
      %c0_22 = arith.constant 0 : index
      %c0_23 = arith.constant 0 : index
      %26 = vector.load %arg8[%c0_22, %c0_23] : memref<1x128xf32, #tpu.memory_space<vmem>>, vector<1x128xf32>
      %27 = vector.broadcast %26 : vector<1x128xf32> to vector<8x128xf32>
      %28 = arith.addf %25, %27 : vector<8x128xf32>
      %c0_24 = arith.constant 0 : index
      %c0_25 = arith.constant 0 : index
      %29 = vector.load %arg9[%c0_24, %c0_25] : memref<8x128xf32, #tpu.memory_space<vmem>>, vector<8x128xf32>
      tpu.vector_store %arg9[%c0_24, %c0_25], %28 {strides = array<i32>} : memref<8x128xf32, #tpu.memory_space<vmem>>, vector<8x128xf32>,
    } else {
    }
    return
  }
  func.func @transform_0(%arg0: i32, %arg1: i32) -> (i32, i32) {
    %c0_i32 = arith.constant 0 : i32
    return %arg0, %arg1 : i32, i32
  }
  func.func @transform_1(%arg0: i32, %arg1: i32) -> (i32, i32) {
    %c0_i32 = arith.constant 0 : i32
    %c0_i32_0 = arith.constant 0 : i32
    return %arg1, %c0_i32 : i32, i32
  }
  func.func @transform_2(%arg0: i32, %arg1: i32) -> (i32, i32) {
    %c0_i32 = arith.constant 0 : i32
    %c0_i32_0 = arith.constant 0 : i32
    %c0_i32_1 = arith.constant 0 : i32
    return %c0_i32, %c0_i32_0 : i32, i32
  }
  func.func @transform_3(%arg0: i32, %arg1: i32) -> (i32, i32) {
    %c0_i32 = arith.constant 0 : i32
    %c0_i32_0 = arith.constant 0 : i32
    %c0_i32_1 = arith.constant 0 : i32
    return %c0_i32, %c0_i32_0 : i32, i32
  }
  func.func @transform_4(%arg0: i32, %arg1: i32) -> (i32, i32) {
    %c0_i32 = arith.constant 0 : i32
    %c0_i32_0 = arith.constant 0 : i32
    %c0_i32_1 = arith.constant 0 : i32
    return %c0_i32, %c0_i32_0 : i32, i32
  }
  func.func @transform_5(%arg0: i32, %arg1: i32) -> (i32, i32) {
    %c0_i32 = arith.constant 0 : i32
    %c0_i32_0 = arith.constant 0 : i32
    %c0_i32_1 = arith.constant 0 : i32
    return %c0_i32, %c0_i32_0 : i32, i32
  }
  func.func @transform_6(%arg0: i32, %arg1: i32) -> (i32, i32) {
    %c0_i32 = arith.constant 0 : i32
    %c0_i32_0 = arith.constant 0 : i32
    %c0_i32_1 = arith.constant 0 : i32
    return %c0_i32, %c0_i32_0 : i32, i32
  }
  func.func @transform_7(%arg0: i32, %arg1: i32) -> (i32, i32) {
    %c0_i32 = arith.constant 0 : i32
    %c0_i32_0 = arith.constant 0 : i32
    return %arg0, %c0_i32 : i32, i32
  }
}

</mosaic_0001>

<bundles_post_ra>
// kernel: tpu_custom_call.1
= control target key start
LH: loop header
LB: loop body
LE: loop exit
PB: predicated region body
PF: predicated region fallthrough
CT: control target
= control target key end

     0   :  { %12 = vsyncpa [#allocation4], 0  ;;  %s7081_s0 = inlined_call_operand.hbm [shape: bf16[8,256], index: 0, kind: input, shape index: {}]   ;;  %s7082_s1 = inlined_call_operand.hbm [shape: bf16[256,1024], index: 1, kind: input, shape index: {}]   ;;  %s7083_s2 = inlined_call_operand.hbm [shape: f32[1,1024], index: 2, kind: input, shape index: {}]   ;;  %s7084_s3 = inlined_call_operand.hbm [shape: bf16[1024,1024], index: 3, kind: input, shape index: {}]   ;;  %s7085_s4 = inlined_call_operand.hbm [shape: f32[1,1024], index: 4, kind: input, shape index: {}]   ;;  %s7086_s5 = inlined_call_operand.hbm [shape: bf16[1024,128], index: 5, kind: input, shape index: {}]   ;;  %s7087_s6 = inlined_call_operand.hbm [shape: f32[1,128], index: 6, kind: input, shape index: {}]   ;;  %s7088_s7 = inlined_call_operand.hbm [shape: f32[8,128], index: 7, kind: output, shape index: {}]  }
   0x1   :  { %13 = vsyncpa [#allocation7], 0 }
   0x2   :  { %14 = vsyncpa [#allocation10], 0 }
   0x3   :  { %15 = vsyncpa [#allocation13], 0 }
   0x4   :  { %16 = vsyncpa [#allocation5], 0  ;;  %s6760_s24 = smov [#allocation6]   ;;  %s6574_s28 = scalar_lea.hbm %s7082_s1, 16384 }
   0x5   :  { %s32_s25 = sshll.u32 %s6760_s24, 4  ;;  %p6575_p0 = scmp.ne.s32.totalorder %s7082_s1, %s6574_s28  ;;  %s33_s25 = int_to_ptr.vmem [resolvable:$true] %s32_s25 }
   0x6   :  { %p6578_p1 = scmp.lt.u32.totalorder %s6574_s28, %s7082_s1 }
   0x8   :  { %p6580_p2 = pnand %p6578_p1, %p6575_p0 }
   0xa   :  { %6583 = shalt.err (!%p6580_p2)
}
   0xb   :  { %s6584_s10 = scalar_lea.vmem %s33_s25, 16384  ;;  %p6589_p4 = scmp.lt.s32.totalorder %s33_s25, %s33_s25 }
   0xc   :  { %p6585_p3 = scmp.ne.s32.totalorder %s33_s25, %s6584_s10  ;;  %p6590_p5 = scmp.lt.s32.totalorder %s6584_s10, %s6584_s10 }
   0xe   :  { %p6591_p6 = por %p6590_p5, %p6589_p4 }
  0x10   :  { %p6592_p7 = pnand %p6591_p6, %p6585_p3 }
  0x12   :  { %6595 = shalt.err (!%p6592_p7)
}
  0x13   :  { %s6761_s11 = smov 512   ;;  %s6762_s12 = smov 32  }
  0x14   :  { %38 = dma.hbm_to_vmem [thread:$0]  %s7082_s1, 16384, %s33_s25, [#allocation7], %s6761_s11, %s6761_s11, %s6762_s12  }
  0x15   :  { %s6763_s15 = smov [#allocation9]   ;;  %s6764_s17 = smov [#allocation12]  }
  0x16   :  { %s54_s16 = sshll.u32 %s6763_s15, 4  ;;  %s76_s18 = sshll.u32 %s6764_s17, 4  ;;  %s55_s16 = int_to_ptr.vmem [resolvable:$true] %s54_s16  ;;  %s77_s18 = int_to_ptr.vmem [resolvable:$true] %s76_s18 }
  0x17   :  { %s6596_s21 = scalar_lea.hbm %s7084_s3, 65536 }
  0x18   :  { %p6597_p8 = scmp.ne.s32.totalorder %s7084_s3, %s6596_s21  ;;  %p6600_p9 = scmp.lt.u32.totalorder %s6596_s21, %s7084_s3 }
  0x1a   :  { %p6602_p10 = pnand %p6600_p9, %p6597_p8 }
  0x1c   :  { %6605 = shalt.err (!%p6602_p10)
}
  0x1d   :  { %s6606_s1 = scalar_lea.vmem %s55_s16, 65536  ;;  %p6611_p12 = scmp.lt.s32.totalorder %s55_s16, %s55_s16 }
  0x1e   :  { %p6607_p11 = scmp.ne.s32.totalorder %s55_s16, %s6606_s1  ;;  %p6612_p13 = scmp.lt.s32.totalorder %s6606_s1, %s6606_s1 }
  0x20   :  { %p6613_p0 = por %p6612_p13, %p6611_p12 }
  0x22   :  { %p6614_p1 = pnand %p6613_p0, %p6607_p11 }
  0x24   :  { %6617 = shalt.err (!%p6614_p1)
}
  0x25   :  { %60 = dma.hbm_to_vmem [thread:$0]  %s7084_s3, 65536, %s55_s16, [#allocation10], %s6761_s11, %s6761_s11, %s6762_s12  }
  0x26   :  { %s6618_s30 = scalar_lea.hbm %s7086_s5, 8192 }
  0x27   :  { %p6619_p2 = scmp.ne.s32.totalorder %s7086_s5, %s6618_s30  ;;  %p6622_p3 = scmp.lt.u32.totalorder %s6618_s30, %s7086_s5 }
  0x29   :  { %p6624_p4 = pnand %p6622_p3, %p6619_p2 }
  0x2b   :  { %6627 = shalt.err (!%p6624_p4)
}
  0x2c   :  { %s6628_s14 = scalar_lea.vmem %s77_s18, 8192  ;;  %p6633_p6 = scmp.lt.s32.totalorder %s77_s18, %s77_s18 }
  0x2d   :  { %p6629_p5 = scmp.ne.s32.totalorder %s77_s18, %s6628_s14  ;;  %p6634_p7 = scmp.lt.s32.totalorder %s6628_s14, %s6628_s14 }
  0x2f   :  { %p6635_p8 = por %p6634_p7, %p6633_p6 }
  0x31   :  { %p6636_p9 = pnand %p6635_p8, %p6629_p5 }
  0x33   :  { %6639 = shalt.err (!%p6636_p9)
}
  0x34   :  { %s6765_s3 = smov 64   ;;  %s6766_s11 = smov 4  }
  0x35   :  { %82 = dma.hbm_to_vmem [thread:$0]  %s7086_s5, 8192, %s77_s18, [#allocation13], %s6765_s3, %s6765_s3, %s6766_s11  }
  0x36   :  { %s6767_s16 = smov [#allocation3]   ;;  %s6768_s19 = smov [#allocation8]  }
  0x37   :  { %s23_s17 = sshll.u32 %s6767_s16, 4  ;;  %s45_s20 = sshll.u32 %s6768_s19, 4  ;;  %s24_s17 = int_to_ptr.vmem [resolvable:$true] %s23_s17  ;;  %s46_s20 = int_to_ptr.vmem [resolvable:$true] %s45_s20 }
  0x38   :  { %s6640_s23 = scalar_lea.hbm %s7081_s0, 128 }
  0x39   :  { %p6641_p10 = scmp.ne.s32.totalorder %s7081_s0, %s6640_s23  ;;  %p6644_p11 = scmp.lt.u32.totalorder %s6640_s23, %s7081_s0 }
  0x3b   :  { %p6646_p12 = pnand %p6644_p11, %p6641_p10 }
  0x3d   :  { %6649 = shalt.err (!%p6646_p12)
}
  0x3e   :  { %s6650_s5 = scalar_lea.vmem %s24_s17, 128  ;;  %p6655_p0 = scmp.lt.s32.totalorder %s24_s17, %s24_s17 }
  0x3f   :  { %p6651_p13 = scmp.ne.s32.totalorder %s24_s17, %s6650_s5  ;;  %p6656_p1 = scmp.lt.s32.totalorder %s6650_s5, %s6650_s5 }
  0x41   :  { %p6657_p2 = por %p6656_p1, %p6655_p0 }
  0x43   :  { %p6658_p3 = pnand %p6657_p2, %p6651_p13 }
  0x45   :  { %6661 = shalt.err (!%p6658_p3)
}
  0x46   :  { %26 = dma.hbm_to_vmem [thread:$0]  %s7081_s0, 128, %s24_s17, [#allocation4]  }
  0x47   :  { %s6662_s30 = scalar_lea.hbm %s7083_s2, 128 }
  0x48   :  { %p6663_p4 = scmp.ne.s32.totalorder %s7083_s2, %s6662_s30  ;;  %p6666_p5 = scmp.lt.u32.totalorder %s6662_s30, %s7083_s2 }
  0x4a   :  { %p6668_p6 = pnand %p6666_p5, %p6663_p4 }
  0x4c   :  { %6671 = shalt.err (!%p6668_p6)
}
  0x4d   :  { %s6672_s14 = scalar_lea.vmem %s46_s20, 128  ;;  %p6677_p8 = scmp.lt.s32.totalorder %s46_s20, %s46_s20 }
  0x4e   :  { %p6673_p7 = scmp.ne.s32.totalorder %s46_s20, %s6672_s14  ;;  %p6678_p9 = scmp.lt.s32.totalorder %s6672_s14, %s6672_s14 }
  0x50   :  { %p6679_p10 = por %p6678_p9, %p6677_p8 }
  0x52   :  { %p6680_p11 = pnand %p6679_p10, %p6673_p7 }
  0x54   :  { %6683 = shalt.err (!%p6680_p11)
}
  0x55   :  { %48 = dma.hbm_to_vmem [thread:$0]  %s7083_s2, 128, %s46_s20, [#allocation7]  }
  0x56   :  { %s6769_s11 = smov [#allocation11]   ;;  %s6770_s15 = smov [#allocation14]  }
  0x57   :  { %s67_s12 = sshll.u32 %s6769_s11, 4  ;;  %s89_s16 = sshll.u32 %s6770_s15, 4  ;;  %s68_s12 = int_to_ptr.vmem [resolvable:$true] %s67_s12  ;;  %s90_s16 = int_to_ptr.vmem [resolvable:$true] %s89_s16 }
  0x58   :  { %s6684_s21 = scalar_lea.hbm %s7085_s4, 128 }
  0x59   :  { %p6685_p12 = scmp.ne.s32.totalorder %s7085_s4, %s6684_s21  ;;  %p6688_p13 = scmp.lt.u32.totalorder %s6684_s21, %s7085_s4 }
  0x5b   :  { %p6690_p0 = pnand %p6688_p13, %p6685_p12 }
  0x5d   :  { %6693 = shalt.err (!%p6690_p0)
}
  0x5e   :  { %s6694_s2 = scalar_lea.vmem %s68_s12, 128  ;;  %p6699_p2 = scmp.lt.s32.totalorder %s68_s12, %s68_s12 }
  0x5f   :  { %p6695_p1 = scmp.ne.s32.totalorder %s68_s12, %s6694_s2  ;;  %p6700_p3 = scmp.lt.s32.totalorder %s6694_s2, %s6694_s2 }
  0x61   :  { %p6701_p4 = por %p6700_p3, %p6699_p2 }
  0x63   :  { %p6702_p5 = pnand %p6701_p4, %p6695_p1 }
  0x65   :  { %6705 = shalt.err (!%p6702_p5)
}
  0x66   :  { %70 = dma.hbm_to_vmem [thread:$0]  %s7085_s4, 128, %s68_s12, [#allocation10]  }
  0x67   :  { %s6706_s18 = scalar_lea.hbm %s7087_s6, 16 }
  0x68   :  { %p6707_p6 = scmp.ne.s32.totalorder %s7087_s6, %s6706_s18  ;;  %p6710_p7 = scmp.lt.u32.totalorder %s6706_s18, %s7087_s6 }
  0x6a   :  { %p6712_p8 = pnand %p6710_p7, %p6707_p6 }
  0x6c   :  { %6715 = shalt.err (!%p6712_p8)
}
  0x6d   :  { %s6716_s8 = scalar_lea.vmem %s90_s16, 16  ;;  %s6720_s9 = scalar_lea.vmem %s90_s16, 32 }
  0x6e   :  { %p6717_p9 = scmp.ne.s32.totalorder %s90_s16, %s6716_s8  ;;  %p6721_p10 = scmp.lt.s32.totalorder %s90_s16, %s90_s16 }
  0x6f   :  { %p6722_p11 = scmp.lt.s32.totalorder %s6720_s9, %s6716_s8 }
  0x71   :  { %p6723_p12 = por %p6722_p11, %p6721_p10 }
  0x73   :  { %p6724_p13 = pnand %p6723_p12, %p6717_p9 }
  0x75   :  { %6727 = shalt.err (!%p6724_p13)
}
  0x76   :  { %92 = dma.hbm_to_vmem [thread:$0]  %s7087_s6, 16, %s90_s16, [#allocation13]  }
  0x77   :  { %6750 = dma.done.wait [#allocation4], 128  }
  0x78   :  { %6751 = vsyncadd [#allocation4], 4294967168 }
  0x79   :  { %6752 = dma.done.wait [#allocation7], 16512  }
  0x7a   :  { %6753 = vsyncadd [#allocation7], 4294950784 }
  0x7b   :  { %6754 = dma.done.wait [#allocation10], 65664  }
  0x7c   :  { %6755 = vsyncadd [#allocation10], 4294901632 }
  0x7d   :  { %6756 = dma.done.wait [#allocation13], 8208  }
  0x7e   :  { %6757 = vsyncadd [#allocation13], 4294959088  ;;  %v178_v0 = vld [vmem:[#allocation6] sm:$0xff]  ;;  %v179_v17 = vld [vmem:[#allocation6 + $0x8] sm:$0xff]  ;;  %s6771_s6 = smov [#allocation15]  }
  0x7f   :  { %v182_v1 = vld [vmem:[#allocation6 + $0x20] sm:$0xff]  ;;  %v183_v18 = vld [vmem:[#allocation6 + $0x28] sm:$0xff]  ;;  %v6896_v19 = vld [vmem:[#allocation3] sm:$0xff]  ;;  %s5632_s13 = sshll.u32 %s6771_s6, 4  ;;  %s5633_s13 = int_to_ptr.vmem [resolvable:$true] %s5632_s13 }
  0x80   :  { %v186_v2 = vld [vmem:[#allocation6 + $0x40] sm:$0xff]  ;;  %v5647_v3 = vcombine.high %v178_v0, %v182_v1  ;;  %v5646_v4 = vcombine.low %v178_v0, %v182_v1  ;;  %v187_v20 = vld [vmem:[#allocation6 + $0x48] sm:$0xff]  ;;  %v5649_v22 = vcombine.high %v179_v17, %v183_v18  ;;  %v5648_v23 = vcombine.low %v179_v17, %v183_v18  ;;  %s6728_s14 = scalar_lea.vmem %s5633_s13, 128  ;;  %p6733_p1 = scmp.lt.s32.totalorder %s5633_s13, %s5633_s13 }
  0x81   :  { %v190_v5 = vld [vmem:[#allocation6 + $0x60] sm:$0xff]  ;;  %v6900_v24 = vcombine.high %v6896_v19, %v6896_v19  ;;  %v191_v25 = vld [vmem:[#allocation6 + $0x68] sm:$0xff]  ;;  %p6729_p0 = scmp.ne.s32.totalorder %s5633_s13, %s6728_s14  ;;  %p6734_p2 = scmp.lt.s32.totalorder %s6728_s14, %s6728_s14 }
  0x82   :  { %v5655_v6 = vcombine.high %v186_v2, %v190_v5  ;;  %v194_v7 = vld [vmem:[#allocation6 + $0x80] sm:$0xff]  ;;  %953 = vmatprep.subr.bf16.mxu0 %v5647_v3  ;;  %v5654_v9 = vcombine.low %v186_v2, %v190_v5  ;;  %v5657_v27 = vcombine.high %v187_v20, %v191_v25  ;;  %v195_v28 = vld [vmem:[#allocation6 + $0x88] sm:$0xff]  ;;  %994 = vmatprep.subr.bf16.mxu1 %v5649_v22 }
  0x83   :  { %v198_v8 = vld [vmem:[#allocation6 + $0xa0] sm:$0xff]  ;;  %954 = vmatpush1.bf16.msra.mxu0 %v5646_v4  ;;  %v199_v29 = vld [vmem:[#allocation6 + $0xa8] sm:$0xff]  ;;  %985 = vmatprep.mubr.bf16.mxu0 %v6900_v24  ;;  %v5656_v32 = vcombine.low %v187_v20, %v191_v25  ;;  %p6735_p3 = por %p6734_p2, %p6733_p1 }
  0x84   :  { %955 = vmatprep.subr.bf16.mxu0 %v5655_v6  ;;  %v5663_v10 = vcombine.high %v194_v7, %v198_v8  ;;  %v202_v11 = vld [vmem:[#allocation6 + $0xc0] sm:$0xff]  ;;  %v5662_v13 = vcombine.low %v194_v7, %v198_v8  ;;  %995 = vmatpush1.bf16.msra.mxu1 %v5648_v23  ;;  %v5665_v34 = vcombine.high %v195_v28, %v199_v29  ;;  %v203_v36 = vld [vmem:[#allocation6 + $0xc8] sm:$0xff] }
  0x85   :  { %v206_v12 = vld [vmem:[#allocation6 + $0xe0] sm:$0xff]  ;;  %996 = vmatprep.subr.bf16.mxu1 %v5657_v27  ;;  %v207_v37 = vld [vmem:[#allocation6 + $0xe8] sm:$0xff]  ;;  %1026 = vmatprep.mubr.bf16.mxu1 %v6900_v24  ;;  %v5664_v40 = vcombine.low %v195_v28, %v199_v29  ;;  %p6736_p4 = pnand %p6735_p3, %p6729_p0 }
  0x86   :  { %v5671_v14 = vcombine.high %v202_v11, %v206_v12  ;;  %v210_v15 = vld [vmem:[#allocation6 + $0x100] sm:$0xff]  ;;  %v5670_v21 = vcombine.low %v202_v11, %v206_v12  ;;  %v5673_v42 = vcombine.high %v203_v36, %v207_v37  ;;  %v211_v44 = vld [vmem:[#allocation6 + $0x108] sm:$0xff]  ;;  %v5672_v48 = vcombine.low %v203_v36, %v207_v37 }
  0x87   :  { %956 = vmatpush1.bf16.msra.mxu0 %v5654_v9  ;;  %v214_v16 = vld [vmem:[#allocation6 + $0x120] sm:$0xff]  ;;  %v215_v45 = vld [vmem:[#allocation6 + $0x128] sm:$0xff] }
  0x88   :  { %957 = vmatprep.subr.bf16.mxu0 %v5663_v10  ;;  %v5679_v26 = vcombine.high %v210_v15, %v214_v16  ;;  %v218_v30 = vld [vmem:[#allocation6 + $0x140] sm:$0xff]  ;;  %v5678_v33 = vcombine.low %v210_v15, %v214_v16  ;;  %997 = vmatpush1.bf16.msra.mxu1 %v5656_v32  ;;  %v5681_v50 = vcombine.high %v211_v44, %v215_v45  ;;  %v219_v52 = vld [vmem:[#allocation6 + $0x148] sm:$0xff] }
  0x89   :  { %v222_v31 = vld [vmem:[#allocation6 + $0x160] sm:$0xff]  ;;  %998 = vmatprep.subr.bf16.mxu1 %v5665_v34  ;;  %v223_v53 = vld [vmem:[#allocation6 + $0x168] sm:$0xff]  ;;  %v5680_v56 = vcombine.low %v211_v44, %v215_v45 }
  0x8a   :  { %v5687_v35 = vcombine.high %v218_v30, %v222_v31  ;;  %v226_v38 = vld [vmem:[#allocation6 + $0x180] sm:$0xff]  ;;  %v5686_v41 = vcombine.low %v218_v30, %v222_v31  ;;  %v5689_v58 = vcombine.high %v219_v52, %v223_v53  ;;  %v227_v60 = vld [vmem:[#allocation6 + $0x188] sm:$0xff]  ;;  %v5688_v0 = vcombine.low %v219_v52, %v223_v53 }
  0x8b   :  { %958 = vmatpush1.bf16.msra.mxu0 %v5662_v13  ;;  %v230_v39 = vld [vmem:[#allocation6 + $0x1a0] sm:$0xff]  ;;  %v231_v61 = vld [vmem:[#allocation6 + $0x1a8] sm:$0xff] }
  0x8c   :  { %959 = vmatprep.subr.bf16.mxu0 %v5671_v14  ;;  %v5695_v43 = vcombine.high %v226_v38, %v230_v39  ;;  %v234_v46 = vld [vmem:[#allocation6 + $0x1c0] sm:$0xff]  ;;  %999 = vmatpush1.bf16.msra.mxu1 %v5664_v40  ;;  %v5694_v49 = vcombine.low %v226_v38, %v230_v39  ;;  %v5697_v2 = vcombine.high %v227_v60, %v231_v61  ;;  %v235_v4 = vld [vmem:[#allocation6 + $0x1c8] sm:$0xff] }
  0x8d   :  { %v238_v47 = vld [vmem:[#allocation6 + $0x1e0] sm:$0xff]  ;;  %1000 = vmatprep.subr.bf16.mxu1 %v5673_v42  ;;  %v239_v5 = vld [vmem:[#allocation6 + $0x1e8] sm:$0xff]  ;;  %v5696_v8 = vcombine.low %v227_v60, %v231_v61 }
  0x8e   :  { %v5703_v51 = vcombine.high %v234_v46, %v238_v47  ;;  %v242_v54 = vld [vmem:[#allocation6 + $0x200] sm:$0xff]  ;;  %v5702_v57 = vcombine.low %v234_v46, %v238_v47  ;;  %v5705_v10 = vcombine.high %v235_v4, %v239_v5  ;;  %v243_v12 = vld [vmem:[#allocation6 + $0x208] sm:$0xff]  ;;  %v5704_v16 = vcombine.low %v235_v4, %v239_v5 }
  0x8f   :  { %960 = vmatpush1.bf16.msra.mxu0 %v5670_v21  ;;  %v246_v55 = vld [vmem:[#allocation6 + $0x220] sm:$0xff]  ;;  %v247_v13 = vld [vmem:[#allocation6 + $0x228] sm:$0xff] }
  0x90   :  { %961 = vmatprep.subr.bf16.mxu0 %v5679_v26  ;;  %1001 = vmatpush1.bf16.msra.mxu1 %v5672_v48  ;;  %v5711_v59 = vcombine.high %v242_v54, %v246_v55  ;;  %v250_v62 = vld [vmem:[#allocation6 + $0x240] sm:$0xff]  ;;  %v5710_v1 = vcombine.low %v242_v54, %v246_v55  ;;  %v5713_v18 = vcombine.high %v243_v12, %v247_v13  ;;  %v251_v21 = vld [vmem:[#allocation6 + $0x248] sm:$0xff] }
  0x91   :  { %1002 = vmatprep.subr.bf16.mxu1 %v5681_v50  ;;  %v254_v63 = vld [vmem:[#allocation6 + $0x260] sm:$0xff]  ;;  %v255_v22 = vld [vmem:[#allocation6 + $0x268] sm:$0xff]  ;;  %v5712_v26 = vcombine.low %v243_v12, %v247_v13  ;;  %v181_v12 = vld [vmem:[#allocation6 + $0x18] sm:$0xff] }
  0x92   :  { %v5719_v3 = vcombine.high %v250_v62, %v254_v63  ;;  %v258_v6 = vld [vmem:[#allocation6 + $0x280] sm:$0xff]  ;;  %v5718_v9 = vcombine.low %v250_v62, %v254_v63  ;;  %v5721_v28 = vcombine.high %v251_v21, %v255_v22  ;;  %v259_v30 = vld [vmem:[#allocation6 + $0x288] sm:$0xff]  ;;  %v5720_v34 = vcombine.low %v251_v21, %v255_v22  ;;  %v188_v63 = vld [vmem:[#allocation6 + $0x50] sm:$0xff] }
  0x93   :  { %962 = vmatpush1.bf16.msra.mxu0 %v5678_v33  ;;  %v262_v7 = vld [vmem:[#allocation6 + $0x2a0] sm:$0xff]  ;;  %v263_v31 = vld [vmem:[#allocation6 + $0x2a8] sm:$0xff]  ;;  %v193_v21 = vld [vmem:[#allocation6 + $0x78] sm:$0xff] }
  0x94   :  { %963 = vmatprep.subr.bf16.mxu0 %v5687_v35  ;;  %1003 = vmatpush1.bf16.msra.mxu1 %v5680_v56  ;;  %v5727_v11 = vcombine.high %v258_v6, %v262_v7  ;;  %v266_v14 = vld [vmem:[#allocation6 + $0x2c0] sm:$0xff]  ;;  %v5726_v17 = vcombine.low %v258_v6, %v262_v7  ;;  %v5729_v36 = vcombine.high %v259_v30, %v263_v31  ;;  %v267_v38 = vld [vmem:[#allocation6 + $0x2c8] sm:$0xff]  ;;  %v180_v56 = vld [vmem:[#allocation6 + $0x10] sm:$0xff] }
  0x95   :  { %1004 = vmatprep.subr.bf16.mxu1 %v5689_v58  ;;  %v270_v15 = vld [vmem:[#allocation6 + $0x2e0] sm:$0xff]  ;;  %v271_v39 = vld [vmem:[#allocation6 + $0x2e8] sm:$0xff]  ;;  %v5728_v42 = vcombine.low %v259_v30, %v263_v31  ;;  %v201_v30 = vld [vmem:[#allocation6 + $0xb8] sm:$0xff] }
  0x96   :  { %v5735_v20 = vcombine.high %v266_v14, %v270_v15  ;;  %v274_v23 = vld [vmem:[#allocation6 + $0x300] sm:$0xff]  ;;  %v5734_v27 = vcombine.low %v266_v14, %v270_v15  ;;  %v5737_v44 = vcombine.high %v267_v38, %v271_v39  ;;  %v275_v46 = vld [vmem:[#allocation6 + $0x308] sm:$0xff]  ;;  %v5736_v50 = vcombine.low %v267_v38, %v271_v39  ;;  %v204_v14 = vld [vmem:[#allocation6 + $0xd0] sm:$0xff] }
  0x97   :  { %964 = vmatpush1.bf16.msra.mxu0 %v5686_v41  ;;  %v278_v25 = vld [vmem:[#allocation6 + $0x320] sm:$0xff]  ;;  %v279_v47 = vld [vmem:[#allocation6 + $0x328] sm:$0xff]  ;;  %v208_v15 = vld [vmem:[#allocation6 + $0xf0] sm:$0xff] }
  0x98   :  { %965 = vmatprep.subr.bf16.mxu0 %v5695_v43  ;;  %1005 = vmatpush1.bf16.msra.mxu1 %v5688_v0  ;;  %v5743_v29 = vcombine.high %v274_v23, %v278_v25  ;;  %v282_v32 = vld [vmem:[#allocation6 + $0x340] sm:$0xff]  ;;  %v5742_v35 = vcombine.low %v274_v23, %v278_v25  ;;  %v5745_v52 = vcombine.high %v275_v46, %v279_v47  ;;  %v283_v54 = vld [vmem:[#allocation6 + $0x348] sm:$0xff]  ;;  %v192_v0 = vld [vmem:[#allocation6 + $0x70] sm:$0xff] }
  0x99   :  { %1006 = vmatprep.subr.bf16.mxu1 %v5697_v2  ;;  %v286_v33 = vld [vmem:[#allocation6 + $0x360] sm:$0xff]  ;;  %v287_v55 = vld [vmem:[#allocation6 + $0x368] sm:$0xff]  ;;  %v5744_v58 = vcombine.low %v275_v46, %v279_v47  ;;  %v6906_v2 = vcombine.low %v6896_v19, %v6896_v19  ;;  %v5658_v13 = vcombine.low %v188_v63, %v192_v0  ;;  %v212_v23 = vld [vmem:[#allocation6 + $0x110] sm:$0xff]  ;;  %v5674_v31 = vcombine.low %v204_v14, %v208_v15 }
  0x9a   :  { %v5751_v37 = vcombine.high %v282_v32, %v286_v33  ;;  %v290_v40 = vld [vmem:[#allocation6 + $0x380] sm:$0xff]  ;;  %v5750_v43 = vcombine.low %v282_v32, %v286_v33  ;;  %v295_v60 = vld [vmem:[#allocation6 + $0x3a8] sm:$0xff]  ;;  %v5753_v62 = vcombine.high %v283_v54, %v287_v55  ;;  %v216_v25 = vld [vmem:[#allocation6 + $0x130] sm:$0xff] }
  0x9b   :  { %966 = vmatpush1.bf16.msra.mxu0 %v5694_v49  ;;  %v294_v41 = vld [vmem:[#allocation6 + $0x3a0] sm:$0xff]  ;;  %v299_v4 = vld [vmem:[#allocation6 + $0x3c8] sm:$0xff]  ;;  %v220_v32 = vld [vmem:[#allocation6 + $0x150] sm:$0xff]  ;;  %v5682_v39 = vcombine.low %v212_v23, %v216_v25 }
  0x9c   :  { %967 = vmatprep.subr.bf16.mxu0 %v5703_v51  ;;  %1007 = vmatpush1.bf16.msra.mxu1 %v5696_v8  ;;  %v5759_v45 = vcombine.high %v290_v40, %v294_v41  ;;  %v298_v48 = vld [vmem:[#allocation6 + $0x3c0] sm:$0xff]  ;;  %v5758_v51 = vcombine.low %v290_v40, %v294_v41  ;;  %v303_v5 = vld [vmem:[#allocation6 + $0x3e8] sm:$0xff]  ;;  %v196_v8 = vld [vmem:[#allocation6 + $0x90] sm:$0xff] }
  0x9d   :  { %1008 = vmatprep.subr.bf16.mxu1 %v5705_v10  ;;  %v302_v49 = vld [vmem:[#allocation6 + $0x3e0] sm:$0xff]  ;;  %v5659_v10 = vcombine.high %v188_v63, %v192_v0  ;;  %v5769_v19 = vcombine.high %v299_v4, %v303_v5  ;;  %v224_v33 = vld [vmem:[#allocation6 + $0x170] sm:$0xff]  ;;  %v209_v38 = vld [vmem:[#allocation6 + $0xf8] sm:$0xff] }
  0x9e   :  { %v5767_v53 = vcombine.high %v298_v48, %v302_v49  ;;  %v5766_v61 = vcombine.low %v298_v48, %v302_v49  ;;  %v228_v40 = vld [vmem:[#allocation6 + $0x190] sm:$0xff]  ;;  %v217_v46 = vld [vmem:[#allocation6 + $0x138] sm:$0xff]  ;;  %v5690_v47 = vcombine.low %v220_v32, %v224_v33 }
  0x9f   :  { %968 = vmatpush1.bf16.msra.mxu0 %v5702_v57  ;;  %v184_v57 = vld [vmem:[#allocation6 + $0x30] sm:$0xff] }
  0xa0   :  { %969 = vmatprep.subr.bf16.mxu0 %v5711_v59  ;;  %1009 = vmatpush1.bf16.msra.mxu1 %v5704_v16  ;;  %v291_v59 = vld [vmem:[#allocation6 + $0x388] sm:$0xff]  ;;  %v5650_v7 = vcombine.low %v180_v56, %v184_v57  ;;  %v232_v41 = vld [vmem:[#allocation6 + $0x1b0] sm:$0xff] }
  0xa1   :  { %1010 = vmatprep.subr.bf16.mxu1 %v5713_v18  ;;  %v5761_v6 = vcombine.high %v291_v59, %v295_v60  ;;  %v5768_v18 = vcombine.low %v299_v4, %v303_v5  ;;  %v236_v48 = vld [vmem:[#allocation6 + $0x1d0] sm:$0xff]  ;;  %v237_v5 = vld [vmem:[#allocation6 + $0x1d8] sm:$0xff] }
  0xa2   :  { %v240_v49 = vld [vmem:[#allocation6 + $0x1f0] sm:$0xff] }
  0xa3   :  { %970 = vmatpush1.bf16.msra.mxu0 %v5710_v1  ;;  %v5651_v1 = vcombine.high %v180_v56, %v184_v57  ;;  %v248_v56 = vld [vmem:[#allocation6 + $0x230] sm:$0xff] }
  0xa4   :  { %971 = vmatprep.subr.bf16.mxu0 %v5719_v3  ;;  %1011 = vmatpush1.bf16.msra.mxu1 %v5712_v26  ;;  %v5752_v3 = vcombine.low %v283_v54, %v287_v55  ;;  %v5698_v54 = vcombine.low %v228_v40, %v232_v41  ;;  %v244_v55 = vld [vmem:[#allocation6 + $0x210] sm:$0xff] }
  0xa5   :  { %1012 = vmatprep.subr.bf16.mxu1 %v5721_v28  ;;  %v252_v63 = vld [vmem:[#allocation6 + $0x250] sm:$0xff] }
  0xa6   :  { %v256_v0 = vld [vmem:[#allocation6 + $0x270] sm:$0xff] }
  0xa7   :  { %972 = vmatpush1.bf16.msra.mxu0 %v5718_v9  ;;  %v200_v9 = vld [vmem:[#allocation6 + $0xb0] sm:$0xff] }
  0xa8   :  { %973 = vmatprep.subr.bf16.mxu0 %v5727_v11  ;;  %1013 = vmatpush1.bf16.msra.mxu1 %v5720_v34  ;;  %v5760_v11 = vcombine.low %v291_v59, %v295_v60  ;;  %v5667_v16 = vcombine.high %v196_v8, %v200_v9  ;;  %v5666_v22 = vcombine.low %v196_v8, %v200_v9  ;;  %v229_v60 = vld [vmem:[#allocation6 + $0x198] sm:$0xff]  ;;  %v260_v8 = vld [vmem:[#allocation6 + $0x290] sm:$0xff] }
  0xa9   :  { %1014 = vmatprep.subr.bf16.mxu1 %v5729_v36  ;;  %v264_v9 = vld [vmem:[#allocation6 + $0x2b0] sm:$0xff] }
  0xab   :  { %974 = vmatpush1.bf16.msra.mxu0 %v5726_v17  ;;  %v185_v17 = vld [vmem:[#allocation6 + $0x38] sm:$0xff] }
  0xac   :  { %975 = vmatprep.subr.bf16.mxu0 %v5735_v20  ;;  %1015 = vmatpush1.bf16.msra.mxu1 %v5728_v42  ;;  %v189_v20 = vld [vmem:[#allocation6 + $0x58] sm:$0xff]  ;;  %v5653_v26 = vcombine.high %v181_v12, %v185_v17  ;;  %v5652_v28 = vcombine.low %v181_v12, %v185_v17 }
  0xad   :  { %1016 = vmatprep.subr.bf16.mxu1 %v5737_v44  ;;  %v5661_v34 = vcombine.high %v189_v20, %v193_v21  ;;  %v5660_v36 = vcombine.low %v189_v20, %v193_v21  ;;  %v5730_v21 = vcombine.low %v260_v8, %v264_v9 }
  0xaf   :  { %976 = vmatpush1.bf16.msra.mxu0 %v5734_v27  ;;  %v5675_v27 = vcombine.high %v204_v14, %v208_v15  ;;  %v5722_v14 = vcombine.low %v252_v63, %v256_v0  ;;  %v268_v15 = vld [vmem:[#allocation6 + $0x2d0] sm:$0xff] }
  0xb0   :  { %977 = vmatprep.subr.bf16.mxu0 %v5743_v29  ;;  %1017 = vmatpush1.bf16.msra.mxu1 %v5736_v50  ;;  %v197_v29 = vld [vmem:[#allocation6 + $0x98] sm:$0xff] }
  0xb1   :  { %1018 = vmatprep.subr.bf16.mxu1 %v5745_v52  ;;  %v5669_v42 = vcombine.high %v197_v29, %v201_v30  ;;  %v5668_v44 = vcombine.low %v197_v29, %v201_v30  ;;  %v221_v52 = vld [vmem:[#allocation6 + $0x158] sm:$0xff] }
  0xb3   :  { %978 = vmatpush1.bf16.msra.mxu0 %v5742_v35  ;;  %v5683_v35 = vcombine.high %v212_v23, %v216_v25  ;;  %v253_v25 = vld [vmem:[#allocation6 + $0x258] sm:$0xff] }
  0xb4   :  { %979 = vmatprep.subr.bf16.mxu0 %v5751_v37  ;;  %1019 = vmatpush1.bf16.msra.mxu1 %v5744_v58  ;;  %v205_v37 = vld [vmem:[#allocation6 + $0xd8] sm:$0xff]  ;;  %v5707_v58 = vcombine.high %v236_v48, %v240_v49 }
  0xb5   :  { %1020 = vmatprep.subr.bf16.mxu1 %v5753_v62  ;;  %v5677_v50 = vcombine.high %v205_v37, %v209_v38  ;;  %v5706_v62 = vcombine.low %v236_v48, %v240_v49  ;;  %v277_v49 = vld [vmem:[#allocation6 + $0x318] sm:$0xff] }
  0xb7   :  { %980 = vmatpush1.bf16.msra.mxu0 %v5750_v43  ;;  %v5691_v43 = vcombine.high %v220_v32, %v224_v33  ;;  %v261_v33 = vld [vmem:[#allocation6 + $0x298] sm:$0xff] }
  0xb8   :  { %981 = vmatprep.subr.bf16.mxu0 %v5759_v45  ;;  %1021 = vmatpush1.bf16.msra.mxu1 %v5752_v3  ;;  %v213_v45 = vld [vmem:[#allocation6 + $0x118] sm:$0xff]  ;;  %v5715_v3 = vcombine.high %v244_v55, %v248_v56 }
  0xb9   :  { %1022 = vmatprep.subr.bf16.mxu1 %v5761_v6  ;;  %v5685_v57 = vcombine.high %v213_v45, %v217_v46  ;;  %v5684_v59 = vcombine.low %v213_v45, %v217_v46  ;;  %v241_v6 = vld [vmem:[#allocation6 + $0x1f8] sm:$0xff] }
  0xba   :  { %v5709_v17 = vcombine.high %v237_v5, %v241_v6  ;;  %v5708_v20 = vcombine.low %v237_v5, %v241_v6 }
  0xbb   :  { %982 = vmatpush1.bf16.msra.mxu0 %v5758_v51  ;;  %v5676_v51 = vcombine.low %v205_v37, %v209_v38 }
  0xbc   :  { %983 = vmatprep.subr.bf16.mxu0 %v5767_v53  ;;  %1023 = vmatpush1.bf16.msra.mxu1 %v5760_v11  ;;  %v225_v53 = vld [vmem:[#allocation6 + $0x178] sm:$0xff]  ;;  %v5723_v11 = vcombine.high %v252_v63, %v256_v0 }
  0xbd   :  { %1024 = vmatprep.subr.bf16.mxu1 %v5769_v19  ;;  %v5692_v4 = vcombine.low %v221_v52, %v225_v53  ;;  %v245_v19 = vld [vmem:[#allocation6 + $0x218] sm:$0xff] }
  0xbe   :  { %v293_v63 = vld [vmem:[#allocation6 + $0x398] sm:$0xff] }
  0xbf   :  { %984 = vmatpush1.bf16.msra.mxu0 %v5766_v61  ;;  %v233_v61 = vld [vmem:[#allocation6 + $0x1b8] sm:$0xff] }
  0xc0   :  { %1035 = vmatprep.subr.bf16.mxu0 %v5651_v1  ;;  %1025 = vmatpush1.bf16.msra.mxu1 %v5768_v18  ;;  %v5693_v1 = vcombine.high %v221_v52, %v225_v53  ;;  %v5700_v12 = vcombine.low %v229_v60, %v233_v61  ;;  %v5731_v18 = vcombine.high %v260_v8, %v264_v9  ;;  %v297_v0 = vld [vmem:[#allocation6 + $0x3b8] sm:$0xff] }
  0xc1   :  { %1076 = vmatprep.subr.bf16.mxu1 %v5653_v26  ;;  %v257_v26 = vld [vmem:[#allocation6 + $0x278] sm:$0xff]  ;;  %v5765_v6 = vcombine.high %v293_v63, %v297_v0 }
  0xc2   :  { %986 = vmatmul.mubr.bf16.vlgmr.msra.gmra.mrb[0].mxu0 %v6906_v2  ;;  %v5724_v37 = vcombine.low %v253_v25, %v257_v26  ;;  %v301_v8 = vld [vmem:[#allocation6 + $0x3d8] sm:$0xff] }
  0xc3   :  { %1036 = vmatpush1.bf16.msra.mxu0 %v5650_v7  ;;  %1067 = vmatprep.mubr.bf16.mxu0 %v6900_v24  ;;  %v5714_v7 = vcombine.low %v244_v55, %v248_v56  ;;  %v285_v56 = vld [vmem:[#allocation6 + $0x358] sm:$0xff] }
  0xc4   :  { %1037 = vmatprep.subr.bf16.mxu0 %v5659_v10  ;;  %1027 = vmatmul.mubr.bf16.vlgmr.msra.gmra.mrb[0].mxu1 %v6906_v2  ;;  %v5701_v10 = vcombine.high %v229_v60, %v233_v61  ;;  %v305_v9 = vld [vmem:[#allocation6 + $0x3f8] sm:$0xff] }
  0xc5   :  { %1077 = vmatpush1.bf16.msra.mxu1 %v5652_v28  ;;  %1108 = vmatprep.mubr.bf16.mxu1 %v6900_v24  ;;  %v5699_v24 = vcombine.high %v228_v40, %v232_v41  ;;  %v280_v28 = vld [vmem:[#allocation6 + $0x330] sm:$0xff]  ;;  %v269_v41 = vld [vmem:[#allocation6 + $0x2d8] sm:$0xff] }
  0xc6   :  { %1078 = vmatprep.subr.bf16.mxu1 %v5661_v34  ;;  %v265_v34 = vld [vmem:[#allocation6 + $0x2b8] sm:$0xff] }
  0xc7   :  { %1038 = vmatpush1.bf16.msra.mxu0 %v5658_v13  ;;  %v249_v13 = vld [vmem:[#allocation6 + $0x238] sm:$0xff]  ;;  %v5732_v45 = vcombine.low %v261_v33, %v265_v34 }
  0xc8   :  { %1039 = vmatprep.subr.bf16.mxu0 %v5667_v16  ;;  %v272_v16 = vld [vmem:[#allocation6 + $0x2f0] sm:$0xff]  ;;  %v5716_v29 = vcombine.low %v245_v19, %v249_v13 }
  0xc9   :  { %1079 = vmatpush1.bf16.msra.mxu1 %v5660_v36  ;;  %v5739_v23 = vcombine.high %v268_v15, %v272_v16  ;;  %v5738_v30 = vcombine.low %v268_v15, %v272_v16  ;;  %v288_v36 = vld [vmem:[#allocation6 + $0x370] sm:$0xff] }
  0xca   :  { %1080 = vmatprep.subr.bf16.mxu1 %v5669_v42  ;;  %v273_v42 = vld [vmem:[#allocation6 + $0x2f8] sm:$0xff]  ;;  %v1161_v15 = vld [vmem:[#allocation9 + $0x8] sm:$0xff] }
  0xcb   :  { %1040 = vmatpush1.bf16.msra.mxu0 %v5666_v22  ;;  %v5717_v22 = vcombine.high %v245_v19, %v249_v13  ;;  %v5740_v52 = vcombine.low %v269_v41, %v273_v42  ;;  %v5764_v19 = vcombine.low %v293_v63, %v297_v0  ;;  %v5773_v13 = vcombine.high %v301_v8, %v305_v9  ;;  %v1165_v16 = vld [vmem:[#allocation9 + $0x28] sm:$0xff] }
  0xcc   :  { %1041 = vmatprep.subr.bf16.mxu0 %v5675_v27  ;;  %v276_v27 = vld [vmem:[#allocation6 + $0x310] sm:$0xff] }
  0xcd   :  { %1081 = vmatpush1.bf16.msra.mxu1 %v5668_v44  ;;  %v5747_v32 = vcombine.high %v276_v27, %v280_v28  ;;  %v5746_v38 = vcombine.low %v276_v27, %v280_v28  ;;  %v296_v44 = vld [vmem:[#allocation6 + $0x3b0] sm:$0xff]  ;;  %v1192_v28 = vld [vmem:[#allocation9 + $0x100] sm:$0xff] }
  0xce   :  { %1082 = vmatprep.subr.bf16.mxu1 %v5677_v50  ;;  %v281_v50 = vld [vmem:[#allocation6 + $0x338] sm:$0xff]  ;;  %v6918_v63 = vld [vmem:[#allocation9 + $0x408] sm:$0xff] }
  0xcf   :  { %1042 = vmatpush1.bf16.msra.mxu0 %v5674_v31  ;;  %v5725_v31 = vcombine.high %v253_v25, %v257_v26  ;;  %v5748_v60 = vcombine.low %v277_v49, %v281_v50  ;;  %v1169_v25 = vld [vmem:[#allocation9 + $0x48] sm:$0xff] }
  0xd0   :  { %1043 = vmatprep.subr.bf16.mxu0 %v5683_v35  ;;  %v284_v35 = vld [vmem:[#allocation6 + $0x350] sm:$0xff] }
  0xd1   :  { %1083 = vmatpush1.bf16.msra.mxu1 %v5676_v51  ;;  %v5755_v40 = vcombine.high %v284_v35, %v288_v36  ;;  %v5754_v46 = vcombine.low %v284_v35, %v288_v36  ;;  %v304_v51 = vld [vmem:[#allocation6 + $0x3f0] sm:$0xff]  ;;  %v1200_v36 = vld [vmem:[#allocation9 + $0x140] sm:$0xff] }
  0xd2   :  { %1084 = vmatprep.subr.bf16.mxu1 %v5685_v57  ;;  %v289_v57 = vld [vmem:[#allocation6 + $0x378] sm:$0xff]  ;;  %v1173_v26 = vld [vmem:[#allocation9 + $0x68] sm:$0xff] }
  0xd3   :  { %1044 = vmatpush1.bf16.msra.mxu0 %v5682_v39  ;;  %v5733_v39 = vcombine.high %v261_v33, %v265_v34  ;;  %v5756_v5 = vcombine.low %v285_v56, %v289_v57  ;;  %v1177_v33 = vld [vmem:[#allocation9 + $0x88] sm:$0xff] }
  0xd4   :  { %1045 = vmatprep.subr.bf16.mxu0 %v5691_v43  ;;  %v292_v43 = vld [vmem:[#allocation6 + $0x390] sm:$0xff] }
  0xd5   :  { %1085 = vmatpush1.bf16.msra.mxu1 %v5684_v59  ;;  %v5763_v48 = vcombine.high %v292_v43, %v296_v44  ;;  %v5762_v53 = vcombine.low %v292_v43, %v296_v44  ;;  %v1164_v59 = vld [vmem:[#allocation9 + $0x20] sm:$0xff]  ;;  %v1181_v34 = vld [vmem:[#allocation9 + $0xa8] sm:$0xff] }
  0xd6   :  { %1086 = vmatprep.subr.bf16.mxu1 %v5693_v1  ;;  %v1208_v44 = vld [vmem:[#allocation9 + $0x180] sm:$0xff] }
  0xd7   :  { %1046 = vmatpush1.bf16.msra.mxu0 %v5690_v47  ;;  %v5741_v47 = vcombine.high %v269_v41, %v273_v42  ;;  %v1185_v41 = vld [vmem:[#allocation9 + $0xc8] sm:$0xff] }
  0xd8   :  { %1047 = vmatprep.subr.bf16.mxu0 %v5699_v24  ;;  %v300_v24 = vld [vmem:[#allocation6 + $0x3d0] sm:$0xff] }
  0xd9   :  { %1087 = vmatpush1.bf16.msra.mxu1 %v5692_v4  ;;  %v5771_v55 = vcombine.high %v300_v24, %v304_v51  ;;  %v5770_v61 = vcombine.low %v300_v24, %v304_v51  ;;  %v1172_v4 = vld [vmem:[#allocation9 + $0x60] sm:$0xff]  ;;  %v1189_v42 = vld [vmem:[#allocation9 + $0xe8] sm:$0xff] }
  0xda   :  { %1088 = vmatprep.subr.bf16.mxu1 %v5701_v10  ;;  %v1216_v24 = vld [vmem:[#allocation9 + $0x1c0] sm:$0xff] }
  0xdb   :  { %1048 = vmatpush1.bf16.msra.mxu0 %v5698_v54  ;;  %v5749_v54 = vcombine.high %v277_v49, %v281_v50  ;;  %v1197_v49 = vld [vmem:[#allocation9 + $0x128] sm:$0xff]  ;;  %v1220_v51 = vld [vmem:[#allocation9 + $0x1e0] sm:$0xff] }
  0xdc   :  { %1049 = vmatprep.subr.bf16.mxu0 %v5707_v58  ;;  %v1160_v58 = vld [vmem:[#allocation9] sm:$0xff] }
  0xdd   :  { %1089 = vmatpush1.bf16.msra.mxu1 %v5700_v12  ;;  %v5775_v1 = vcombine.high %v1160_v58, %v1164_v59  ;;  %v1180_v12 = vld [vmem:[#allocation9 + $0xa0] sm:$0xff] }
  0xde   :  { %1090 = vmatprep.subr.bf16.mxu1 %v5709_v17 }
  0xdf   :  { %1050 = vmatpush1.bf16.msra.mxu0 %v5706_v62  ;;  %v5757_v62 = vcombine.high %v285_v56, %v289_v57  ;;  %v1205_v56 = vld [vmem:[#allocation9 + $0x168] sm:$0xff]  ;;  %v5831_v57 = vcombine.high %v1216_v24, %v1220_v51 }
  0xe0   :  { %1051 = vmatprep.subr.bf16.mxu0 %v5715_v3  ;;  %v1168_v3 = vld [vmem:[#allocation9 + $0x40] sm:$0xff] }
  0xe1   :  { %1091 = vmatpush1.bf16.msra.mxu1 %v5708_v20  ;;  %v5783_v10 = vcombine.high %v1168_v3, %v1172_v4  ;;  %v1188_v20 = vld [vmem:[#allocation9 + $0xe0] sm:$0xff] }
  0xe2   :  { %1092 = vmatprep.subr.bf16.mxu1 %v5717_v22  ;;  %v5777_v22 = vcombine.high %v1161_v15, %v1165_v16 }
  0xe3   :  { %1052 = vmatpush1.bf16.msra.mxu0 %v5714_v7  ;;  %v5774_v7 = vcombine.low %v1160_v58, %v1164_v59  ;;  %v1224_v58 = vld [vmem:[#allocation9 + $0x200] sm:$0xff] }
  0xe4   :  { %1053 = vmatprep.subr.bf16.mxu0 %v5723_v11  ;;  %v1176_v11 = vld [vmem:[#allocation9 + $0x80] sm:$0xff] }
  0xe5   :  { %1093 = vmatpush1.bf16.msra.mxu1 %v5716_v29  ;;  %v5791_v17 = vcombine.high %v1176_v11, %v1180_v12  ;;  %v1196_v29 = vld [vmem:[#allocation9 + $0x120] sm:$0xff] }
  0xe6   :  { %1094 = vmatprep.subr.bf16.mxu1 %v5725_v31  ;;  %v5785_v31 = vcombine.high %v1169_v25, %v1173_v26  ;;  %v5807_v35 = vcombine.high %v1192_v28, %v1196_v29  ;;  %v1228_v59 = vld [vmem:[#allocation9 + $0x220] sm:$0xff] }
  0xe7   :  { %1054 = vmatpush1.bf16.msra.mxu0 %v5722_v14  ;;  %v5782_v14 = vcombine.low %v1168_v3, %v1172_v4  ;;  %v6920_v3 = vld [vmem:[#allocation9 + $0x428] sm:$0xff] }
  0xe8   :  { %1055 = vmatprep.subr.bf16.mxu0 %v5731_v18  ;;  %v1184_v18 = vld [vmem:[#allocation9 + $0xc0] sm:$0xff]  ;;  %v1209_v4 = vld [vmem:[#allocation9 + $0x188] sm:$0xff] }
  0xe9   :  { %1095 = vmatpush1.bf16.msra.mxu1 %v5724_v37  ;;  %v5799_v27 = vcombine.high %v1184_v18, %v1188_v20  ;;  %v1204_v37 = vld [vmem:[#allocation9 + $0x160] sm:$0xff] }
  0xea   :  { %1096 = vmatprep.subr.bf16.mxu1 %v5733_v39  ;;  %v5793_v39 = vcombine.high %v1177_v33, %v1181_v34  ;;  %v5815_v43 = vcombine.high %v1200_v36, %v1204_v37 }
  0xeb   :  { %1056 = vmatpush1.bf16.msra.mxu0 %v5730_v21  ;;  %v5772_v21 = vcombine.low %v301_v8, %v305_v9  ;;  %v5904_v8 = vcombine.low %v6918_v63, %v6920_v3  ;;  %v1232_v9 = vld [vmem:[#allocation9 + $0x240] sm:$0xff] }
  0xec   :  { %1057 = vmatprep.subr.bf16.mxu0 %v5739_v23  ;;  %v5790_v23 = vcombine.low %v1176_v11, %v1180_v12 }
  0xed   :  { %1097 = vmatpush1.bf16.msra.mxu1 %v5732_v45  ;;  %v1212_v45 = vld [vmem:[#allocation9 + $0x1a0] sm:$0xff] }
  0xee   :  { %1098 = vmatprep.subr.bf16.mxu1 %v5741_v47  ;;  %v5801_v47 = vcombine.high %v1185_v41, %v1189_v42  ;;  %v5823_v50 = vcombine.high %v1208_v44, %v1212_v45 }
  0xef   :  { %1058 = vmatpush1.bf16.msra.mxu0 %v5738_v30  ;;  %v5776_v30 = vcombine.low %v1161_v15, %v1165_v16  ;;  %v1240_v16 = vld [vmem:[#allocation9 + $0x280] sm:$0xff] }
  0xf0   :  { %1059 = vmatprep.subr.bf16.mxu0 %v5747_v32  ;;  %v5798_v32 = vcombine.low %v1184_v18, %v1188_v20 }
  0xf1   :  { %1099 = vmatpush1.bf16.msra.mxu1 %v5740_v52  ;;  %v5800_v52 = vcombine.low %v1185_v41, %v1189_v42  ;;  %v1264_v42 = vld [vmem:[#allocation9 + $0x340] sm:$0xff] }
  0xf2   :  { %1100 = vmatprep.subr.bf16.mxu1 %v5749_v54  ;;  %v5822_v54 = vcombine.low %v1208_v44, %v1212_v45 }
  0xf3   :  { %1060 = vmatpush1.bf16.msra.mxu0 %v5746_v38  ;;  %v5784_v38 = vcombine.low %v1169_v25, %v1173_v26  ;;  %v1248_v26 = vld [vmem:[#allocation9 + $0x2c0] sm:$0xff] }
  0xf4   :  { %1061 = vmatprep.subr.bf16.mxu0 %v5755_v40  ;;  %v5806_v40 = vcombine.low %v1192_v28, %v1196_v29 }
  0xf5   :  { %1101 = vmatpush1.bf16.msra.mxu1 %v5748_v60 }
  0xf6   :  { %1102 = vmatprep.subr.bf16.mxu1 %v5757_v62  ;;  %v6916_v62 = vld [vmem:[#allocation9 + $0x420] sm:$0xff] }
  0xf7   :  { %1062 = vmatpush1.bf16.msra.mxu0 %v5754_v46  ;;  %v5792_v46 = vcombine.low %v1177_v33, %v1181_v34  ;;  %v1256_v34 = vld [vmem:[#allocation9 + $0x300] sm:$0xff] }
  0xf8   :  { %1063 = vmatprep.subr.bf16.mxu0 %v5763_v48  ;;  %v1193_v48 = vld [vmem:[#allocation9 + $0x108] sm:$0xff] }
  0xf9   :  { %1103 = vmatpush1.bf16.msra.mxu1 %v5756_v5  ;;  %v5808_v60 = vcombine.low %v1193_v48, %v1197_v49  ;;  %v1213_v5 = vld [vmem:[#allocation9 + $0x1a8] sm:$0xff] }
  0xfa   :  { %1104 = vmatprep.subr.bf16.mxu1 %v5765_v6  ;;  %v5839_v6 = vcombine.high %v1224_v58, %v1228_v59  ;;  %v5825_v12 = vcombine.high %v1209_v4, %v1213_v5  ;;  %v5824_v18 = vcombine.low %v1209_v4, %v1213_v5 }
  0xfb   :  { %1064 = vmatpush1.bf16.msra.mxu0 %v5762_v53  ;;  %v5809_v53 = vcombine.high %v1193_v48, %v1197_v49  ;;  %v1272_v49 = vld [vmem:[#allocation9 + $0x380] sm:$0xff] }
  0xfc   :  { %1065 = vmatprep.subr.bf16.mxu0 %v5771_v55  ;;  %v1201_v55 = vld [vmem:[#allocation9 + $0x148] sm:$0xff] }
  0xfd   :  { %1105 = vmatpush1.bf16.msra.mxu1 %v5764_v19  ;;  %v5817_v0 = vcombine.high %v1201_v55, %v1205_v56  ;;  %v5816_v11 = vcombine.low %v1201_v55, %v1205_v56  ;;  %v5838_v19 = vcombine.low %v1224_v58, %v1228_v59  ;;  %v1280_v56 = vld [vmem:[#allocation9 + $0x3c0] sm:$0xff] }
  0xfe   :  { %1106 = vmatprep.subr.bf16.mxu1 %v5773_v13  ;;  %v1217_v13 = vld [vmem:[#allocation9 + $0x1c8] sm:$0xff] }
  0xff   :  { %1066 = vmatpush1.bf16.msra.mxu0 %v5770_v61  ;;  %v6914_v61 = vld [vmem:[#allocation9 + $0x400] sm:$0xff] }
 0x100   :  { %4274 = vmatprep.subr.bf16.mxu0 %v5775_v1  ;;  %v5830_v1 = vcombine.low %v1216_v24, %v1220_v51 }
 0x101   :  { %1107 = vmatpush1.bf16.msra.mxu1 %v5772_v21 }
 0x102   :  { %1068 = vmatmul.mubr.bf16.vlgmr.msra.gmra.mrb[4].mxu0 %v6906_v2  ;;  %4438 = vmatprep.subr.bf16.mxu1 %v5777_v22  ;;  %v1225_v22 = vld [vmem:[#allocation9 + $0x208] sm:$0xff] }
 0x103   :  { %4275 = vmatpush1.bf16.msra.mxu0 %v5774_v7  ;;  %v5902_v7 = vcombine.low %v6914_v61, %v6916_v62 }
 0x104   :  { %4276 = vmatprep.subr.bf16.mxu0 %v5783_v10  ;;  %1109 = vmatmul.mubr.bf16.vlgmr.msra.gmra.mrb[4].mxu1 %v6906_v2  ;;  %v5814_v2 = vcombine.low %v1200_v36, %v1204_v37  ;;  %v1236_v10 = vld [vmem:[#allocation9 + $0x260] sm:$0xff] }
 0x105   :  { %4439 = vmatpush1.bf16.msra.mxu1 %v5776_v30  ;;  %v5847_v15 = vcombine.high %v1232_v9, %v1236_v10  ;;  %v5846_v21 = vcombine.low %v1232_v9, %v1236_v10  ;;  %v1273_v10 = vld [vmem:[#allocation9 + $0x388] sm:$0xff] }
 0x106   :  { %4440 = vmatprep.subr.bf16.mxu1 %v5785_v31  ;;  %v1233_v31 = vld [vmem:[#allocation9 + $0x248] sm:$0xff] }
 0x107   :  { %4277 = vmatpush1.bf16.msra.mxu0 %v5782_v14  ;;  %v1221_v14 = vld [vmem:[#allocation9 + $0x1e8] sm:$0xff] }
 0x108   :  { %4278 = vmatprep.subr.bf16.mxu0 %v5791_v17  ;;  %v1244_v17 = vld [vmem:[#allocation9 + $0x2a0] sm:$0xff]  ;;  %v5833_v20 = vcombine.high %v1217_v13, %v1221_v14  ;;  %v5832_v28 = vcombine.low %v1217_v13, %v1221_v14  ;;  %v1281_v14 = vld [vmem:[#allocation9 + $0x3c8] sm:$0xff] }
 0x109   :  { %4441 = vmatpush1.bf16.msra.mxu1 %v5784_v38  ;;  %v5855_v25 = vcombine.high %v1240_v16, %v1244_v17  ;;  %v5854_v30 = vcombine.low %v1240_v16, %v1244_v17 }
 0x10a   :  { %4442 = vmatprep.subr.bf16.mxu1 %v5793_v39  ;;  %v1241_v39 = vld [vmem:[#allocation9 + $0x288] sm:$0xff] }
 0x10b   :  { %4279 = vmatpush1.bf16.msra.mxu0 %v5790_v23  ;;  %v1229_v23 = vld [vmem:[#allocation9 + $0x228] sm:$0xff] }
 0x10c   :  { %4280 = vmatprep.subr.bf16.mxu0 %v5799_v27  ;;  %v1252_v27 = vld [vmem:[#allocation9 + $0x2e0] sm:$0xff]  ;;  %v5841_v29 = vcombine.high %v1225_v22, %v1229_v23  ;;  %v5840_v36 = vcombine.low %v1225_v22, %v1229_v23 }
 0x10d   :  { %4443 = vmatpush1.bf16.msra.mxu1 %v5792_v46  ;;  %v5863_v33 = vcombine.high %v1248_v26, %v1252_v27  ;;  %v5862_v38 = vcombine.low %v1248_v26, %v1252_v27 }
 0x10e   :  { %4444 = vmatprep.subr.bf16.mxu1 %v5801_v47  ;;  %v1249_v47 = vld [vmem:[#allocation9 + $0x2c8] sm:$0xff] }
 0x10f   :  { %4281 = vmatpush1.bf16.msra.mxu0 %v5798_v32  ;;  %v1237_v32 = vld [vmem:[#allocation9 + $0x268] sm:$0xff] }
 0x110   :  { %4282 = vmatprep.subr.bf16.mxu0 %v5807_v35  ;;  %v1260_v35 = vld [vmem:[#allocation9 + $0x320] sm:$0xff]  ;;  %v5849_v37 = vcombine.high %v1233_v31, %v1237_v32  ;;  %v5848_v44 = vcombine.low %v1233_v31, %v1237_v32 }
 0x111   :  { %4445 = vmatpush1.bf16.msra.mxu1 %v5800_v52  ;;  %v5871_v41 = vcombine.high %v1256_v34, %v1260_v35  ;;  %v5870_v46 = vcombine.low %v1256_v34, %v1260_v35 }
 0x112   :  { %4446 = vmatprep.subr.bf16.mxu1 %v5809_v53  ;;  %v1257_v53 = vld [vmem:[#allocation9 + $0x308] sm:$0xff] }
 0x113   :  { %4283 = vmatpush1.bf16.msra.mxu0 %v5806_v40  ;;  %v1245_v40 = vld [vmem:[#allocation9 + $0x2a8] sm:$0xff] }
 0x114   :  { %4284 = vmatprep.subr.bf16.mxu0 %v5815_v43  ;;  %v1268_v43 = vld [vmem:[#allocation9 + $0x360] sm:$0xff]  ;;  %v5857_v45 = vcombine.high %v1241_v39, %v1245_v40  ;;  %v5856_v24 = vcombine.low %v1241_v39, %v1245_v40  ;;  %v1297_v39 = vld [vmem:[#allocation9 + $0x448] sm:$0xff] }
 0x115   :  { %4447 = vmatpush1.bf16.msra.mxu1 %v5808_v60  ;;  %v5879_v48 = vcombine.high %v1264_v42, %v1268_v43  ;;  %v5878_v52 = vcombine.low %v1264_v42, %v1268_v43  ;;  %v1301_v40 = vld [vmem:[#allocation9 + $0x468] sm:$0xff] }
 0x116   :  { %4448 = vmatprep.subr.bf16.mxu1 %v5817_v0  ;;  %v1265_v0 = vld [vmem:[#allocation9 + $0x348] sm:$0xff] }
 0x117   :  { %4285 = vmatpush1.bf16.msra.mxu0 %v5814_v2  ;;  %v1253_v2 = vld [vmem:[#allocation9 + $0x2e8] sm:$0xff] }
 0x118   :  { %4286 = vmatprep.subr.bf16.mxu0 %v5823_v50  ;;  %v1276_v50 = vld [vmem:[#allocation9 + $0x3a0] sm:$0xff]  ;;  %v5865_v51 = vcombine.high %v1249_v47, %v1253_v2  ;;  %v5864_v58 = vcombine.low %v1249_v47, %v1253_v2  ;;  %v1305_v2 = vld [vmem:[#allocation9 + $0x488] sm:$0xff] }
 0x119   :  { %4449 = vmatpush1.bf16.msra.mxu1 %v5816_v11  ;;  %v5887_v55 = vcombine.high %v1272_v49, %v1276_v50  ;;  %v5886_v60 = vcombine.low %v1272_v49, %v1276_v50  ;;  %v1277_v11 = vld [vmem:[#allocation9 + $0x3a8] sm:$0xff]  ;;  %v1308_v47 = vld [vmem:[#allocation9 + $0x4a0] sm:$0xff] }
 0x11a   :  { %4450 = vmatprep.subr.bf16.mxu1 %v5825_v12  ;;  %v5903_v12 = vcombine.high %v6914_v61, %v6916_v62  ;;  %v5889_v13 = vcombine.high %v1273_v10, %v1277_v11  ;;  %v5888_v16 = vcombine.low %v1273_v10, %v1277_v11 }
 0x11b   :  { %4287 = vmatpush1.bf16.msra.mxu0 %v5822_v54  ;;  %v1261_v54 = vld [vmem:[#allocation9 + $0x328] sm:$0xff] }
 0x11c   :  { %4288 = vmatprep.subr.bf16.mxu0 %v5831_v57  ;;  %v1284_v57 = vld [vmem:[#allocation9 + $0x3e0] sm:$0xff]  ;;  %v5873_v59 = vcombine.high %v1257_v53, %v1261_v54  ;;  %v5872_v5 = vcombine.low %v1257_v53, %v1261_v54 }
 0x11d   :  { %4451 = vmatpush1.bf16.msra.mxu1 %v5824_v18  ;;  %v5895_v4 = vcombine.high %v1280_v56, %v1284_v57  ;;  %v5894_v9 = vcombine.low %v1280_v56, %v1284_v57  ;;  %v1312_v53 = vld [vmem:[#allocation9 + $0x4c0] sm:$0xff]  ;;  %v1313_v56 = vld [vmem:[#allocation9 + $0x4c8] sm:$0xff] }
 0x11e   :  { %4452 = vmatprep.subr.bf16.mxu1 %v5833_v20  ;;  %v5905_v20 = vcombine.high %v6918_v63, %v6920_v3  ;;  %v1317_v57 = vld [vmem:[#allocation9 + $0x4e8] sm:$0xff] }
 0x11f   :  { %4289 = vmatpush1.bf16.msra.mxu0 %v5830_v1  ;;  %v1269_v1 = vld [vmem:[#allocation9 + $0x368] sm:$0xff]  ;;  %v5928_v10 = vcombine.low %v1313_v56, %v1317_v57 }
 0x120   :  { %4290 = vmatprep.subr.bf16.mxu0 %v5839_v6  ;;  %v5881_v6 = vcombine.high %v1265_v0, %v1269_v1 }
 0x121   :  { %4453 = vmatpush1.bf16.msra.mxu1 %v5832_v28 }
 0x122   :  { %4454 = vmatprep.subr.bf16.mxu1 %v5841_v29 }
 0x123   :  { %4291 = vmatpush1.bf16.msra.mxu0 %v5838_v19  ;;  %v5880_v19 = vcombine.low %v1265_v0, %v1269_v1  ;;  %v1324_v1 = vld [vmem:[#allocation9 + $0x520] sm:$0xff] }
 0x124   :  { %4292 = vmatprep.subr.bf16.mxu0 %v5847_v15  ;;  %v1285_v15 = vld [vmem:[#allocation9 + $0x3e8] sm:$0xff] }
 0x125   :  { %4455 = vmatpush1.bf16.msra.mxu1 %v5840_v36  ;;  %v5897_v17 = vcombine.high %v1281_v14, %v1285_v15  ;;  %v5896_v18 = vcombine.low %v1281_v14, %v1285_v15  ;;  %v1296_v36 = vld [vmem:[#allocation9 + $0x440] sm:$0xff]  ;;  %v1329_v14 = vld [vmem:[#allocation9 + $0x548] sm:$0xff] }
 0x126   :  { %4456 = vmatprep.subr.bf16.mxu1 %v5849_v37  ;;  %v1333_v15 = vld [vmem:[#allocation9 + $0x568] sm:$0xff] }
 0x127   :  { %4293 = vmatpush1.bf16.msra.mxu0 %v5846_v21  ;;  %v121_v21 = vlaneseq }
 0x128   :  { %4294 = vmatprep.subr.bf16.mxu0 %v5855_v25  ;;  %v6933_v25 = vld [vmem:[#allocation8] sm:$0xff] }
 0x129   :  { %4457 = vmatpush1.bf16.msra.mxu1 %v5848_v44  ;;  %v6930_v22 = vshrl.u32 %v121_v21, 7  ;;  %v1336_v21 = vld [vmem:[#allocation9 + $0x580] sm:$0xff] }
 0x12a   :  { %4458 = vmatprep.subr.bf16.mxu1 %v5857_v45  ;;  %v5913_v45 = vcombine.high %v1297_v39, %v1301_v40 }
 0x12b   :  { %4295 = vmatpush1.bf16.msra.mxu0 %v5854_v30  ;;  %v123_v23 = vsub.s32 0, %v6930_v22  ;;  %v127_v26 = vsub.s32 1, %v6930_v22 }
 0x12c   :  { %4296 = vmatprep.subr.bf16.mxu0 %v5863_v33 }
 0x12d   :  { %4459 = vmatpush1.bf16.msra.mxu1 %v5856_v24  ;;  %v124_v27 = vrot.slane %v6933_v25, %v123_v23  ;;  %v128_v28 = vrot.slane %v6933_v25, %v127_v26  ;;  %v5912_v24 = vcombine.low %v1297_v39, %v1301_v40 }
 0x12e   :  { %4460 = vmatprep.subr.bf16.mxu1 %v5865_v51 }
 0x12f   :  { %4297 = vmatpush1.bf16.msra.mxu0 %v5862_v38  ;;  %v1300_v38 = vld [vmem:[#allocation9 + $0x460] sm:$0xff] }
 0x130   :  { %4298 = vmatprep.subr.bf16.mxu0 %v5871_v41  ;;  %v135_v41 = vsub.s32 3, %v6930_v22  ;;  %v5911_v44 = vcombine.high %v1296_v36, %v1300_v38  ;;  %v5910_v50 = vcombine.low %v1296_v36, %v1300_v38  ;;  %v1345_v36 = vld [vmem:[#allocation9 + $0x5c8] sm:$0xff] }
 0x131   :  { %4461 = vmatpush1.bf16.msra.mxu1 %v5864_v58 }
 0x132   :  { %4462 = vmatprep.subr.bf16.mxu1 %v5873_v59  ;;  %v136_v49 = vrot.slane %v6933_v25, %v135_v41 }
 0x133   :  { %4299 = vmatpush1.bf16.msra.mxu0 %v5870_v46  ;;  %v1304_v46 = vld [vmem:[#allocation9 + $0x480] sm:$0xff] }
 0x134   :  { %4300 = vmatprep.subr.bf16.mxu0 %v5879_v48  ;;  %v1309_v48 = vld [vmem:[#allocation9 + $0x4a8] sm:$0xff]  ;;  %v5919_v51 = vcombine.high %v1304_v46, %v1308_v47  ;;  %v5918_v62 = vcombine.low %v1304_v46, %v1308_v47  ;;  %v1356_v46 = vld [vmem:[#allocation9 + $0x620] sm:$0xff] }
 0x135   :  { %4463 = vmatpush1.bf16.msra.mxu1 %v5872_v5  ;;  %v5920_v63 = vcombine.low %v1305_v2, %v1309_v48  ;;  %v1325_v5 = vld [vmem:[#allocation9 + $0x528] sm:$0xff] }
 0x136   :  { %4464 = vmatprep.subr.bf16.mxu1 %v5881_v6  ;;  %v1353_v47 = vld [vmem:[#allocation9 + $0x608] sm:$0xff] }
 0x137   :  { %4301 = vmatpush1.bf16.msra.mxu0 %v5878_v52  ;;  %v5921_v52 = vcombine.high %v1305_v2, %v1309_v48  ;;  %v1357_v2 = vld [vmem:[#allocation9 + $0x628] sm:$0xff] }
 0x138   :  { %4302 = vmatprep.subr.bf16.mxu0 %v5887_v55  ;;  %v1316_v55 = vld [vmem:[#allocation9 + $0x4e0] sm:$0xff] }
 0x139   :  { %4465 = vmatpush1.bf16.msra.mxu1 %v5880_v19  ;;  %v1328_v19 = vld [vmem:[#allocation9 + $0x540] sm:$0xff] }
 0x13a   :  { %4466 = vmatprep.subr.bf16.mxu1 %v5889_v13  ;;  %v1332_v13 = vld [vmem:[#allocation9 + $0x560] sm:$0xff] }
 0x13b   :  { %4303 = vmatpush1.bf16.msra.mxu0 %v5886_v60  ;;  %v1320_v60 = vld [vmem:[#allocation9 + $0x500] sm:$0xff] }
 0x13c   :  { %4304 = vmatprep.subr.bf16.mxu0 %v5895_v4  ;;  %v1321_v4 = vld [vmem:[#allocation9 + $0x508] sm:$0xff]  ;;  %v5935_v11 = vcombine.high %v1320_v60, %v1324_v1 }
 0x13d   :  { %4467 = vmatpush1.bf16.msra.mxu1 %v5888_v16  ;;  %v5934_v16 = vcombine.low %v1320_v60, %v1324_v1  ;;  %v1376_v1 = vld [vmem:[#allocation9 + $0x6c0] sm:$0xff] }
 0x13e   :  { %4468 = vmatprep.subr.bf16.mxu1 %v5897_v17  ;;  %v5936_v17 = vcombine.low %v1321_v4, %v1325_v5 }
 0x13f   :  { %4305 = vmatpush1.bf16.msra.mxu0 %v5894_v9  ;;  %v5926_v9 = vcombine.low %v1312_v53, %v1316_v55 }
 0x140   :  { %4315 = vmatprep.subr.bf16.mxu0 %v5903_v12  ;;  %v5937_v12 = vcombine.high %v1321_v4, %v1325_v5  ;;  %v1380_v4 = vld [vmem:[#allocation9 + $0x6e0] sm:$0xff]  ;;  %v1377_v5 = vld [vmem:[#allocation9 + $0x6c8] sm:$0xff] }
 0x141   :  { %4469 = vmatpush1.bf16.msra.mxu1 %v5896_v18  ;;  %v5943_v18 = vcombine.high %v1328_v19, %v1332_v13 }
 0x142   :  { %4479 = vmatprep.subr.bf16.mxu1 %v5905_v20  ;;  %v5945_v20 = vcombine.high %v1329_v14, %v1333_v15 }
 0x195   :  { %v987_v29 = vpop.f32.mrb[0].mxu0 }
 0x196   :  { %v1117_v30 = vadd.f32 %v987_v29, %v124_v27  ;;  %v989_v31 = vpop.f32.mrb[1].mxu0  ;;  %v1340_v27 = vld [vmem:[#allocation9 + $0x5a0] sm:$0xff]  ;;  %v1341_v29 = vld [vmem:[#allocation9 + $0x5a8] sm:$0xff] }
 0x197   :  { %v1118_v32 = vadd.f32 %v989_v31, %v128_v28  ;;  %v991_v33 = vpop.f32.mrb[2].mxu0  ;;  %v6960_v54 = vpop.f32.mrb[0].mxu1  ;;  %v1337_v28 = vld [vmem:[#allocation9 + $0x588] sm:$0xff]  ;;  %v5944_v31 = vcombine.low %v1329_v14, %v1333_v15  ;;  %v5950_v38 = vcombine.low %v1336_v21, %v1340_v27  ;;  %v1388_v14 = vld [vmem:[#allocation9 + $0x720] sm:$0xff] }
 0x198   :  { %v1144_v34 = vmax.f32 %v1117_v30, 0.0  ;;  %v992_v35 = vpop.f32.mrb[3].mxu0  ;;  %v1030_v58 = vpop.f32.mrb[1].mxu1  ;;  %v5942_v30 = vcombine.low %v1328_v19, %v1332_v13  ;;  %v5953_v33 = vcombine.high %v1337_v28, %v1341_v29  ;;  %v5952_v39 = vcombine.low %v1337_v28, %v1341_v29  ;;  %v1384_v13 = vld [vmem:[#allocation9 + $0x700] sm:$0xff]  ;;  %v1385_v15 = vld [vmem:[#allocation9 + $0x708] sm:$0xff] }
 0x199   :  { %v1145_v37 = vmax.f32 %v1118_v32, 0.0  ;;  %v1120_v59 = vadd.f32 %v1030_v58, %v136_v49  ;;  %v1032_v61 = vpop.f32.mrb[2].mxu1  ;;  %v5951_v32 = vcombine.high %v1336_v21, %v1340_v27  ;;  %v1348_v35 = vld [vmem:[#allocation9 + $0x5e0] sm:$0xff]  ;;  %v1393_v29 = vld [vmem:[#allocation9 + $0x748] sm:$0xff] }
 0x19a   :  { %v6945_v43 = vpack.c.bf16 %v1144_v34, %v1144_v34  ;;  %v1033_v3 = vpop.f32.mrb[3].mxu1  ;;  %v1344_v34 = vld [vmem:[#allocation9 + $0x5c0] sm:$0xff] }
 0x19b   :  { %v6943_v42 = vpack.c.bf16 %v1145_v37, %v1145_v37  ;;  %v1147_v0 = vmax.f32 %v1120_v59, 0.0  ;;  %v1349_v37 = vld [vmem:[#allocation9 + $0x5e8] sm:$0xff]  ;;  %v5959_v40 = vcombine.high %v1344_v34, %v1348_v35  ;;  %v5958_v48 = vcombine.low %v1344_v34, %v1348_v35  ;;  %v1368_v61 = vld [vmem:[#allocation9 + $0x680] sm:$0xff] }
 0x19c   :  { %v5960_v49 = vcombine.low %v1345_v36, %v1349_v37  ;;  %v1373_v3 = vld [vmem:[#allocation9 + $0x6a8] sm:$0xff]  ;;  %v1392_v27 = vld [vmem:[#allocation9 + $0x740] sm:$0xff] }
 0x19d   :  { %4306 = vmatprep.mubr.bf16.mxu0 %v6943_v42  ;;  %4470 = vmatprep.mubr.bf16.mxu1 %v6943_v42  ;;  %v6962_v6 = vpack.c.bf16 %v1147_v0, %v1147_v0  ;;  %v1396_v28 = vld [vmem:[#allocation9 + $0x760] sm:$0xff] }
 0x19e   :  { %4307 = vmatmul.mubr.bf16.vlgmr.msra.gmra.mrb[8].mxu0 %v6945_v43  ;;  %4471 = vmatmul.mubr.bf16.vlgmr.msra.gmra.mrb[8].mxu1 %v6945_v43  ;;  %v6007_v34 = vcombine.high %v1392_v27, %v1396_v28 }
 0x19f   :  { %4316 = vmatpush1.bf16.msra.mxu0 %v5902_v7  ;;  %4480 = vmatpush1.bf16.msra.mxu1 %v5904_v8  ;;  %v5927_v7 = vcombine.high %v1312_v53, %v1316_v55  ;;  %v5929_v8 = vcombine.high %v1313_v56, %v1317_v57  ;;  %v1361_v53 = vld [vmem:[#allocation9 + $0x648] sm:$0xff]  ;;  %v5968_v57 = vcombine.low %v1353_v47, %v1357_v2 }
 0x1a0   :  { %4317 = vmatprep.subr.bf16.mxu0 %v5911_v44  ;;  %4481 = vmatprep.subr.bf16.mxu1 %v5913_v45  ;;  %v5961_v44 = vcombine.high %v1345_v36, %v1349_v37  ;;  %v1352_v45 = vld [vmem:[#allocation9 + $0x600] sm:$0xff]  ;;  %v1365_v55 = vld [vmem:[#allocation9 + $0x668] sm:$0xff] }
 0x1a1   :  { %4347 = vmatprep.mubr.bf16.mxu0 %v6962_v6  ;;  %4511 = vmatprep.mubr.bf16.mxu1 %v6962_v6  ;;  %v5966_v56 = vcombine.low %v1352_v45, %v1356_v46  ;;  %v5977_v59 = vcombine.high %v1361_v53, %v1365_v55  ;;  %v1400_v36 = vld [vmem:[#allocation9 + $0x780] sm:$0xff] }
 0x1a2   :  { %v1404_v37 = vld [vmem:[#allocation9 + $0x7a0] sm:$0xff] }
 0x1a3   :  { %4318 = vmatpush1.bf16.msra.mxu0 %v5910_v50  ;;  %4482 = vmatpush1.bf16.msra.mxu1 %v5912_v24  ;;  %v5967_v50 = vcombine.high %v1352_v45, %v1356_v46  ;;  %v5969_v24 = vcombine.high %v1353_v47, %v1357_v2  ;;  %v143_v46 = vsub.s32 5, %v6930_v22  ;;  %v6015_v47 = vcombine.high %v1400_v36, %v1404_v37 }
 0x1a4   :  { %4319 = vmatprep.subr.bf16.mxu0 %v5919_v51  ;;  %4483 = vmatprep.subr.bf16.mxu1 %v5921_v52  ;;  %v1360_v51 = vld [vmem:[#allocation9 + $0x640] sm:$0xff] }
 0x1a5   :  { %v1364_v52 = vld [vmem:[#allocation9 + $0x660] sm:$0xff] }
 0x1a6   :  { %v5975_v58 = vcombine.high %v1360_v51, %v1364_v52 }
 0x1a7   :  { %4320 = vmatpush1.bf16.msra.mxu0 %v5918_v62  ;;  %4484 = vmatpush1.bf16.msra.mxu1 %v5920_v63  ;;  %v1372_v62 = vld [vmem:[#allocation9 + $0x6a0] sm:$0xff]  ;;  %v1369_v63 = vld [vmem:[#allocation9 + $0x688] sm:$0xff] }
 0x1a8   :  { %4321 = vmatprep.subr.bf16.mxu0 %v5927_v7  ;;  %4485 = vmatprep.subr.bf16.mxu1 %v5929_v8  ;;  %v5974_v7 = vcombine.low %v1360_v51, %v1364_v52  ;;  %v5976_v8 = vcombine.low %v1361_v53, %v1365_v55  ;;  %v5983_v60 = vcombine.high %v1368_v61, %v1372_v62 }
 0x1a9   :  { %v5985_v0 = vcombine.high %v1369_v63, %v1373_v3  ;;  %v6014_v52 = vcombine.low %v1400_v36, %v1404_v37  ;;  %v144_v55 = vrot.slane %v6933_v25, %v143_v46  ;;  %v1444_v36 = vld [vmem:[#allocation9 + $0x8e0] sm:$0xff]  ;;  %v1441_v37 = vld [vmem:[#allocation9 + $0x8c8] sm:$0xff] }
 0x1ab   :  { %4322 = vmatpush1.bf16.msra.mxu0 %v5926_v9  ;;  %4486 = vmatpush1.bf16.msra.mxu1 %v5928_v10  ;;  %v1381_v9 = vld [vmem:[#allocation9 + $0x6e8] sm:$0xff]  ;;  %v5982_v10 = vcombine.low %v1368_v61, %v1372_v62 }
 0x1ac   :  { %4323 = vmatprep.subr.bf16.mxu0 %v5935_v11  ;;  %4487 = vmatprep.subr.bf16.mxu1 %v5937_v12  ;;  %v5984_v11 = vcombine.low %v1369_v63, %v1373_v3  ;;  %v5991_v12 = vcombine.high %v1376_v1, %v1380_v4  ;;  %v5993_v19 = vcombine.high %v1377_v5, %v1381_v9  ;;  %v1417_v61 = vld [vmem:[#allocation9 + $0x808] sm:$0xff] }
 0x1ad   :  { %v1421_v62 = vld [vmem:[#allocation9 + $0x828] sm:$0xff] }
 0x1af   :  { %4324 = vmatpush1.bf16.msra.mxu0 %v5934_v16  ;;  %4488 = vmatpush1.bf16.msra.mxu1 %v5936_v17  ;;  %v1389_v16 = vld [vmem:[#allocation9 + $0x728] sm:$0xff]  ;;  %v5990_v17 = vcombine.low %v1376_v1, %v1380_v4  ;;  %v6033_v4 = vcombine.high %v1417_v61, %v1421_v62 }
 0x1b0   :  { %4325 = vmatprep.subr.bf16.mxu0 %v5943_v18  ;;  %4489 = vmatprep.subr.bf16.mxu1 %v5945_v20  ;;  %v5992_v18 = vcombine.low %v1377_v5, %v1381_v9  ;;  %v5999_v20 = vcombine.high %v1384_v13, %v1388_v14  ;;  %v6001_v21 = vcombine.high %v1385_v15, %v1389_v16  ;;  %v1424_v5 = vld [vmem:[#allocation9 + $0x840] sm:$0xff] }
 0x1b3   :  { %4326 = vmatpush1.bf16.msra.mxu0 %v5942_v30  ;;  %4490 = vmatpush1.bf16.msra.mxu1 %v5944_v31  ;;  %v1397_v30 = vld [vmem:[#allocation9 + $0x768] sm:$0xff]  ;;  %v131_v31 = vsub.s32 2, %v6930_v22 }
 0x1b4   :  { %4327 = vmatprep.subr.bf16.mxu0 %v5951_v32  ;;  %4491 = vmatprep.subr.bf16.mxu1 %v5953_v33  ;;  %v5998_v32 = vcombine.low %v1384_v13, %v1388_v14  ;;  %v6000_v33 = vcombine.low %v1385_v15, %v1389_v16  ;;  %v6009_v35 = vcombine.high %v1393_v29, %v1397_v30 }
 0x1b5   :  { %v6008_v45 = vcombine.low %v1393_v29, %v1397_v30  ;;  %v6032_v15 = vcombine.low %v1417_v61, %v1421_v62  ;;  %v1461_v61 = vld [vmem:[#allocation9 + $0x968] sm:$0xff] }
 0x1b7   :  { %4328 = vmatpush1.bf16.msra.mxu0 %v5950_v38  ;;  %4492 = vmatpush1.bf16.msra.mxu1 %v5952_v39  ;;  %v1401_v38 = vld [vmem:[#allocation9 + $0x788] sm:$0xff] }
 0x1b8   :  { %4329 = vmatprep.subr.bf16.mxu0 %v5959_v40  ;;  %4493 = vmatprep.subr.bf16.mxu1 %v5961_v44  ;;  %v1405_v39 = vld [vmem:[#allocation9 + $0x7a8] sm:$0xff]  ;;  %v132_v40 = vrot.slane %v6933_v25, %v131_v31  ;;  %v6006_v44 = vcombine.low %v1392_v27, %v1396_v28 }
 0x1b9   :  { %v6017_v2 = vcombine.high %v1401_v38, %v1405_v39  ;;  %v6016_v53 = vcombine.low %v1401_v38, %v1405_v39  ;;  %v1437_v27 = vld [vmem:[#allocation9 + $0x8a8] sm:$0xff] }
 0x1ba   :  { %v1119_v51 = vadd.f32 %v6960_v54, %v132_v40  ;;  %v1445_v38 = vld [vmem:[#allocation9 + $0x8e8] sm:$0xff] }
 0x1bb   :  { %4330 = vmatpush1.bf16.msra.mxu0 %v5958_v48  ;;  %4494 = vmatpush1.bf16.msra.mxu1 %v5960_v49  ;;  %v1408_v48 = vld [vmem:[#allocation9 + $0x7c0] sm:$0xff] }
 0x1bc   :  { %4331 = vmatprep.subr.bf16.mxu0 %v5967_v50  ;;  %4495 = vmatprep.subr.bf16.mxu1 %v5969_v24  ;;  %v1412_v49 = vld [vmem:[#allocation9 + $0x7e0] sm:$0xff]  ;;  %v1409_v50 = vld [vmem:[#allocation9 + $0x7c8] sm:$0xff]  ;;  %v1146_v3 = vmax.f32 %v1119_v51, 0.0 }
 0x1bd   :  { %v1413_v24 = vld [vmem:[#allocation9 + $0x7e8] sm:$0xff] }
 0x1be   :  { %v6977_v13 = vpack.c.bf16 %v1146_v3, %v1146_v3  ;;  %v1453_v51 = vld [vmem:[#allocation9 + $0x928] sm:$0xff] }
 0x1bf   :  { %4332 = vmatpush1.bf16.msra.mxu0 %v5966_v56  ;;  %4496 = vmatpush1.bf16.msra.mxu1 %v5968_v57  ;;  %v6023_v56 = vcombine.high %v1408_v48, %v1412_v49  ;;  %v6025_v57 = vcombine.high %v1409_v50, %v1413_v24 }
 0x1c0   :  { %4333 = vmatprep.subr.bf16.mxu0 %v5975_v58  ;;  %4497 = vmatprep.subr.bf16.mxu1 %v5977_v59  ;;  %v1416_v58 = vld [vmem:[#allocation9 + $0x800] sm:$0xff] }
 0x1c1   :  { %v1420_v59 = vld [vmem:[#allocation9 + $0x820] sm:$0xff] }
 0x1c2   :  { %v6031_v1 = vcombine.high %v1416_v58, %v1420_v59  ;;  %v6030_v14 = vcombine.low %v1416_v58, %v1420_v59  ;;  %v1460_v58 = vld [vmem:[#allocation9 + $0x960] sm:$0xff]  ;;  %v1457_v59 = vld [vmem:[#allocation9 + $0x948] sm:$0xff] }
 0x1c3   :  { %4334 = vmatpush1.bf16.msra.mxu0 %v5974_v7  ;;  %4498 = vmatpush1.bf16.msra.mxu1 %v5976_v8  ;;  %v6022_v7 = vcombine.low %v1408_v48, %v1412_v49  ;;  %v6024_v8 = vcombine.low %v1409_v50, %v1413_v24  ;;  %v6057_v48 = vcombine.high %v1441_v37, %v1445_v38  ;;  %v1448_v49 = vld [vmem:[#allocation9 + $0x900] sm:$0xff]  ;;  %v1449_v24 = vld [vmem:[#allocation9 + $0x908] sm:$0xff] }
 0x1c4   :  { %4335 = vmatprep.subr.bf16.mxu0 %v5983_v60  ;;  %4499 = vmatprep.subr.bf16.mxu1 %v5985_v0  ;;  %v1452_v50 = vld [vmem:[#allocation9 + $0x920] sm:$0xff]  ;;  %v6064_v3 = vcombine.low %v1449_v24, %v1453_v51 }
 0x1c5   :  { %v6062_v62 = vcombine.low %v1448_v49, %v1452_v50 }
 0x1c7   :  { %4336 = vmatpush1.bf16.msra.mxu0 %v5982_v10  ;;  %4500 = vmatpush1.bf16.msra.mxu1 %v5984_v11  ;;  %v1428_v10 = vld [vmem:[#allocation9 + $0x860] sm:$0xff]  ;;  %v1425_v11 = vld [vmem:[#allocation9 + $0x848] sm:$0xff] }
 0x1c8   :  { %4337 = vmatprep.subr.bf16.mxu0 %v5991_v12  ;;  %4501 = vmatprep.subr.bf16.mxu1 %v5993_v19  ;;  %v1429_v12 = vld [vmem:[#allocation9 + $0x868] sm:$0xff]  ;;  %v6039_v16 = vcombine.high %v1424_v5, %v1428_v10  ;;  %v6038_v29 = vcombine.low %v1424_v5, %v1428_v10  ;;  %v6072_v5 = vcombine.low %v1457_v59, %v1461_v61 }
 0x1c9   :  { %v6040_v30 = vcombine.low %v1425_v11, %v1429_v12 }
 0x1cb   :  { %4338 = vmatpush1.bf16.msra.mxu0 %v5990_v17  ;;  %4502 = vmatpush1.bf16.msra.mxu1 %v5992_v18  ;;  %v6041_v17 = vcombine.high %v1425_v11, %v1429_v12  ;;  %v1432_v18 = vld [vmem:[#allocation9 + $0x880] sm:$0xff] }
 0x1cc   :  { %4339 = vmatprep.subr.bf16.mxu0 %v5999_v20  ;;  %4503 = vmatprep.subr.bf16.mxu1 %v6001_v21  ;;  %v1436_v20 = vld [vmem:[#allocation9 + $0x8a0] sm:$0xff]  ;;  %v1433_v21 = vld [vmem:[#allocation9 + $0x888] sm:$0xff] }
 0x1cd   :  { %v1472_v11 = vld [vmem:[#allocation9 + $0x9c0] sm:$0xff] }
 0x1ce   :  { %v1476_v12 = vld [vmem:[#allocation9 + $0x9e0] sm:$0xff] }
 0x1cf   :  { %4340 = vmatpush1.bf16.msra.mxu0 %v5998_v32  ;;  %4504 = vmatpush1.bf16.msra.mxu1 %v6000_v33  ;;  %v6047_v32 = vcombine.high %v1432_v18, %v1436_v20  ;;  %v6049_v33 = vcombine.high %v1433_v21, %v1437_v27 }
 0x1d0   :  { %4341 = vmatprep.subr.bf16.mxu0 %v6007_v34  ;;  %4505 = vmatprep.subr.bf16.mxu1 %v6009_v35  ;;  %v1440_v34 = vld [vmem:[#allocation9 + $0x8c0] sm:$0xff] }
 0x1d3   :  { %4342 = vmatpush1.bf16.msra.mxu0 %v6006_v44  ;;  %4506 = vmatpush1.bf16.msra.mxu1 %v6008_v45  ;;  %v6046_v44 = vcombine.low %v1432_v18, %v1436_v20  ;;  %v6048_v45 = vcombine.low %v1433_v21, %v1437_v27  ;;  %v1480_v20 = vld [vmem:[#allocation9 + $0xa00] sm:$0xff]  ;;  %v1481_v27 = vld [vmem:[#allocation9 + $0xa08] sm:$0xff] }
 0x1d4   :  { %4343 = vmatprep.subr.bf16.mxu0 %v6015_v47  ;;  %4507 = vmatprep.subr.bf16.mxu1 %v6017_v2  ;;  %v6055_v2 = vcombine.high %v1440_v34, %v1444_v36  ;;  %v1484_v21 = vld [vmem:[#allocation9 + $0xa20] sm:$0xff] }
 0x1d5   :  { %v6975_v63 = vpop.f32.mrb[4].mxu0 }
 0x1d6   :  { %v1071_v54 = vpop.f32.mrb[5].mxu0 }
 0x1d7   :  { %4344 = vmatpush1.bf16.msra.mxu0 %v6014_v52  ;;  %4508 = vmatpush1.bf16.msra.mxu1 %v6016_v53  ;;  %v1122_v60 = vadd.f32 %v1071_v54, %v144_v55  ;;  %v1073_v0 = vpop.f32.mrb[6].mxu0  ;;  %v6983_v35 = vpop.f32.mrb[4].mxu1  ;;  %v6054_v52 = vcombine.low %v1440_v34, %v1444_v36  ;;  %v6056_v53 = vcombine.low %v1441_v37, %v1445_v38  ;;  %v1488_v36 = vld [vmem:[#allocation9 + $0xa40] sm:$0xff]  ;;  %v1489_v38 = vld [vmem:[#allocation9 + $0xa48] sm:$0xff] }
 0x1d8   :  { %4345 = vmatprep.subr.bf16.mxu0 %v6023_v56  ;;  %4509 = vmatprep.subr.bf16.mxu1 %v6025_v57  ;;  %v1074_v9 = vpop.f32.mrb[7].mxu0  ;;  %v6987_v39 = vpop.f32.mrb[5].mxu1  ;;  %v6063_v55 = vcombine.high %v1448_v49, %v1452_v50  ;;  %v6065_v56 = vcombine.high %v1449_v24, %v1453_v51  ;;  %v1456_v57 = vld [vmem:[#allocation9 + $0x940] sm:$0xff]  ;;  %v1465_v0 = vld [vmem:[#allocation9 + $0x988] sm:$0xff] }
 0x1d9   :  { %v1149_v19 = vmax.f32 %v1122_v60, 0.0  ;;  %v1114_v40 = vpop.f32.mrb[6].mxu1  ;;  %v6071_v54 = vcombine.high %v1456_v57, %v1460_v58  ;;  %v1468_v60 = vld [vmem:[#allocation9 + $0x9a0] sm:$0xff]  ;;  %v1497_v50 = vld [vmem:[#allocation9 + $0xa88] sm:$0xff] }
 0x1da   :  { %v1115_v47 = vpop.f32.mrb[7].mxu1  ;;  %v1492_v37 = vld [vmem:[#allocation9 + $0xa60] sm:$0xff]  ;;  %v1493_v40 = vld [vmem:[#allocation9 + $0xa68] sm:$0xff] }
 0x1db   :  { %4346 = vmatpush1.bf16.msra.mxu0 %v6022_v7  ;;  %4510 = vmatpush1.bf16.msra.mxu1 %v6024_v8  ;;  %v6979_v28 = vpack.c.bf16 %v1149_v19, %v1149_v19  ;;  %v6073_v7 = vcombine.high %v1457_v59, %v1461_v61  ;;  %v1464_v8 = vld [vmem:[#allocation9 + $0x980] sm:$0xff]  ;;  %v1473_v19 = vld [vmem:[#allocation9 + $0x9c8] sm:$0xff]  ;;  %v6103_v47 = vcombine.high %v1488_v36, %v1492_v37 }
 0x1dc   :  { %4356 = vmatprep.subr.bf16.mxu0 %v6031_v1  ;;  %4520 = vmatprep.subr.bf16.mxu1 %v6033_v4  ;;  %v1469_v1 = vld [vmem:[#allocation9 + $0x9a8] sm:$0xff]  ;;  %v6070_v4 = vcombine.low %v1456_v57, %v1460_v58  ;;  %v6079_v9 = vcombine.high %v1464_v8, %v1468_v60  ;;  %v1500_v49 = vld [vmem:[#allocation9 + $0xaa0] sm:$0xff]  ;;  %v6102_v51 = vcombine.low %v1488_v36, %v1492_v37 }
 0x1dd   :  { %v6081_v10 = vcombine.high %v1465_v0, %v1469_v1  ;;  %v1501_v24 = vld [vmem:[#allocation9 + $0xaa8] sm:$0xff]  ;;  %v1508_v57 = vld [vmem:[#allocation9 + $0xae0] sm:$0xff] }
 0x1de   :  { %4348 = vmatmul.mubr.bf16.vlgmr.msra.gmra.mrb[8].mxu0 %v6977_v13  ;;  %4512 = vmatmul.mubr.bf16.vlgmr.msra.gmra.mrb[8].mxu1 %v6977_v13  ;;  %v1505_v58 = vld [vmem:[#allocation9 + $0xac8] sm:$0xff] }
 0x1df   :  { %4357 = vmatpush1.bf16.msra.mxu0 %v6030_v14  ;;  %4521 = vmatpush1.bf16.msra.mxu1 %v6032_v15  ;;  %v1477_v14 = vld [vmem:[#allocation9 + $0x9e8] sm:$0xff]  ;;  %v6078_v15 = vcombine.low %v1464_v8, %v1468_v60  ;;  %v1516_v8 = vld [vmem:[#allocation9 + $0xb20] sm:$0xff] }
 0x1e0   :  { %4358 = vmatprep.subr.bf16.mxu0 %v6039_v16  ;;  %4522 = vmatprep.subr.bf16.mxu1 %v6041_v17  ;;  %v6080_v16 = vcombine.low %v1465_v0, %v1469_v1  ;;  %v6087_v17 = vcombine.high %v1472_v11, %v1476_v12  ;;  %v6089_v18 = vcombine.high %v1473_v19, %v1477_v14  ;;  %v1509_v59 = vld [vmem:[#allocation9 + $0xae8] sm:$0xff] }
 0x1e1   :  { %4388 = vmatprep.mubr.bf16.mxu0 %v6979_v28  ;;  %4552 = vmatprep.mubr.bf16.mxu1 %v6979_v28  ;;  %v1513_v60 = vld [vmem:[#allocation9 + $0xb08] sm:$0xff] }
 0x1e2   :  { %v1517_v0 = vld [vmem:[#allocation9 + $0xb28] sm:$0xff] }
 0x1e3   :  { %4359 = vmatpush1.bf16.msra.mxu0 %v6038_v29  ;;  %4523 = vmatpush1.bf16.msra.mxu1 %v6040_v30  ;;  %v1485_v29 = vld [vmem:[#allocation9 + $0xa28] sm:$0xff]  ;;  %v6086_v30 = vcombine.low %v1472_v11, %v1476_v12  ;;  %v1524_v11 = vld [vmem:[#allocation9 + $0xb60] sm:$0xff] }
 0x1e4   :  { %4360 = vmatprep.subr.bf16.mxu0 %v6047_v32  ;;  %4524 = vmatprep.subr.bf16.mxu1 %v6049_v33  ;;  %v6088_v32 = vcombine.low %v1473_v19, %v1477_v14  ;;  %v6095_v33 = vcombine.high %v1480_v20, %v1484_v21  ;;  %v6097_v34 = vcombine.high %v1481_v27, %v1485_v29  ;;  %v1521_v12 = vld [vmem:[#allocation9 + $0xb48] sm:$0xff]  ;;  %v139_v14 = vsub.s32 4, %v6930_v22 }
 0x1e5   :  { %v1525_v19 = vld [vmem:[#allocation9 + $0xb68] sm:$0xff] }
 0x1e7   :  { %4361 = vmatpush1.bf16.msra.mxu0 %v6046_v44  ;;  %4525 = vmatpush1.bf16.msra.mxu1 %v6048_v45  ;;  %v6094_v44 = vcombine.low %v1480_v20, %v1484_v21  ;;  %v6096_v45 = vcombine.low %v1481_v27, %v1485_v29  ;;  %v1528_v20 = vld [vmem:[#allocation9 + $0xb80] sm:$0xff]  ;;  %v1529_v27 = vld [vmem:[#allocation9 + $0xb88] sm:$0xff] }
 0x1e8   :  { %4362 = vmatprep.subr.bf16.mxu0 %v6055_v2  ;;  %4526 = vmatprep.subr.bf16.mxu1 %v6057_v48  ;;  %v6105_v2 = vcombine.high %v1489_v38, %v1493_v40  ;;  %v1496_v48 = vld [vmem:[#allocation9 + $0xa80] sm:$0xff]  ;;  %v1533_v29 = vld [vmem:[#allocation9 + $0xba8] sm:$0xff] }
 0x1e9   :  { %v6110_v61 = vcombine.low %v1496_v48, %v1500_v49  ;;  %v1532_v21 = vld [vmem:[#allocation9 + $0xba0] sm:$0xff]  ;;  %v6145_v37 = vcombine.high %v1529_v27, %v1533_v29 }
 0x1ea   :  { %v6143_v36 = vcombine.high %v1528_v20, %v1532_v21 }
 0x1eb   :  { %4363 = vmatpush1.bf16.msra.mxu0 %v6054_v52  ;;  %4527 = vmatpush1.bf16.msra.mxu1 %v6056_v53  ;;  %v6104_v52 = vcombine.low %v1489_v38, %v1493_v40  ;;  %v6111_v53 = vcombine.high %v1496_v48, %v1500_v49  ;;  %v1536_v38 = vld [vmem:[#allocation9 + $0xbc0] sm:$0xff]  ;;  %v6142_v48 = vcombine.low %v1528_v20, %v1532_v21  ;;  %v1569_v20 = vld [vmem:[#allocation9 + $0xcc8] sm:$0xff] }
 0x1ec   :  { %4364 = vmatprep.subr.bf16.mxu0 %v6063_v55  ;;  %4528 = vmatprep.subr.bf16.mxu1 %v6065_v56  ;;  %v6113_v55 = vcombine.high %v1497_v50, %v1501_v24  ;;  %v1504_v56 = vld [vmem:[#allocation9 + $0xac0] sm:$0xff]  ;;  %v6144_v49 = vcombine.low %v1529_v27, %v1533_v29  ;;  %v1573_v21 = vld [vmem:[#allocation9 + $0xce8] sm:$0xff] }
 0x1ed   :  { %v6118_v1 = vcombine.low %v1504_v56, %v1508_v57  ;;  %v1540_v40 = vld [vmem:[#allocation9 + $0xbe0] sm:$0xff] }
 0x1ef   :  { %4365 = vmatpush1.bf16.msra.mxu0 %v6062_v62  ;;  %4529 = vmatpush1.bf16.msra.mxu1 %v6064_v3  ;;  %v6112_v62 = vcombine.low %v1497_v50, %v1501_v24  ;;  %v6119_v3 = vcombine.high %v1504_v56, %v1508_v57  ;;  %v6151_v50 = vcombine.high %v1536_v38, %v1540_v40 }
 0x1f0   :  { %4366 = vmatprep.subr.bf16.mxu0 %v6071_v54  ;;  %4530 = vmatprep.subr.bf16.mxu1 %v6073_v7  ;;  %v6121_v54 = vcombine.high %v1505_v58, %v1509_v59  ;;  %v1512_v7 = vld [vmem:[#allocation9 + $0xb00] sm:$0xff] }
 0x1f3   :  { %4367 = vmatpush1.bf16.msra.mxu0 %v6070_v4  ;;  %4531 = vmatpush1.bf16.msra.mxu1 %v6072_v5  ;;  %v6120_v4 = vcombine.low %v1505_v58, %v1509_v59  ;;  %v6127_v5 = vcombine.high %v1512_v7, %v1516_v8 }
 0x1f4   :  { %4368 = vmatprep.subr.bf16.mxu0 %v6079_v9  ;;  %4532 = vmatprep.subr.bf16.mxu1 %v6081_v10  ;;  %v6129_v9 = vcombine.high %v1513_v60, %v1517_v0  ;;  %v1520_v10 = vld [vmem:[#allocation9 + $0xb40] sm:$0xff] }
 0x1f7   :  { %4369 = vmatpush1.bf16.msra.mxu0 %v6078_v15  ;;  %4533 = vmatpush1.bf16.msra.mxu1 %v6080_v16  ;;  %v6126_v15 = vcombine.low %v1512_v7, %v1516_v8  ;;  %v6128_v16 = vcombine.low %v1513_v60, %v1517_v0 }
 0x1f8   :  { %4370 = vmatprep.subr.bf16.mxu0 %v6087_v17  ;;  %4534 = vmatprep.subr.bf16.mxu1 %v6089_v18  ;;  %v6135_v17 = vcombine.high %v1520_v10, %v1524_v11  ;;  %v6137_v18 = vcombine.high %v1521_v12, %v1525_v19 }
 0x1fb   :  { %4371 = vmatpush1.bf16.msra.mxu0 %v6086_v30  ;;  %4535 = vmatpush1.bf16.msra.mxu1 %v6088_v32  ;;  %v151_v30 = vsub.s32 7, %v6930_v22  ;;  %v140_v32 = vrot.slane %v6933_v25, %v139_v14 }
 0x1fc   :  { %4372 = vmatprep.subr.bf16.mxu0 %v6095_v33  ;;  %4536 = vmatprep.subr.bf16.mxu1 %v6097_v34  ;;  %v6134_v33 = vcombine.low %v1520_v10, %v1524_v11  ;;  %v6136_v34 = vcombine.low %v1521_v12, %v1525_v19  ;;  %v1565_v10 = vld [vmem:[#allocation9 + $0xca8] sm:$0xff] }
 0x1ff   :  { %4373 = vmatpush1.bf16.msra.mxu0 %v6094_v44  ;;  %4537 = vmatpush1.bf16.msra.mxu1 %v6096_v45  ;;  %v1537_v44 = vld [vmem:[#allocation9 + $0xbc8] sm:$0xff] }
 0x200   :  { %4374 = vmatprep.subr.bf16.mxu0 %v6103_v47  ;;  %4538 = vmatprep.subr.bf16.mxu1 %v6105_v2  ;;  %v1541_v45 = vld [vmem:[#allocation9 + $0xbe8] sm:$0xff]  ;;  %v152_v47 = vrot.slane %v6933_v25, %v151_v30  ;;  %v1121_v2 = vadd.f32 %v6975_v63, %v140_v32  ;;  %v6150_v25 = vcombine.low %v1536_v38, %v1540_v40 }
 0x201   :  { %v6153_v24 = vcombine.high %v1537_v44, %v1541_v45  ;;  %v6152_v58 = vcombine.low %v1537_v44, %v1541_v45  ;;  %v1581_v38 = vld [vmem:[#allocation9 + $0xd28] sm:$0xff]  ;;  %v6184_v44 = vcombine.low %v1569_v20, %v1573_v21 }
 0x202   :  { %v1124_v56 = vadd.f32 %v6987_v39, %v152_v47  ;;  %v1148_v57 = vmax.f32 %v1121_v2, 0.0  ;;  %v1584_v2 = vld [vmem:[#allocation9 + $0xd40] sm:$0xff] }
 0x203   :  { %4375 = vmatpush1.bf16.msra.mxu0 %v6102_v51  ;;  %4539 = vmatpush1.bf16.msra.mxu1 %v6104_v52  ;;  %v1544_v51 = vld [vmem:[#allocation9 + $0xc00] sm:$0xff] }
 0x204   :  { %4376 = vmatprep.subr.bf16.mxu0 %v6111_v53  ;;  %4540 = vmatprep.subr.bf16.mxu1 %v6113_v55  ;;  %v1548_v52 = vld [vmem:[#allocation9 + $0xc20] sm:$0xff]  ;;  %v1545_v53 = vld [vmem:[#allocation9 + $0xc08] sm:$0xff]  ;;  %v1151_v7 = vmax.f32 %v1124_v56, 0.0  ;;  %v6999_v8 = vpack.c.bf16 %v1148_v57, %v1148_v57 }
 0x205   :  { %v1549_v55 = vld [vmem:[#allocation9 + $0xc28] sm:$0xff]  ;;  %v6159_v63 = vcombine.high %v1544_v51, %v1548_v52  ;;  %v6158_v60 = vcombine.low %v1544_v51, %v1548_v52  ;;  %v1596_v56 = vld [vmem:[#allocation9 + $0xda0] sm:$0xff] }
 0x206   :  { %v6161_v59 = vcombine.high %v1545_v53, %v1549_v55  ;;  %v6160_v39 = vcombine.low %v1545_v53, %v1549_v55  ;;  %v7001_v11 = vpack.c.bf16 %v1151_v7, %v1151_v7  ;;  %v1592_v55 = vld [vmem:[#allocation9 + $0xd80] sm:$0xff]  ;;  %v1593_v57 = vld [vmem:[#allocation9 + $0xd88] sm:$0xff] }
 0x207   :  { %4377 = vmatpush1.bf16.msra.mxu0 %v6110_v61  ;;  %4541 = vmatpush1.bf16.msra.mxu1 %v6112_v62  ;;  %v1552_v61 = vld [vmem:[#allocation9 + $0xc40] sm:$0xff]  ;;  %v1605_v7 = vld [vmem:[#allocation9 + $0xde8] sm:$0xff] }
 0x208   :  { %4378 = vmatprep.subr.bf16.mxu0 %v6119_v3  ;;  %4542 = vmatprep.subr.bf16.mxu1 %v6121_v54  ;;  %v1556_v62 = vld [vmem:[#allocation9 + $0xc60] sm:$0xff]  ;;  %v1553_v3 = vld [vmem:[#allocation9 + $0xc48] sm:$0xff] }
 0x209   :  { %v1557_v54 = vld [vmem:[#allocation9 + $0xc68] sm:$0xff]  ;;  %v6167_v0 = vcombine.high %v1552_v61, %v1556_v62  ;;  %v6166_v12 = vcombine.low %v1552_v61, %v1556_v62  ;;  %v1600_v62 = vld [vmem:[#allocation9 + $0xdc0] sm:$0xff] }
 0x20a   :  { %v6168_v19 = vcombine.low %v1553_v3, %v1557_v54 }
 0x20b   :  { %4379 = vmatpush1.bf16.msra.mxu0 %v6118_v1  ;;  %4543 = vmatpush1.bf16.msra.mxu1 %v6120_v4  ;;  %v6169_v1 = vcombine.high %v1553_v3, %v1557_v54  ;;  %v1560_v4 = vld [vmem:[#allocation9 + $0xc80] sm:$0xff]  ;;  %v1601_v54 = vld [vmem:[#allocation9 + $0xdc8] sm:$0xff] }
 0x20c   :  { %4380 = vmatprep.subr.bf16.mxu0 %v6127_v5  ;;  %4544 = vmatprep.subr.bf16.mxu1 %v6129_v9  ;;  %v1564_v5 = vld [vmem:[#allocation9 + $0xca0] sm:$0xff]  ;;  %v1561_v9 = vld [vmem:[#allocation9 + $0xc88] sm:$0xff] }
 0x20d   :  { %v6174_v27 = vcombine.low %v1560_v4, %v1564_v5  ;;  %v6176_v29 = vcombine.low %v1561_v9, %v1565_v10  ;;  %v1604_v3 = vld [vmem:[#allocation9 + $0xde0] sm:$0xff] }
 0x20f   :  { %4381 = vmatpush1.bf16.msra.mxu0 %v6126_v15  ;;  %4545 = vmatpush1.bf16.msra.mxu1 %v6128_v16  ;;  %v6175_v15 = vcombine.high %v1560_v4, %v1564_v5  ;;  %v6177_v16 = vcombine.high %v1561_v9, %v1565_v10  ;;  %v1608_v4 = vld [vmem:[#allocation9 + $0xe00] sm:$0xff]  ;;  %v1609_v9 = vld [vmem:[#allocation9 + $0xe08] sm:$0xff] }
 0x210   :  { %4382 = vmatprep.subr.bf16.mxu0 %v6135_v17  ;;  %4546 = vmatprep.subr.bf16.mxu1 %v6137_v18  ;;  %v1568_v17 = vld [vmem:[#allocation9 + $0xcc0] sm:$0xff]  ;;  %v1613_v10 = vld [vmem:[#allocation9 + $0xe28] sm:$0xff] }
 0x211   :  { %v1572_v18 = vld [vmem:[#allocation9 + $0xce0] sm:$0xff] }
 0x212   :  { %v6183_v32 = vcombine.high %v1568_v17, %v1572_v18  ;;  %v6182_v40 = vcombine.low %v1568_v17, %v1572_v18  ;;  %v1612_v5 = vld [vmem:[#allocation9 + $0xe20] sm:$0xff] }
 0x213   :  { %4383 = vmatpush1.bf16.msra.mxu0 %v6134_v33  ;;  %4547 = vmatpush1.bf16.msra.mxu1 %v6136_v34  ;;  %v6185_v33 = vcombine.high %v1569_v20, %v1573_v21  ;;  %v1576_v34 = vld [vmem:[#allocation9 + $0xd00] sm:$0xff]  ;;  %v1617_v20 = vld [vmem:[#allocation9 + $0xe48] sm:$0xff] }
 0x214   :  { %4384 = vmatprep.subr.bf16.mxu0 %v6143_v36  ;;  %4548 = vmatprep.subr.bf16.mxu1 %v6145_v37  ;;  %v1580_v36 = vld [vmem:[#allocation9 + $0xd20] sm:$0xff]  ;;  %v1577_v37 = vld [vmem:[#allocation9 + $0xd08] sm:$0xff] }
 0x215   :  { %v6191_v45 = vcombine.high %v1576_v34, %v1580_v36  ;;  %v6193_v47 = vcombine.high %v1577_v37, %v1581_v38  ;;  %v6192_v51 = vcombine.low %v1577_v37, %v1581_v38  ;;  %v1616_v17 = vld [vmem:[#allocation9 + $0xe40] sm:$0xff]  ;;  %v1621_v21 = vld [vmem:[#allocation9 + $0xe68] sm:$0xff] }
 0x216   :  { %v1620_v18 = vld [vmem:[#allocation9 + $0xe60] sm:$0xff]  ;;  %v1625_v37 = vld [vmem:[#allocation9 + $0xe88] sm:$0xff] }
 0x217   :  { %4385 = vmatpush1.bf16.msra.mxu0 %v6142_v48  ;;  %4549 = vmatpush1.bf16.msra.mxu1 %v6144_v49  ;;  %v1588_v48 = vld [vmem:[#allocation9 + $0xd60] sm:$0xff]  ;;  %v1585_v49 = vld [vmem:[#allocation9 + $0xd48] sm:$0xff] }
 0x218   :  { %4386 = vmatprep.subr.bf16.mxu0 %v6151_v50  ;;  %4550 = vmatprep.subr.bf16.mxu1 %v6153_v24  ;;  %v1589_v50 = vld [vmem:[#allocation9 + $0xd68] sm:$0xff]  ;;  %v6190_v24 = vcombine.low %v1576_v34, %v1580_v36  ;;  %v6199_v52 = vcombine.high %v1584_v2, %v1588_v48  ;;  %v1624_v34 = vld [vmem:[#allocation9 + $0xe80] sm:$0xff] }
 0x219   :  { %v6201_v53 = vcombine.high %v1585_v49, %v1589_v50  ;;  %v1628_v36 = vld [vmem:[#allocation9 + $0xea0] sm:$0xff]  ;;  %v1629_v38 = vld [vmem:[#allocation9 + $0xea8] sm:$0xff] }
 0x21b   :  { %4387 = vmatpush1.bf16.msra.mxu0 %v6150_v25  ;;  %4551 = vmatpush1.bf16.msra.mxu1 %v6152_v58  ;;  %v1597_v25 = vld [vmem:[#allocation9 + $0xda8] sm:$0xff]  ;;  %v6198_v58 = vcombine.low %v1584_v2, %v1588_v48  ;;  %v1632_v2 = vld [vmem:[#allocation9 + $0xec0] sm:$0xff] }
 0x21c   :  { %4397 = vmatprep.subr.bf16.mxu0 %v6159_v63  ;;  %4561 = vmatprep.subr.bf16.mxu1 %v6161_v59  ;;  %v6200_v63 = vcombine.low %v1585_v49, %v1589_v50  ;;  %v6207_v59 = vcombine.high %v1592_v55, %v1596_v56  ;;  %v6209_v61 = vcombine.high %v1593_v57, %v1597_v25  ;;  %v1636_v48 = vld [vmem:[#allocation9 + $0xee0] sm:$0xff]  ;;  %v1633_v49 = vld [vmem:[#allocation9 + $0xec8] sm:$0xff] }
 0x21d   :  { %v1637_v50 = vld [vmem:[#allocation9 + $0xee8] sm:$0xff] }
 0x21e   :  { %4389 = vmatmul.mubr.bf16.vlgmr.msra.gmra.mrb[8].mxu0 %v6999_v8  ;;  %4553 = vmatmul.mubr.bf16.vlgmr.msra.gmra.mrb[8].mxu1 %v6999_v8 }
 0x21f   :  { %4398 = vmatpush1.bf16.msra.mxu0 %v6158_v60  ;;  %4562 = vmatpush1.bf16.msra.mxu1 %v6160_v39  ;;  %v6206_v60 = vcombine.low %v1592_v55, %v1596_v56  ;;  %v6208_v39 = vcombine.low %v1593_v57, %v1597_v25  ;;  %v1640_v55 = vld [vmem:[#allocation9 + $0xf00] sm:$0xff]  ;;  %v1641_v57 = vld [vmem:[#allocation9 + $0xf08] sm:$0xff] }
 0x220   :  { %4399 = vmatprep.subr.bf16.mxu0 %v6167_v0  ;;  %4563 = vmatprep.subr.bf16.mxu1 %v6169_v1  ;;  %v6215_v0 = vcombine.high %v1600_v62, %v1604_v3  ;;  %v6217_v1 = vcombine.high %v1601_v54, %v1605_v7  ;;  %v1644_v56 = vld [vmem:[#allocation9 + $0xf20] sm:$0xff]  ;;  %v1645_v25 = vld [vmem:[#allocation9 + $0xf28] sm:$0xff] }
 0x221   :  { %4429 = vmatprep.mubr.bf16.mxu0 %v7001_v11  ;;  %4593 = vmatprep.mubr.bf16.mxu1 %v7001_v11 }
 0x223   :  { %4400 = vmatpush1.bf16.msra.mxu0 %v6166_v12  ;;  %4564 = vmatpush1.bf16.msra.mxu1 %v6168_v19  ;;  %v6214_v12 = vcombine.low %v1600_v62, %v1604_v3  ;;  %v6216_v19 = vcombine.low %v1601_v54, %v1605_v7  ;;  %v1648_v62 = vld [vmem:[#allocation9 + $0xf40] sm:$0xff]  ;;  %v1649_v54 = vld [vmem:[#allocation9 + $0xf48] sm:$0xff] }
 0x224   :  { %4401 = vmatprep.subr.bf16.mxu0 %v6175_v15  ;;  %4565 = vmatprep.subr.bf16.mxu1 %v6177_v16  ;;  %v6223_v15 = vcombine.high %v1608_v4, %v1612_v5  ;;  %v6225_v16 = vcombine.high %v1609_v9, %v1613_v10  ;;  %v1652_v3 = vld [vmem:[#allocation9 + $0xf60] sm:$0xff]  ;;  %v1653_v7 = vld [vmem:[#allocation9 + $0xf68] sm:$0xff] }
 0x227   :  { %4402 = vmatpush1.bf16.msra.mxu0 %v6174_v27  ;;  %4566 = vmatpush1.bf16.msra.mxu1 %v6176_v29  ;;  %v6222_v27 = vcombine.low %v1608_v4, %v1612_v5  ;;  %v6224_v29 = vcombine.low %v1609_v9, %v1613_v10  ;;  %v6265_v4 = vcombine.high %v1649_v54, %v1653_v7  ;;  %v1656_v5 = vld [vmem:[#allocation9 + $0xf80] sm:$0xff]  ;;  %v1657_v10 = vld [vmem:[#allocation9 + $0xf88] sm:$0xff] }
 0x228   :  { %4403 = vmatprep.subr.bf16.mxu0 %v6183_v32  ;;  %4567 = vmatprep.subr.bf16.mxu1 %v6185_v33  ;;  %v6231_v32 = vcombine.high %v1616_v17, %v1620_v18  ;;  %v6233_v33 = vcombine.high %v1617_v20, %v1621_v21  ;;  %v1660_v9 = vld [vmem:[#allocation9 + $0xfa0] sm:$0xff] }
 0x22b   :  { %4404 = vmatpush1.bf16.msra.mxu0 %v6182_v40  ;;  %4568 = vmatpush1.bf16.msra.mxu1 %v6184_v44  ;;  %v6230_v40 = vcombine.low %v1616_v17, %v1620_v18  ;;  %v6232_v44 = vcombine.low %v1617_v20, %v1621_v21  ;;  %v6271_v18 = vcombine.high %v1656_v5, %v1660_v9  ;;  %v1664_v21 = vld [vmem:[#allocation9 + $0xfc0] sm:$0xff] }
 0x22c   :  { %4405 = vmatprep.subr.bf16.mxu0 %v6191_v45  ;;  %4569 = vmatprep.subr.bf16.mxu1 %v6193_v47  ;;  %v6239_v45 = vcombine.high %v1624_v34, %v1628_v36  ;;  %v6241_v47 = vcombine.high %v1625_v37, %v1629_v38 }
 0x22f   :  { %4406 = vmatpush1.bf16.msra.mxu0 %v6190_v24  ;;  %4570 = vmatpush1.bf16.msra.mxu1 %v6192_v51  ;;  %v6238_v24 = vcombine.low %v1624_v34, %v1628_v36  ;;  %v6240_v51 = vcombine.low %v1625_v37, %v1629_v38 }
 0x230   :  { %4407 = vmatprep.subr.bf16.mxu0 %v6199_v52  ;;  %4571 = vmatprep.subr.bf16.mxu1 %v6201_v53  ;;  %v6247_v52 = vcombine.high %v1632_v2, %v1636_v48  ;;  %v6249_v53 = vcombine.high %v1633_v49, %v1637_v50 }
 0x233   :  { %4408 = vmatpush1.bf16.msra.mxu0 %v6198_v58  ;;  %4572 = vmatpush1.bf16.msra.mxu1 %v6200_v63  ;;  %v6246_v58 = vcombine.low %v1632_v2, %v1636_v48  ;;  %v6248_v63 = vcombine.low %v1633_v49, %v1637_v50 }
 0x234   :  { %4409 = vmatprep.subr.bf16.mxu0 %v6207_v59  ;;  %4573 = vmatprep.subr.bf16.mxu1 %v6209_v61  ;;  %v6255_v59 = vcombine.high %v1640_v55, %v1644_v56  ;;  %v6257_v61 = vcombine.high %v1641_v57, %v1645_v25 }
 0x237   :  { %4410 = vmatpush1.bf16.msra.mxu0 %v6206_v60  ;;  %4574 = vmatpush1.bf16.msra.mxu1 %v6208_v39  ;;  %v6254_v60 = vcombine.low %v1640_v55, %v1644_v56  ;;  %v6256_v39 = vcombine.low %v1641_v57, %v1645_v25 }
 0x238   :  { %4411 = vmatprep.subr.bf16.mxu0 %v6215_v0  ;;  %4575 = vmatprep.subr.bf16.mxu1 %v6217_v1  ;;  %v147_v0 = vsub.s32 6, %v6930_v22  ;;  %v6263_v1 = vcombine.high %v1648_v62, %v1652_v3 }
 0x23b   :  { %4412 = vmatpush1.bf16.msra.mxu0 %v6214_v12  ;;  %4576 = vmatpush1.bf16.msra.mxu1 %v6216_v19  ;;  %v1661_v12 = vld [vmem:[#allocation9 + $0xfa8] sm:$0xff]  ;;  %v6262_v19 = vcombine.low %v1648_v62, %v1652_v3  ;;  %v1183_v62 = vld [vmem:[#allocation9 + $0xb8] sm:$0xff] }
 0x23c   :  { %4413 = vmatprep.subr.bf16.mxu0 %v6223_v15  ;;  %4577 = vmatprep.subr.bf16.mxu1 %v6225_v16  ;;  %v6264_v15 = vcombine.low %v1649_v54, %v1653_v7  ;;  %v6573_v16 = vld [vmem:[#allocation8] sm:$0xff]  ;;  %v6273_v20 = vcombine.high %v1657_v10, %v1661_v12  ;;  %v6272_v34 = vcombine.low %v1657_v10, %v1661_v12 }
 0x23d   :  { %v148_v17 = vrot.slane %v6573_v16, %v147_v0  ;;  %v1198_v16 = vld [vmem:[#allocation9 + $0x130] sm:$0xff] }
 0x23f   :  { %4414 = vmatpush1.bf16.msra.mxu0 %v6222_v27  ;;  %4578 = vmatpush1.bf16.msra.mxu1 %v6224_v29  ;;  %v1668_v27 = vld [vmem:[#allocation9 + $0xfe0] sm:$0xff]  ;;  %v1665_v29 = vld [vmem:[#allocation9 + $0xfc8] sm:$0xff]  ;;  %v1123_v36 = vadd.f32 %v6983_v35, %v148_v17  ;;  %v1171_v35 = vld [vmem:[#allocation9 + $0x58] sm:$0xff] }
 0x240   :  { %4415 = vmatprep.subr.bf16.mxu0 %v6231_v32  ;;  %4579 = vmatprep.subr.bf16.mxu1 %v6233_v33  ;;  %v1669_v32 = vld [vmem:[#allocation9 + $0xfe8] sm:$0xff]  ;;  %v6270_v33 = vcombine.low %v1656_v5, %v1660_v9  ;;  %v6279_v37 = vcombine.high %v1664_v21, %v1668_v27  ;;  %v6278_v2 = vcombine.low %v1664_v21, %v1668_v27  ;;  %v1191_v5 = vld [vmem:[#allocation9 + $0xf8] sm:$0xff] }
 0x241   :  { %v6281_v38 = vcombine.high %v1665_v29, %v1669_v32  ;;  %v6280_v48 = vcombine.low %v1665_v29, %v1669_v32  ;;  %v1150_v49 = vmax.f32 %v1123_v36, 0.0  ;;  %v1199_v17 = vld [vmem:[#allocation9 + $0x138] sm:$0xff]  ;;  %v1202_v29 = vld [vmem:[#allocation9 + $0x150] sm:$0xff] }
 0x242   :  { %v1206_v32 = vld [vmem:[#allocation9 + $0x170] sm:$0xff] }
 0x243   :  { %4416 = vmatpush1.bf16.msra.mxu0 %v6230_v40  ;;  %4580 = vmatpush1.bf16.msra.mxu1 %v6232_v44  ;;  %v1162_v40 = vld [vmem:[#allocation9 + $0x10] sm:$0xff]  ;;  %v7011_v56 = vpack.c.bf16 %v1150_v49, %v1150_v49 }
 0x244   :  { %4417 = vmatprep.subr.bf16.mxu0 %v6239_v45  ;;  %4581 = vmatprep.subr.bf16.mxu1 %v6241_v47  ;;  %v1166_v44 = vld [vmem:[#allocation9 + $0x30] sm:$0xff]  ;;  %v1163_v45 = vld [vmem:[#allocation9 + $0x18] sm:$0xff] }
 0x245   :  { %v1167_v47 = vld [vmem:[#allocation9 + $0x38] sm:$0xff]  ;;  %v5779_v50 = vcombine.high %v1162_v40, %v1166_v44  ;;  %v5778_v55 = vcombine.low %v1162_v40, %v1166_v44  ;;  %v1210_v44 = vld [vmem:[#allocation9 + $0x190] sm:$0xff] }
 0x246   :  { %v5780_v57 = vcombine.low %v1163_v45, %v1167_v47 }
 0x247   :  { %4418 = vmatpush1.bf16.msra.mxu0 %v6238_v24  ;;  %4582 = vmatpush1.bf16.msra.mxu1 %v6240_v51  ;;  %v5781_v24 = vcombine.high %v1163_v45, %v1167_v47  ;;  %v1170_v51 = vld [vmem:[#allocation9 + $0x50] sm:$0xff]  ;;  %v1211_v47 = vld [vmem:[#allocation9 + $0x198] sm:$0xff] }
 0x248   :  { %4419 = vmatprep.subr.bf16.mxu0 %v6247_v52  ;;  %4583 = vmatprep.subr.bf16.mxu1 %v6249_v53  ;;  %v1174_v52 = vld [vmem:[#allocation9 + $0x70] sm:$0xff]  ;;  %v1175_v53 = vld [vmem:[#allocation9 + $0x78] sm:$0xff] }
 0x249   :  { %v5787_v25 = vcombine.high %v1170_v51, %v1174_v52  ;;  %v5786_v3 = vcombine.low %v1170_v51, %v1174_v52  ;;  %v5788_v54 = vcombine.low %v1171_v35, %v1175_v53  ;;  %v1214_v45 = vld [vmem:[#allocation9 + $0x1b0] sm:$0xff] }
 0x24a   :  { %v1218_v51 = vld [vmem:[#allocation9 + $0x1d0] sm:$0xff] }
 0x24b   :  { %4420 = vmatpush1.bf16.msra.mxu0 %v6246_v58  ;;  %4584 = vmatpush1.bf16.msra.mxu1 %v6248_v63  ;;  %v5789_v58 = vcombine.high %v1171_v35, %v1175_v53  ;;  %v1178_v63 = vld [vmem:[#allocation9 + $0x90] sm:$0xff]  ;;  %v1219_v35 = vld [vmem:[#allocation9 + $0x1d8] sm:$0xff] }
 0x24c   :  { %4421 = vmatprep.subr.bf16.mxu0 %v6255_v59  ;;  %4585 = vmatprep.subr.bf16.mxu1 %v6257_v61  ;;  %v1182_v59 = vld [vmem:[#allocation9 + $0xb0] sm:$0xff]  ;;  %v1179_v61 = vld [vmem:[#allocation9 + $0x98] sm:$0xff] }
 0x24d   :  { %v5795_v7 = vcombine.high %v1178_v63, %v1182_v59  ;;  %v5794_v9 = vcombine.low %v1178_v63, %v1182_v59  ;;  %v5796_v10 = vcombine.low %v1179_v61, %v1183_v62  ;;  %v1222_v52 = vld [vmem:[#allocation9 + $0x1f0] sm:$0xff]  ;;  %v1223_v53 = vld [vmem:[#allocation9 + $0x1f8] sm:$0xff] }
 0x24e   :  { %v1226_v63 = vld [vmem:[#allocation9 + $0x210] sm:$0xff] }
 0x24f   :  { %4422 = vmatpush1.bf16.msra.mxu0 %v6254_v60  ;;  %4586 = vmatpush1.bf16.msra.mxu1 %v6256_v39  ;;  %v5797_v60 = vcombine.high %v1179_v61, %v1183_v62  ;;  %v1186_v39 = vld [vmem:[#allocation9 + $0xd0] sm:$0xff]  ;;  %v1227_v61 = vld [vmem:[#allocation9 + $0x218] sm:$0xff] }
 0x250   :  { %4423 = vmatprep.subr.bf16.mxu0 %v6263_v1  ;;  %4587 = vmatprep.subr.bf16.mxu1 %v6265_v4  ;;  %v1190_v1 = vld [vmem:[#allocation9 + $0xf0] sm:$0xff]  ;;  %v1187_v4 = vld [vmem:[#allocation9 + $0xd8] sm:$0xff] }
 0x251   :  { %v5803_v12 = vcombine.high %v1186_v39, %v1190_v1  ;;  %v1230_v59 = vld [vmem:[#allocation9 + $0x230] sm:$0xff]  ;;  %v1231_v62 = vld [vmem:[#allocation9 + $0x238] sm:$0xff] }
 0x253   :  { %4424 = vmatpush1.bf16.msra.mxu0 %v6262_v19  ;;  %4588 = vmatpush1.bf16.msra.mxu1 %v6264_v15  ;;  %v5805_v19 = vcombine.high %v1187_v4, %v1191_v5  ;;  %v1194_v15 = vld [vmem:[#allocation9 + $0x110] sm:$0xff] }
 0x254   :  { %4425 = vmatprep.subr.bf16.mxu0 %v6271_v18  ;;  %4589 = vmatprep.subr.bf16.mxu1 %v6273_v20  ;;  %v5802_v18 = vcombine.low %v1186_v39, %v1190_v1  ;;  %v5804_v20 = vcombine.low %v1187_v4, %v1191_v5  ;;  %v5811_v21 = vcombine.high %v1194_v15, %v1198_v16  ;;  %v1234_v39 = vld [vmem:[#allocation9 + $0x250] sm:$0xff]  ;;  %v1235_v4 = vld [vmem:[#allocation9 + $0x258] sm:$0xff] }
 0x255   :  { %v5810_v36 = vcombine.low %v1194_v15, %v1198_v16  ;;  %v1238_v1 = vld [vmem:[#allocation9 + $0x270] sm:$0xff]  ;;  %v1239_v5 = vld [vmem:[#allocation9 + $0x278] sm:$0xff] }
 0x256   :  { %v1242_v15 = vld [vmem:[#allocation9 + $0x290] sm:$0xff] }
 0x257   :  { %4426 = vmatpush1.bf16.msra.mxu0 %v6270_v33  ;;  %4590 = vmatpush1.bf16.msra.mxu1 %v6272_v34  ;;  %v1203_v33 = vld [vmem:[#allocation9 + $0x158] sm:$0xff]  ;;  %v1246_v16 = vld [vmem:[#allocation9 + $0x2b0] sm:$0xff] }
 0x258   :  { %4427 = vmatprep.subr.bf16.mxu0 %v6279_v37  ;;  %4591 = vmatprep.subr.bf16.mxu1 %v6281_v38  ;;  %v1207_v34 = vld [vmem:[#allocation9 + $0x178] sm:$0xff]  ;;  %v5819_v38 = vcombine.high %v1202_v29, %v1206_v32 }
 0x259   :  { %v5821_v40 = vcombine.high %v1203_v33, %v1207_v34  ;;  %v5820_v49 = vcombine.low %v1203_v33, %v1207_v34  ;;  %v1251_v33 = vld [vmem:[#allocation9 + $0x2d8] sm:$0xff] }
 0x25a   :  { %v1255_v34 = vld [vmem:[#allocation9 + $0x2f8] sm:$0xff] }
 0x25b   :  { %4428 = vmatpush1.bf16.msra.mxu0 %v6278_v2  ;;  %4592 = vmatpush1.bf16.msra.mxu1 %v6280_v48  ;;  %v1215_v2 = vld [vmem:[#allocation9 + $0x1b8] sm:$0xff]  ;;  %v5818_v48 = vcombine.low %v1202_v29, %v1206_v32  ;;  %v1250_v29 = vld [vmem:[#allocation9 + $0x2d0] sm:$0xff] }
 0x25c   :  { %4602 = vmatprep.subr.bf16.mxu0 %v5779_v50  ;;  %4766 = vmatprep.subr.bf16.mxu1 %v5781_v24  ;;  %v5827_v50 = vcombine.high %v1210_v44, %v1214_v45  ;;  %v5829_v24 = vcombine.high %v1211_v47, %v1215_v2  ;;  %v1254_v32 = vld [vmem:[#allocation9 + $0x2f0] sm:$0xff] }
 0x25e   :  { %4430 = vmatmul.mubr.bf16.vlgmr.msra.gmra.mrb[8].mxu0 %v7011_v56  ;;  %4594 = vmatmul.mubr.bf16.vlgmr.msra.gmra.mrb[8].mxu1 %v7011_v56 }
 0x25f   :  { %4603 = vmatpush1.bf16.msra.mxu0 %v5778_v55  ;;  %4634 = vmatprep.mubr.bf16.mxu0 %v6943_v42  ;;  %v5826_v55 = vcombine.low %v1210_v44, %v1214_v45  ;;  %v1258_v44 = vld [vmem:[#allocation9 + $0x310] sm:$0xff] }
 0x260   :  { %4767 = vmatpush1.bf16.msra.mxu1 %v5780_v57  ;;  %4798 = vmatprep.mubr.bf16.mxu1 %v6943_v42  ;;  %v1195_v42 = vld [vmem:[#allocation9 + $0x118] sm:$0xff]  ;;  %v5828_v57 = vcombine.low %v1211_v47, %v1215_v2  ;;  %v1262_v45 = vld [vmem:[#allocation9 + $0x330] sm:$0xff] }
 0x261   :  { %4604 = vmatprep.subr.bf16.mxu0 %v5787_v25  ;;  %4768 = vmatprep.subr.bf16.mxu1 %v5789_v58  ;;  %v5813_v27 = vcombine.high %v1195_v42, %v1199_v17  ;;  %v5812_v37 = vcombine.low %v1195_v42, %v1199_v17  ;;  %v5835_v25 = vcombine.high %v1218_v51, %v1222_v52  ;;  %v1243_v42 = vld [vmem:[#allocation9 + $0x298] sm:$0xff] }
 0x262   :  { %v5837_v58 = vcombine.high %v1219_v35, %v1223_v53  ;;  %v1247_v17 = vld [vmem:[#allocation9 + $0x2b8] sm:$0xff] }
 0x263   :  { %4605 = vmatpush1.bf16.msra.mxu0 %v5786_v3  ;;  %v5834_v3 = vcombine.low %v1218_v51, %v1222_v52  ;;  %v1259_v47 = vld [vmem:[#allocation9 + $0x318] sm:$0xff]  ;;  %v1266_v51 = vld [vmem:[#allocation9 + $0x350] sm:$0xff] }
 0x264   :  { %4769 = vmatpush1.bf16.msra.mxu1 %v5788_v54  ;;  %4606 = vmatprep.subr.bf16.mxu0 %v5795_v7  ;;  %v5836_v54 = vcombine.low %v1219_v35, %v1223_v53  ;;  %v5843_v7 = vcombine.high %v1226_v63, %v1230_v59  ;;  %v1263_v2 = vld [vmem:[#allocation9 + $0x338] sm:$0xff]  ;;  %v1270_v52 = vld [vmem:[#allocation9 + $0x370] sm:$0xff] }
 0x265   :  { %4770 = vmatprep.subr.bf16.mxu1 %v5797_v60  ;;  %v5845_v60 = vcombine.high %v1227_v61, %v1231_v62  ;;  %v1267_v35 = vld [vmem:[#allocation9 + $0x358] sm:$0xff] }
 0x266   :  { %v1271_v53 = vld [vmem:[#allocation9 + $0x378] sm:$0xff] }
 0x267   :  { %4607 = vmatpush1.bf16.msra.mxu0 %v5794_v9  ;;  %v5842_v9 = vcombine.low %v1226_v63, %v1230_v59  ;;  %v1274_v63 = vld [vmem:[#allocation9 + $0x390] sm:$0xff] }
 0x268   :  { %4771 = vmatpush1.bf16.msra.mxu1 %v5796_v10  ;;  %4608 = vmatprep.subr.bf16.mxu0 %v5803_v12  ;;  %v5844_v10 = vcombine.low %v1227_v61, %v1231_v62  ;;  %v5851_v12 = vcombine.high %v1234_v39, %v1238_v1  ;;  %v1278_v59 = vld [vmem:[#allocation9 + $0x3b0] sm:$0xff]  ;;  %v1275_v61 = vld [vmem:[#allocation9 + $0x398] sm:$0xff] }
 0x269   :  { %4772 = vmatprep.subr.bf16.mxu1 %v5805_v19  ;;  %v5853_v19 = vcombine.high %v1235_v4, %v1239_v5  ;;  %v1279_v62 = vld [vmem:[#allocation9 + $0x3b8] sm:$0xff] }
 0x26b   :  { %4609 = vmatpush1.bf16.msra.mxu0 %v5802_v18  ;;  %v5850_v18 = vcombine.low %v1234_v39, %v1238_v1  ;;  %v1282_v39 = vld [vmem:[#allocation9 + $0x3d0] sm:$0xff] }
 0x26c   :  { %4773 = vmatpush1.bf16.msra.mxu1 %v5804_v20  ;;  %4610 = vmatprep.subr.bf16.mxu0 %v5811_v21  ;;  %v5852_v20 = vcombine.low %v1235_v4, %v1239_v5  ;;  %v5859_v21 = vcombine.high %v1242_v15, %v1246_v16  ;;  %v1286_v1 = vld [vmem:[#allocation9 + $0x3f0] sm:$0xff]  ;;  %v1283_v4 = vld [vmem:[#allocation9 + $0x3d8] sm:$0xff] }
 0x26d   :  { %4774 = vmatprep.subr.bf16.mxu1 %v5813_v27  ;;  %v5861_v27 = vcombine.high %v1243_v42, %v1247_v17  ;;  %v1287_v5 = vld [vmem:[#allocation9 + $0x3f8] sm:$0xff] }
 0x26f   :  { %4611 = vmatpush1.bf16.msra.mxu0 %v5810_v36  ;;  %v5858_v36 = vcombine.low %v1242_v15, %v1246_v16  ;;  %v1290_v15 = vld [vmem:[#allocation9 + $0x410] sm:$0xff] }
 0x270   :  { %4775 = vmatpush1.bf16.msra.mxu1 %v5812_v37  ;;  %4612 = vmatprep.subr.bf16.mxu0 %v5819_v38  ;;  %v5860_v37 = vcombine.low %v1243_v42, %v1247_v17  ;;  %v5867_v38 = vcombine.high %v1250_v29, %v1254_v32  ;;  %v1294_v16 = vld [vmem:[#allocation9 + $0x430] sm:$0xff]  ;;  %v1291_v42 = vld [vmem:[#allocation9 + $0x418] sm:$0xff] }
 0x271   :  { %4776 = vmatprep.subr.bf16.mxu1 %v5821_v40  ;;  %v5869_v40 = vcombine.high %v1251_v33, %v1255_v34  ;;  %v1295_v17 = vld [vmem:[#allocation9 + $0x438] sm:$0xff] }
 0x273   :  { %4613 = vmatpush1.bf16.msra.mxu0 %v5818_v48  ;;  %v5866_v48 = vcombine.low %v1250_v29, %v1254_v32  ;;  %v1298_v29 = vld [vmem:[#allocation9 + $0x450] sm:$0xff] }
 0x274   :  { %4777 = vmatpush1.bf16.msra.mxu1 %v5820_v49  ;;  %4614 = vmatprep.subr.bf16.mxu0 %v5827_v50  ;;  %v5868_v49 = vcombine.low %v1251_v33, %v1255_v34  ;;  %v5875_v50 = vcombine.high %v1258_v44, %v1262_v45  ;;  %v1302_v32 = vld [vmem:[#allocation9 + $0x470] sm:$0xff]  ;;  %v5906_v33 = vcombine.low %v1290_v15, %v1294_v16  ;;  %v1299_v34 = vld [vmem:[#allocation9 + $0x458] sm:$0xff] }
 0x275   :  { %4778 = vmatprep.subr.bf16.mxu1 %v5829_v24  ;;  %v5877_v24 = vcombine.high %v1259_v47, %v1263_v2 }
 0x277   :  { %4615 = vmatpush1.bf16.msra.mxu0 %v5826_v55  ;;  %v5874_v55 = vcombine.low %v1258_v44, %v1262_v45  ;;  %v1310_v44 = vld [vmem:[#allocation9 + $0x4b0] sm:$0xff] }
 0x278   :  { %4779 = vmatpush1.bf16.msra.mxu1 %v5828_v57  ;;  %4616 = vmatprep.subr.bf16.mxu0 %v5835_v25  ;;  %v5876_v57 = vcombine.low %v1259_v47, %v1263_v2  ;;  %v5883_v25 = vcombine.high %v1266_v51, %v1270_v52  ;;  %v1307_v47 = vld [vmem:[#allocation9 + $0x498] sm:$0xff] }
 0x279   :  { %4780 = vmatprep.subr.bf16.mxu1 %v5837_v58  ;;  %v5885_v58 = vcombine.high %v1267_v35, %v1271_v53  ;;  %v1311_v2 = vld [vmem:[#allocation9 + $0x4b8] sm:$0xff] }
 0x27b   :  { %4617 = vmatpush1.bf16.msra.mxu0 %v5834_v3  ;;  %v5882_v3 = vcombine.low %v1266_v51, %v1270_v52  ;;  %v1314_v51 = vld [vmem:[#allocation9 + $0x4d0] sm:$0xff] }
 0x27c   :  { %4781 = vmatpush1.bf16.msra.mxu1 %v5836_v54  ;;  %4618 = vmatprep.subr.bf16.mxu0 %v5843_v7  ;;  %v5884_v54 = vcombine.low %v1267_v35, %v1271_v53  ;;  %v5891_v7 = vcombine.high %v1274_v63, %v1278_v59  ;;  %v1318_v52 = vld [vmem:[#allocation9 + $0x4f0] sm:$0xff]  ;;  %v1315_v35 = vld [vmem:[#allocation9 + $0x4d8] sm:$0xff] }
 0x27d   :  { %4782 = vmatprep.subr.bf16.mxu1 %v5845_v60  ;;  %v5893_v60 = vcombine.high %v1275_v61, %v1279_v62  ;;  %v1319_v53 = vld [vmem:[#allocation9 + $0x4f8] sm:$0xff] }
 0x27f   :  { %4619 = vmatpush1.bf16.msra.mxu0 %v5842_v9  ;;  %v5890_v9 = vcombine.low %v1274_v63, %v1278_v59  ;;  %v1326_v63 = vld [vmem:[#allocation9 + $0x530] sm:$0xff]  ;;  %v1323_v59 = vld [vmem:[#allocation9 + $0x518] sm:$0xff] }
 0x280   :  { %4783 = vmatpush1.bf16.msra.mxu1 %v5844_v10  ;;  %4620 = vmatprep.subr.bf16.mxu0 %v5851_v12  ;;  %v5892_v10 = vcombine.low %v1275_v61, %v1279_v62  ;;  %v5899_v12 = vcombine.high %v1282_v39, %v1286_v1  ;;  %v1327_v61 = vld [vmem:[#allocation9 + $0x538] sm:$0xff]  ;;  %v5932_v62 = vcombine.low %v1315_v35, %v1319_v53 }
 0x281   :  { %4784 = vmatprep.subr.bf16.mxu1 %v5853_v19  ;;  %v5901_v19 = vcombine.high %v1283_v4, %v1287_v5 }
 0x283   :  { %4621 = vmatpush1.bf16.msra.mxu0 %v5850_v18  ;;  %v5898_v18 = vcombine.low %v1282_v39, %v1286_v1  ;;  %v1331_v39 = vld [vmem:[#allocation9 + $0x558] sm:$0xff] }
 0x284   :  { %4785 = vmatpush1.bf16.msra.mxu1 %v5852_v20  ;;  %4622 = vmatprep.subr.bf16.mxu0 %v5859_v21  ;;  %v5900_v20 = vcombine.low %v1283_v4, %v1287_v5  ;;  %v5907_v21 = vcombine.high %v1290_v15, %v1294_v16  ;;  %v1335_v1 = vld [vmem:[#allocation9 + $0x578] sm:$0xff]  ;;  %v5940_v5 = vcombine.low %v1323_v59, %v1327_v61 }
 0x285   :  { %4786 = vmatprep.subr.bf16.mxu1 %v5861_v27  ;;  %v5909_v27 = vcombine.high %v1291_v42, %v1295_v17  ;;  %v1339_v15 = vld [vmem:[#allocation9 + $0x598] sm:$0xff] }
 0x286   :  { %v1343_v16 = vld [vmem:[#allocation9 + $0x5b8] sm:$0xff] }
 0x287   :  { %4623 = vmatpush1.bf16.msra.mxu0 %v5858_v36  ;;  %v1303_v36 = vld [vmem:[#allocation9 + $0x478] sm:$0xff] }
 0x288   :  { %4787 = vmatpush1.bf16.msra.mxu1 %v5860_v37  ;;  %4624 = vmatprep.subr.bf16.mxu0 %v5867_v38  ;;  %v5908_v37 = vcombine.low %v1291_v42, %v1295_v17  ;;  %v5915_v38 = vcombine.high %v1298_v29, %v1302_v32  ;;  %v5917_v45 = vcombine.high %v1299_v34, %v1303_v36 }
 0x289   :  { %4788 = vmatprep.subr.bf16.mxu1 %v5869_v40  ;;  %v1306_v40 = vld [vmem:[#allocation9 + $0x490] sm:$0xff]  ;;  %v5948_v17 = vcombine.low %v1331_v39, %v1335_v1 }
 0x28b   :  { %4625 = vmatpush1.bf16.msra.mxu0 %v5866_v48  ;;  %v5914_v48 = vcombine.low %v1298_v29, %v1302_v32  ;;  %v1347_v29 = vld [vmem:[#allocation9 + $0x5d8] sm:$0xff] }
 0x28c   :  { %4789 = vmatpush1.bf16.msra.mxu1 %v5868_v49  ;;  %4626 = vmatprep.subr.bf16.mxu0 %v5875_v50  ;;  %v5916_v49 = vcombine.low %v1299_v34, %v1303_v36  ;;  %v5923_v50 = vcombine.high %v1306_v40, %v1310_v44  ;;  %v1351_v32 = vld [vmem:[#allocation9 + $0x5f8] sm:$0xff]  ;;  %v5956_v34 = vcombine.low %v1339_v15, %v1343_v16 }
 0x28d   :  { %4790 = vmatprep.subr.bf16.mxu1 %v5877_v24  ;;  %v5925_v24 = vcombine.high %v1307_v47, %v1311_v2 }
 0x28f   :  { %4627 = vmatpush1.bf16.msra.mxu0 %v5874_v55  ;;  %v5922_v55 = vcombine.low %v1306_v40, %v1310_v44  ;;  %v1358_v40 = vld [vmem:[#allocation9 + $0x630] sm:$0xff]  ;;  %v1355_v44 = vld [vmem:[#allocation9 + $0x618] sm:$0xff] }
 0x290   :  { %4791 = vmatpush1.bf16.msra.mxu1 %v5876_v57  ;;  %4628 = vmatprep.subr.bf16.mxu0 %v5883_v25  ;;  %v5931_v57 = vcombine.high %v1314_v51, %v1318_v52  ;;  %v5933_v25 = vcombine.high %v1315_v35, %v1319_v53 }
 0x291   :  { %4792 = vmatprep.subr.bf16.mxu1 %v5885_v58  ;;  %v1322_v58 = vld [vmem:[#allocation9 + $0x510] sm:$0xff] }
 0x292   :  { %v5938_v4 = vcombine.low %v1322_v58, %v1326_v63 }
 0x293   :  { %4629 = vmatpush1.bf16.msra.mxu0 %v5882_v3  ;;  %v5939_v3 = vcombine.high %v1322_v58, %v1326_v63  ;;  %v1371_v58 = vld [vmem:[#allocation9 + $0x698] sm:$0xff] }
 0x294   :  { %4793 = vmatpush1.bf16.msra.mxu1 %v5884_v54  ;;  %4630 = vmatprep.subr.bf16.mxu0 %v5891_v7  ;;  %v5941_v54 = vcombine.high %v1323_v59, %v1327_v61  ;;  %v1330_v7 = vld [vmem:[#allocation9 + $0x550] sm:$0xff]  ;;  %v1375_v63 = vld [vmem:[#allocation9 + $0x6b8] sm:$0xff] }
 0x295   :  { %4794 = vmatprep.subr.bf16.mxu1 %v5893_v60  ;;  %v1334_v60 = vld [vmem:[#allocation9 + $0x570] sm:$0xff] }
 0x296   :  { %v5946_v42 = vcombine.low %v1330_v7, %v1334_v60 }
 0x297   :  { %4631 = vmatpush1.bf16.msra.mxu0 %v5890_v9  ;;  %v5947_v9 = vcombine.high %v1330_v7, %v1334_v60  ;;  %v1379_v7 = vld [vmem:[#allocation9 + $0x6d8] sm:$0xff] }
 0x298   :  { %4795 = vmatpush1.bf16.msra.mxu1 %v5892_v10  ;;  %4632 = vmatprep.subr.bf16.mxu0 %v5899_v12  ;;  %v5949_v10 = vcombine.high %v1331_v39, %v1335_v1  ;;  %v1338_v12 = vld [vmem:[#allocation9 + $0x590] sm:$0xff]  ;;  %v1383_v60 = vld [vmem:[#allocation9 + $0x6f8] sm:$0xff]  ;;  %v5988_v1 = vcombine.low %v1371_v58, %v1375_v63 }
 0x299   :  { %4796 = vmatprep.subr.bf16.mxu1 %v5901_v19  ;;  %v1342_v19 = vld [vmem:[#allocation9 + $0x5b0] sm:$0xff] }
 0x29b   :  { %4633 = vmatpush1.bf16.msra.mxu0 %v5898_v18  ;;  %v5955_v18 = vcombine.high %v1338_v12, %v1342_v19 }
 0x29c   :  { %4797 = vmatpush1.bf16.msra.mxu1 %v5900_v20  ;;  %4643 = vmatprep.subr.bf16.mxu0 %v5907_v21  ;;  %v5957_v20 = vcombine.high %v1339_v15, %v1343_v16  ;;  %v1346_v21 = vld [vmem:[#allocation9 + $0x5d0] sm:$0xff]  ;;  %v5996_v16 = vcombine.low %v1379_v7, %v1383_v60 }
 0x29d   :  { %4807 = vmatprep.subr.bf16.mxu1 %v5909_v27  ;;  %v1350_v27 = vld [vmem:[#allocation9 + $0x5f0] sm:$0xff] }
 0x29e   :  { %4635 = vmatmul.mubr.bf16.vlgmr.msra.gmra.mrb[12].mxu0 %v6945_v43  ;;  %v5963_v36 = vcombine.high %v1346_v21, %v1350_v27 }
 0x29f   :  { %4799 = vmatmul.mubr.bf16.vlgmr.msra.gmra.mrb[12].mxu1 %v6945_v43  ;;  %4644 = vmatpush1.bf16.msra.mxu0 %v5906_v33  ;;  %v5924_v43 = vcombine.low %v1307_v47, %v1311_v2  ;;  %v5954_v33 = vcombine.low %v1338_v12, %v1342_v19  ;;  %v5962_v47 = vcombine.low %v1346_v21, %v1350_v27  ;;  %v1387_v12 = vld [vmem:[#allocation9 + $0x718] sm:$0xff] }
 0x2a0   :  { %4675 = vmatprep.mubr.bf16.mxu0 %v6962_v6  ;;  %4808 = vmatpush1.bf16.msra.mxu1 %v5908_v37  ;;  %v5965_v37 = vcombine.high %v1347_v29, %v1351_v32  ;;  %v5964_v2 = vcombine.low %v1347_v29, %v1351_v32  ;;  %v1391_v19 = vld [vmem:[#allocation9 + $0x738] sm:$0xff] }
 0x2a1   :  { %4839 = vmatprep.mubr.bf16.mxu1 %v6962_v6  ;;  %4645 = vmatprep.subr.bf16.mxu0 %v5915_v38  ;;  %v5930_v6 = vcombine.low %v1314_v51, %v1318_v52  ;;  %v1354_v38 = vld [vmem:[#allocation9 + $0x610] sm:$0xff]  ;;  %v1363_v51 = vld [vmem:[#allocation9 + $0x658] sm:$0xff]  ;;  %v6004_v32 = vcombine.low %v1387_v12, %v1391_v19 }
 0x2a2   :  { %4809 = vmatprep.subr.bf16.mxu1 %v5917_v45  ;;  %v1359_v45 = vld [vmem:[#allocation9 + $0x638] sm:$0xff]  ;;  %v5970_v35 = vcombine.low %v1354_v38, %v1358_v40 }
 0x2a3   :  { %4646 = vmatpush1.bf16.msra.mxu0 %v5914_v48  ;;  %v5971_v48 = vcombine.high %v1354_v38, %v1358_v40  ;;  %v1367_v52 = vld [vmem:[#allocation9 + $0x678] sm:$0xff]  ;;  %v5972_v53 = vcombine.low %v1355_v44, %v1359_v45 }
 0x2a4   :  { %4810 = vmatpush1.bf16.msra.mxu1 %v5916_v49  ;;  %4647 = vmatprep.subr.bf16.mxu0 %v5923_v50  ;;  %v5973_v49 = vcombine.high %v1355_v44, %v1359_v45  ;;  %v1362_v50 = vld [vmem:[#allocation9 + $0x650] sm:$0xff]  ;;  %v5980_v61 = vcombine.low %v1363_v51, %v1367_v52  ;;  %v1395_v21 = vld [vmem:[#allocation9 + $0x758] sm:$0xff] }
 0x2a5   :  { %4811 = vmatprep.subr.bf16.mxu1 %v5925_v24  ;;  %v1366_v24 = vld [vmem:[#allocation9 + $0x670] sm:$0xff]  ;;  %v1399_v27 = vld [vmem:[#allocation9 + $0x778] sm:$0xff] }
 0x2a6   :  { %v5978_v59 = vcombine.low %v1362_v50, %v1366_v24  ;;  %v1403_v38 = vld [vmem:[#allocation9 + $0x798] sm:$0xff]  ;;  %v6012_v45 = vcombine.low %v1395_v21, %v1399_v27 }
 0x2a7   :  { %4648 = vmatpush1.bf16.msra.mxu0 %v5922_v55  ;;  %v5979_v55 = vcombine.high %v1362_v50, %v1366_v24  ;;  %v1407_v40 = vld [vmem:[#allocation9 + $0x7b8] sm:$0xff] }
 0x2a8   :  { %4812 = vmatpush1.bf16.msra.mxu1 %v5924_v43  ;;  %4649 = vmatprep.subr.bf16.mxu0 %v5931_v57  ;;  %v5981_v43 = vcombine.high %v1363_v51, %v1367_v52  ;;  %v1370_v57 = vld [vmem:[#allocation9 + $0x690] sm:$0xff]  ;;  %v1411_v50 = vld [vmem:[#allocation9 + $0x7d8] sm:$0xff]  ;;  %v6020_v52 = vcombine.low %v1403_v38, %v1407_v40 }
 0x2a9   :  { %4813 = vmatprep.subr.bf16.mxu1 %v5933_v25  ;;  %v1374_v25 = vld [vmem:[#allocation9 + $0x6b0] sm:$0xff]  ;;  %v1415_v24 = vld [vmem:[#allocation9 + $0x7f8] sm:$0xff] }
 0x2aa   :  { %v5986_v39 = vcombine.low %v1370_v57, %v1374_v25 }
 0x2ab   :  { %4650 = vmatpush1.bf16.msra.mxu0 %v5930_v6  ;;  %v5987_v6 = vcombine.high %v1370_v57, %v1374_v25  ;;  %v1419_v57 = vld [vmem:[#allocation9 + $0x818] sm:$0xff] }
 0x2ac   :  { %4814 = vmatpush1.bf16.msra.mxu1 %v5932_v62  ;;  %4651 = vmatprep.subr.bf16.mxu0 %v5939_v3  ;;  %v5989_v62 = vcombine.high %v1371_v58, %v1375_v63  ;;  %v1378_v3 = vld [vmem:[#allocation9 + $0x6d0] sm:$0xff]  ;;  %v1423_v25 = vld [vmem:[#allocation9 + $0x838] sm:$0xff]  ;;  %v6028_v63 = vcombine.low %v1411_v50, %v1415_v24 }
 0x2ad   :  { %4815 = vmatprep.subr.bf16.mxu1 %v5941_v54  ;;  %v1382_v54 = vld [vmem:[#allocation9 + $0x6f0] sm:$0xff] }
 0x2ae   :  { %v5994_v15 = vcombine.low %v1378_v3, %v1382_v54 }
 0x2af   :  { %4652 = vmatpush1.bf16.msra.mxu0 %v5938_v4  ;;  %v5995_v4 = vcombine.high %v1378_v3, %v1382_v54  ;;  %v1427_v54 = vld [vmem:[#allocation9 + $0x858] sm:$0xff] }
 0x2b0   :  { %4816 = vmatpush1.bf16.msra.mxu1 %v5940_v5  ;;  %4653 = vmatprep.subr.bf16.mxu0 %v5947_v9  ;;  %v5997_v5 = vcombine.high %v1379_v7, %v1383_v60  ;;  %v1386_v9 = vld [vmem:[#allocation9 + $0x710] sm:$0xff]  ;;  %v1431_v7 = vld [vmem:[#allocation9 + $0x878] sm:$0xff]  ;;  %v6036_v60 = vcombine.low %v1419_v57, %v1423_v25 }
 0x2b1   :  { %4817 = vmatprep.subr.bf16.mxu1 %v5949_v10  ;;  %v1390_v10 = vld [vmem:[#allocation9 + $0x730] sm:$0xff] }
 0x2b2   :  { %v6002_v29 = vcombine.low %v1386_v9, %v1390_v10 }
 0x2b3   :  { %4654 = vmatpush1.bf16.msra.mxu0 %v5946_v42  ;;  %v6003_v42 = vcombine.high %v1386_v9, %v1390_v10  ;;  %v1435_v9 = vld [vmem:[#allocation9 + $0x898] sm:$0xff] }
 0x2b4   :  { %4818 = vmatpush1.bf16.msra.mxu1 %v5948_v17  ;;  %4655 = vmatprep.subr.bf16.mxu0 %v5955_v18  ;;  %v6005_v17 = vcombine.high %v1387_v12, %v1391_v19  ;;  %v1394_v18 = vld [vmem:[#allocation9 + $0x750] sm:$0xff]  ;;  %v1439_v10 = vld [vmem:[#allocation9 + $0x8b8] sm:$0xff]  ;;  %v6044_v19 = vcombine.low %v1427_v54, %v1431_v7 }
 0x2b5   :  { %4819 = vmatprep.subr.bf16.mxu1 %v5957_v20  ;;  %v1398_v20 = vld [vmem:[#allocation9 + $0x770] sm:$0xff] }
 0x2b6   :  { %v6010_v44 = vcombine.low %v1394_v18, %v1398_v20 }
 0x2b7   :  { %4656 = vmatpush1.bf16.msra.mxu0 %v5954_v33  ;;  %v6011_v33 = vcombine.high %v1394_v18, %v1398_v20  ;;  %v1443_v18 = vld [vmem:[#allocation9 + $0x8d8] sm:$0xff] }
 0x2b8   :  { %4820 = vmatpush1.bf16.msra.mxu1 %v5956_v34  ;;  %4657 = vmatprep.subr.bf16.mxu0 %v5963_v36  ;;  %v6013_v34 = vcombine.high %v1395_v21, %v1399_v27  ;;  %v1402_v36 = vld [vmem:[#allocation9 + $0x790] sm:$0xff]  ;;  %v1447_v20 = vld [vmem:[#allocation9 + $0x8f8] sm:$0xff] }
 0x2b9   :  { %4821 = vmatprep.subr.bf16.mxu1 %v5965_v37  ;;  %v1406_v37 = vld [vmem:[#allocation9 + $0x7b0] sm:$0xff] }
 0x2ba   :  { %v6018_v51 = vcombine.low %v1402_v36, %v1406_v37 }
 0x2bb   :  { %4658 = vmatpush1.bf16.msra.mxu0 %v5962_v47  ;;  %v6019_v47 = vcombine.high %v1402_v36, %v1406_v37  ;;  %v1455_v36 = vld [vmem:[#allocation9 + $0x938] sm:$0xff]  ;;  %v6060_v37 = vcombine.low %v1443_v18, %v1447_v20 }
 0x2bc   :  { %4822 = vmatpush1.bf16.msra.mxu1 %v5964_v2  ;;  %4659 = vmatprep.subr.bf16.mxu0 %v5971_v48  ;;  %v6021_v2 = vcombine.high %v1403_v38, %v1407_v40  ;;  %v1410_v48 = vld [vmem:[#allocation9 + $0x7d0] sm:$0xff] }
 0x2bd   :  { %4823 = vmatprep.subr.bf16.mxu1 %v5973_v49  ;;  %v1414_v49 = vld [vmem:[#allocation9 + $0x7f0] sm:$0xff] }
 0x2be   :  { %v6026_v58 = vcombine.low %v1410_v48, %v1414_v49 }
 0x2bf   :  { %4660 = vmatpush1.bf16.msra.mxu0 %v5970_v35  ;;  %v6027_v35 = vcombine.high %v1410_v48, %v1414_v49 }
 0x2c0   :  { %4824 = vmatpush1.bf16.msra.mxu1 %v5972_v53  ;;  %4661 = vmatprep.subr.bf16.mxu0 %v5979_v55  ;;  %v6029_v53 = vcombine.high %v1411_v50, %v1415_v24  ;;  %v1418_v55 = vld [vmem:[#allocation9 + $0x810] sm:$0xff] }
 0x2c1   :  { %4825 = vmatprep.subr.bf16.mxu1 %v5981_v43  ;;  %v1422_v43 = vld [vmem:[#allocation9 + $0x830] sm:$0xff] }
 0x2c2   :  { %v6034_v3 = vcombine.low %v1418_v55, %v1422_v43 }
 0x2c3   :  { %4662 = vmatpush1.bf16.msra.mxu0 %v5978_v59  ;;  %v6035_v59 = vcombine.high %v1418_v55, %v1422_v43 }
 0x2c4   :  { %4826 = vmatpush1.bf16.msra.mxu1 %v5980_v61  ;;  %4663 = vmatprep.subr.bf16.mxu0 %v5987_v6  ;;  %v6037_v61 = vcombine.high %v1419_v57, %v1423_v25  ;;  %v1426_v6 = vld [vmem:[#allocation9 + $0x850] sm:$0xff] }
 0x2c5   :  { %4827 = vmatprep.subr.bf16.mxu1 %v5989_v62  ;;  %v1430_v62 = vld [vmem:[#allocation9 + $0x870] sm:$0xff] }
 0x2c6   :  { %v6042_v12 = vcombine.low %v1426_v6, %v1430_v62 }
 0x2c7   :  { %4664 = vmatpush1.bf16.msra.mxu0 %v5986_v39  ;;  %v6043_v39 = vcombine.high %v1426_v6, %v1430_v62 }
 0x2c8   :  { %4828 = vmatpush1.bf16.msra.mxu1 %v5988_v1  ;;  %4665 = vmatprep.subr.bf16.mxu0 %v5995_v4  ;;  %v1434_v1 = vld [vmem:[#allocation9 + $0x890] sm:$0xff] }
 0x2c9   :  { %4829 = vmatprep.subr.bf16.mxu1 %v5997_v5  ;;  %v1438_v4 = vld [vmem:[#allocation9 + $0x8b0] sm:$0xff]  ;;  %v6045_v5 = vcombine.high %v1427_v54, %v1431_v7 }
 0x2ca   :  { %v6050_v21 = vcombine.low %v1434_v1, %v1438_v4  ;;  %v1482_v7 = vld [vmem:[#allocation9 + $0xa10] sm:$0xff] }
 0x2cb   :  { %4666 = vmatpush1.bf16.msra.mxu0 %v5994_v15  ;;  %v6051_v15 = vcombine.high %v1434_v1, %v1438_v4  ;;  %v1487_v1 = vld [vmem:[#allocation9 + $0xa38] sm:$0xff] }
 0x2cc   :  { %4830 = vmatpush1.bf16.msra.mxu1 %v5996_v16  ;;  %4667 = vmatprep.subr.bf16.mxu0 %v6003_v42  ;;  %v6053_v16 = vcombine.high %v1435_v9, %v1439_v10  ;;  %v1442_v42 = vld [vmem:[#allocation9 + $0x8d0] sm:$0xff] }
 0x2cd   :  { %4831 = vmatprep.subr.bf16.mxu1 %v6005_v17  ;;  %v1446_v17 = vld [vmem:[#allocation9 + $0x8f0] sm:$0xff] }
 0x2ce   :  { %v6059_v27 = vcombine.high %v1442_v42, %v1446_v17 }
 0x2cf   :  { %4668 = vmatpush1.bf16.msra.mxu0 %v6002_v29  ;;  %v6061_v29 = vcombine.high %v1443_v18, %v1447_v20 }
 0x2d0   :  { %4832 = vmatpush1.bf16.msra.mxu1 %v6004_v32  ;;  %4669 = vmatprep.subr.bf16.mxu0 %v6011_v33  ;;  %v1450_v32 = vld [vmem:[#allocation9 + $0x910] sm:$0xff] }
 0x2d1   :  { %4833 = vmatprep.subr.bf16.mxu1 %v6013_v34  ;;  %v1454_v33 = vld [vmem:[#allocation9 + $0x930] sm:$0xff]  ;;  %v1451_v34 = vld [vmem:[#allocation9 + $0x918] sm:$0xff] }
 0x2d2   :  { %v6067_v38 = vcombine.high %v1450_v32, %v1454_v33  ;;  %v6069_v40 = vcombine.high %v1451_v34, %v1455_v36  ;;  %v6066_v48 = vcombine.low %v1450_v32, %v1454_v33  ;;  %v6068_v49 = vcombine.low %v1451_v34, %v1455_v36 }
 0x2d3   :  { %4670 = vmatpush1.bf16.msra.mxu0 %v6010_v44  ;;  %v1458_v44 = vld [vmem:[#allocation9 + $0x950] sm:$0xff] }
 0x2d4   :  { %4834 = vmatpush1.bf16.msra.mxu1 %v6012_v45  ;;  %4671 = vmatprep.subr.bf16.mxu0 %v6019_v47  ;;  %v1462_v45 = vld [vmem:[#allocation9 + $0x970] sm:$0xff]  ;;  %v1459_v47 = vld [vmem:[#allocation9 + $0x958] sm:$0xff] }
 0x2d5   :  { %4835 = vmatprep.subr.bf16.mxu1 %v6021_v2  ;;  %v1463_v2 = vld [vmem:[#allocation9 + $0x978] sm:$0xff]  ;;  %v6075_v50 = vcombine.high %v1458_v44, %v1462_v45  ;;  %v6074_v55 = vcombine.low %v1458_v44, %v1462_v45 }
 0x2d6   :  { %v6077_v24 = vcombine.high %v1459_v47, %v1463_v2  ;;  %v6076_v43 = vcombine.low %v1459_v47, %v1463_v2 }
 0x2d7   :  { %4672 = vmatpush1.bf16.msra.mxu0 %v6018_v51  ;;  %v1466_v51 = vld [vmem:[#allocation9 + $0x990] sm:$0xff] }
 0x2d8   :  { %4836 = vmatpush1.bf16.msra.mxu1 %v6020_v52  ;;  %4673 = vmatprep.subr.bf16.mxu0 %v6027_v35  ;;  %v1470_v52 = vld [vmem:[#allocation9 + $0x9b0] sm:$0xff]  ;;  %v1467_v35 = vld [vmem:[#allocation9 + $0x998] sm:$0xff] }
 0x2d9   :  { %4837 = vmatprep.subr.bf16.mxu1 %v6029_v53  ;;  %v1471_v53 = vld [vmem:[#allocation9 + $0x9b8] sm:$0xff]  ;;  %v6083_v57 = vcombine.high %v1466_v51, %v1470_v52  ;;  %v6082_v6 = vcombine.low %v1466_v51, %v1470_v52 }
 0x2da   :  { %v6085_v25 = vcombine.high %v1467_v35, %v1471_v53  ;;  %v6084_v62 = vcombine.low %v1467_v35, %v1471_v53 }
 0x2db   :  { %4674 = vmatpush1.bf16.msra.mxu0 %v6026_v58  ;;  %v1474_v58 = vld [vmem:[#allocation9 + $0x9d0] sm:$0xff] }
 0x2dc   :  { %4838 = vmatpush1.bf16.msra.mxu1 %v6028_v63  ;;  %4684 = vmatprep.subr.bf16.mxu0 %v6035_v59  ;;  %v1478_v63 = vld [vmem:[#allocation9 + $0x9f0] sm:$0xff]  ;;  %v1475_v59 = vld [vmem:[#allocation9 + $0x9d8] sm:$0xff] }
 0x2dd   :  { %4848 = vmatprep.subr.bf16.mxu1 %v6037_v61  ;;  %v1479_v61 = vld [vmem:[#allocation9 + $0x9f8] sm:$0xff]  ;;  %v6090_v4 = vcombine.low %v1474_v58, %v1478_v63 }
 0x2de   :  { %4676 = vmatmul.mubr.bf16.vlgmr.msra.gmra.mrb[12].mxu0 %v6977_v13  ;;  %v6093_v54 = vcombine.high %v1475_v59, %v1479_v61 }
 0x2df   :  { %4840 = vmatmul.mubr.bf16.vlgmr.msra.gmra.mrb[12].mxu1 %v6977_v13  ;;  %4685 = vmatpush1.bf16.msra.mxu0 %v6034_v3  ;;  %v6052_v13 = vcombine.low %v1435_v9, %v1439_v10  ;;  %v6091_v3 = vcombine.high %v1474_v58, %v1478_v63 }
 0x2e0   :  { %4716 = vmatprep.mubr.bf16.mxu0 %v6979_v28  ;;  %4849 = vmatpush1.bf16.msra.mxu1 %v6036_v60  ;;  %v1486_v60 = vld [vmem:[#allocation9 + $0xa30] sm:$0xff] }
 0x2e1   :  { %4880 = vmatprep.mubr.bf16.mxu1 %v6979_v28  ;;  %4686 = vmatprep.subr.bf16.mxu0 %v6043_v39  ;;  %v6058_v28 = vcombine.low %v1442_v42, %v1446_v17  ;;  %v1483_v39 = vld [vmem:[#allocation9 + $0xa18] sm:$0xff]  ;;  %v6099_v9 = vcombine.high %v1482_v7, %v1486_v60  ;;  %v6098_v42 = vcombine.low %v1482_v7, %v1486_v60 }
 0x2e2   :  { %4850 = vmatprep.subr.bf16.mxu1 %v6045_v5  ;;  %v6092_v5 = vcombine.low %v1475_v59, %v1479_v61  ;;  %v6101_v10 = vcombine.high %v1483_v39, %v1487_v1  ;;  %v6100_v17 = vcombine.low %v1483_v39, %v1487_v1 }
 0x2e3   :  { %4687 = vmatpush1.bf16.msra.mxu0 %v6042_v12  ;;  %v1490_v12 = vld [vmem:[#allocation9 + $0xa50] sm:$0xff] }
 0x2e4   :  { %4851 = vmatpush1.bf16.msra.mxu1 %v6044_v19  ;;  %4688 = vmatprep.subr.bf16.mxu0 %v6051_v15  ;;  %v1494_v19 = vld [vmem:[#allocation9 + $0xa70] sm:$0xff]  ;;  %v1491_v15 = vld [vmem:[#allocation9 + $0xa58] sm:$0xff] }
 0x2e5   :  { %4852 = vmatprep.subr.bf16.mxu1 %v6053_v16  ;;  %v1495_v16 = vld [vmem:[#allocation9 + $0xa78] sm:$0xff]  ;;  %v6107_v18 = vcombine.high %v1490_v12, %v1494_v19  ;;  %v6106_v32 = vcombine.low %v1490_v12, %v1494_v19 }
 0x2e6   :  { %v6109_v20 = vcombine.high %v1491_v15, %v1495_v16  ;;  %v6108_v33 = vcombine.low %v1491_v15, %v1495_v16 }
 0x2e7   :  { %4689 = vmatpush1.bf16.msra.mxu0 %v6050_v21  ;;  %v1498_v21 = vld [vmem:[#allocation9 + $0xa90] sm:$0xff] }
 0x2e8   :  { %4853 = vmatpush1.bf16.msra.mxu1 %v6052_v13  ;;  %4690 = vmatprep.subr.bf16.mxu0 %v6059_v27  ;;  %v1502_v13 = vld [vmem:[#allocation9 + $0xab0] sm:$0xff]  ;;  %v1499_v27 = vld [vmem:[#allocation9 + $0xa98] sm:$0xff] }
 0x2e9   :  { %4854 = vmatprep.subr.bf16.mxu1 %v6061_v29  ;;  %v1503_v29 = vld [vmem:[#allocation9 + $0xab8] sm:$0xff]  ;;  %v6115_v34 = vcombine.high %v1498_v21, %v1502_v13  ;;  %v6114_v44 = vcombine.low %v1498_v21, %v1502_v13 }
 0x2ea   :  { %v6117_v36 = vcombine.high %v1499_v27, %v1503_v29  ;;  %v6116_v45 = vcombine.low %v1499_v27, %v1503_v29 }
 0x2eb   :  { %4691 = vmatpush1.bf16.msra.mxu0 %v6058_v28  ;;  %v1506_v28 = vld [vmem:[#allocation9 + $0xad0] sm:$0xff] }
 0x2ec   :  { %4855 = vmatpush1.bf16.msra.mxu1 %v6060_v37  ;;  %4692 = vmatprep.subr.bf16.mxu0 %v6067_v38  ;;  %v1510_v37 = vld [vmem:[#allocation9 + $0xaf0] sm:$0xff]  ;;  %v1507_v38 = vld [vmem:[#allocation9 + $0xad8] sm:$0xff] }
 0x2ed   :  { %4856 = vmatprep.subr.bf16.mxu1 %v6069_v40  ;;  %v1511_v40 = vld [vmem:[#allocation9 + $0xaf8] sm:$0xff]  ;;  %v6123_v47 = vcombine.high %v1506_v28, %v1510_v37  ;;  %v6122_v51 = vcombine.low %v1506_v28, %v1510_v37 }
 0x2ee   :  { %v6125_v2 = vcombine.high %v1507_v38, %v1511_v40  ;;  %v6124_v52 = vcombine.low %v1507_v38, %v1511_v40  ;;  %v1559_v28 = vld [vmem:[#allocation9 + $0xc78] sm:$0xff]  ;;  %v1562_v40 = vld [vmem:[#allocation9 + $0xc90] sm:$0xff] }
 0x2ef   :  { %4693 = vmatpush1.bf16.msra.mxu0 %v6066_v48  ;;  %v1514_v48 = vld [vmem:[#allocation9 + $0xb10] sm:$0xff] }
 0x2f0   :  { %4857 = vmatpush1.bf16.msra.mxu1 %v6068_v49  ;;  %4694 = vmatprep.subr.bf16.mxu0 %v6075_v50  ;;  %v1518_v49 = vld [vmem:[#allocation9 + $0xb30] sm:$0xff]  ;;  %v1515_v50 = vld [vmem:[#allocation9 + $0xb18] sm:$0xff] }
 0x2f1   :  { %4858 = vmatprep.subr.bf16.mxu1 %v6077_v24  ;;  %v1519_v24 = vld [vmem:[#allocation9 + $0xb38] sm:$0xff]  ;;  %v6131_v35 = vcombine.high %v1514_v48, %v1518_v49  ;;  %v6130_v58 = vcombine.low %v1514_v48, %v1518_v49 }
 0x2f2   :  { %v6133_v53 = vcombine.high %v1515_v50, %v1519_v24  ;;  %v6132_v63 = vcombine.low %v1515_v50, %v1519_v24 }
 0x2f3   :  { %4695 = vmatpush1.bf16.msra.mxu0 %v6074_v55  ;;  %v1522_v55 = vld [vmem:[#allocation9 + $0xb50] sm:$0xff] }
 0x2f4   :  { %4859 = vmatpush1.bf16.msra.mxu1 %v6076_v43  ;;  %4696 = vmatprep.subr.bf16.mxu0 %v6083_v57  ;;  %v1526_v43 = vld [vmem:[#allocation9 + $0xb70] sm:$0xff]  ;;  %v1523_v57 = vld [vmem:[#allocation9 + $0xb58] sm:$0xff] }
 0x2f5   :  { %4860 = vmatprep.subr.bf16.mxu1 %v6085_v25  ;;  %v1527_v25 = vld [vmem:[#allocation9 + $0xb78] sm:$0xff]  ;;  %v6139_v59 = vcombine.high %v1522_v55, %v1526_v43  ;;  %v6138_v7 = vcombine.low %v1522_v55, %v1526_v43 }
 0x2f6   :  { %v6141_v61 = vcombine.high %v1523_v57, %v1527_v25  ;;  %v6140_v60 = vcombine.low %v1523_v57, %v1527_v25  ;;  %v1578_v25 = vld [vmem:[#allocation9 + $0xd10] sm:$0xff] }
 0x2f7   :  { %4697 = vmatpush1.bf16.msra.mxu0 %v6082_v6  ;;  %v1530_v6 = vld [vmem:[#allocation9 + $0xb90] sm:$0xff] }
 0x2f8   :  { %4861 = vmatpush1.bf16.msra.mxu1 %v6084_v62  ;;  %4698 = vmatprep.subr.bf16.mxu0 %v6091_v3  ;;  %v1534_v62 = vld [vmem:[#allocation9 + $0xbb0] sm:$0xff]  ;;  %v1531_v3 = vld [vmem:[#allocation9 + $0xb98] sm:$0xff] }
 0x2f9   :  { %4862 = vmatprep.subr.bf16.mxu1 %v6093_v54  ;;  %v1535_v54 = vld [vmem:[#allocation9 + $0xbb8] sm:$0xff]  ;;  %v6147_v39 = vcombine.high %v1530_v6, %v1534_v62  ;;  %v6146_v12 = vcombine.low %v1530_v6, %v1534_v62 }
 0x2fa   :  { %v6149_v1 = vcombine.high %v1531_v3, %v1535_v54  ;;  %v6148_v19 = vcombine.low %v1531_v3, %v1535_v54  ;;  %v1586_v3 = vld [vmem:[#allocation9 + $0xd50] sm:$0xff] }
 0x2fb   :  { %4699 = vmatpush1.bf16.msra.mxu0 %v6090_v4  ;;  %v1538_v4 = vld [vmem:[#allocation9 + $0xbd0] sm:$0xff] }
 0x2fc   :  { %4863 = vmatpush1.bf16.msra.mxu1 %v6092_v5  ;;  %4700 = vmatprep.subr.bf16.mxu0 %v6099_v9  ;;  %v1542_v5 = vld [vmem:[#allocation9 + $0xbf0] sm:$0xff]  ;;  %v1539_v9 = vld [vmem:[#allocation9 + $0xbd8] sm:$0xff] }
 0x2fd   :  { %4864 = vmatprep.subr.bf16.mxu1 %v6101_v10  ;;  %v1543_v10 = vld [vmem:[#allocation9 + $0xbf8] sm:$0xff]  ;;  %v6155_v15 = vcombine.high %v1538_v4, %v1542_v5  ;;  %v6154_v21 = vcombine.low %v1538_v4, %v1542_v5  ;;  %v1590_v54 = vld [vmem:[#allocation9 + $0xd70] sm:$0xff] }
 0x2fe   :  { %v6157_v16 = vcombine.high %v1539_v9, %v1543_v10  ;;  %v6156_v13 = vcombine.low %v1539_v9, %v1543_v10  ;;  %v6203_v4 = vcombine.high %v1586_v3, %v1590_v54  ;;  %v1594_v9 = vld [vmem:[#allocation9 + $0xd90] sm:$0xff] }
 0x2ff   :  { %4701 = vmatpush1.bf16.msra.mxu0 %v6098_v42  ;;  %v1546_v42 = vld [vmem:[#allocation9 + $0xc10] sm:$0xff] }
 0x300   :  { %4865 = vmatpush1.bf16.msra.mxu1 %v6100_v17  ;;  %4702 = vmatprep.subr.bf16.mxu0 %v6107_v18  ;;  %v1550_v17 = vld [vmem:[#allocation9 + $0xc30] sm:$0xff]  ;;  %v1547_v18 = vld [vmem:[#allocation9 + $0xc18] sm:$0xff] }
 0x301   :  { %4866 = vmatprep.subr.bf16.mxu1 %v6109_v20  ;;  %v1551_v20 = vld [vmem:[#allocation9 + $0xc38] sm:$0xff]  ;;  %v6163_v27 = vcombine.high %v1546_v42, %v1550_v17  ;;  %v1598_v10 = vld [vmem:[#allocation9 + $0xdb0] sm:$0xff] }
 0x302   :  { %v6165_v29 = vcombine.high %v1547_v18, %v1551_v20  ;;  %v6164_v37 = vcombine.low %v1547_v18, %v1551_v20 }
 0x303   :  { %4703 = vmatpush1.bf16.msra.mxu0 %v6106_v32  ;;  %v1554_v32 = vld [vmem:[#allocation9 + $0xc50] sm:$0xff] }
 0x304   :  { %4867 = vmatpush1.bf16.msra.mxu1 %v6108_v33  ;;  %4704 = vmatprep.subr.bf16.mxu0 %v6115_v34  ;;  %v1558_v33 = vld [vmem:[#allocation9 + $0xc70] sm:$0xff]  ;;  %v6162_v34 = vcombine.low %v1546_v42, %v1550_v17  ;;  %v6211_v42 = vcombine.high %v1594_v9, %v1598_v10 }
 0x305   :  { %4868 = vmatprep.subr.bf16.mxu1 %v6117_v36  ;;  %v1555_v36 = vld [vmem:[#allocation9 + $0xc58] sm:$0xff]  ;;  %v6171_v38 = vcombine.high %v1554_v32, %v1558_v33  ;;  %v6170_v48 = vcombine.low %v1554_v32, %v1558_v33 }
 0x306   :  { %v6172_v49 = vcombine.low %v1555_v36, %v1559_v28  ;;  %v1603_v32 = vld [vmem:[#allocation9 + $0xdd8] sm:$0xff] }
 0x307   :  { %4705 = vmatpush1.bf16.msra.mxu0 %v6114_v44  ;;  %v1566_v44 = vld [vmem:[#allocation9 + $0xcb0] sm:$0xff]  ;;  %v1607_v33 = vld [vmem:[#allocation9 + $0xdf8] sm:$0xff] }
 0x308   :  { %4869 = vmatpush1.bf16.msra.mxu1 %v6116_v45  ;;  %4706 = vmatprep.subr.bf16.mxu0 %v6123_v47  ;;  %v6173_v45 = vcombine.high %v1555_v36, %v1559_v28  ;;  %v1563_v47 = vld [vmem:[#allocation9 + $0xc98] sm:$0xff]  ;;  %v6179_v50 = vcombine.high %v1562_v40, %v1566_v44  ;;  %v6178_v55 = vcombine.low %v1562_v40, %v1566_v44 }
 0x309   :  { %4870 = vmatprep.subr.bf16.mxu1 %v6125_v2  ;;  %v1567_v2 = vld [vmem:[#allocation9 + $0xcb8] sm:$0xff]  ;;  %v6210_v28 = vcombine.low %v1594_v9, %v1598_v10 }
 0x30a   :  { %v6181_v24 = vcombine.high %v1563_v47, %v1567_v2 }
 0x30b   :  { %4707 = vmatpush1.bf16.msra.mxu0 %v6122_v51  ;;  %v1570_v51 = vld [vmem:[#allocation9 + $0xcd0] sm:$0xff] }
 0x30c   :  { %4871 = vmatpush1.bf16.msra.mxu1 %v6124_v52  ;;  %4708 = vmatprep.subr.bf16.mxu0 %v6131_v35  ;;  %v1574_v52 = vld [vmem:[#allocation9 + $0xcf0] sm:$0xff]  ;;  %v1571_v35 = vld [vmem:[#allocation9 + $0xcd8] sm:$0xff] }
 0x30d   :  { %4872 = vmatprep.subr.bf16.mxu1 %v6133_v53  ;;  %v1575_v53 = vld [vmem:[#allocation9 + $0xcf8] sm:$0xff]  ;;  %v6187_v43 = vcombine.high %v1570_v51, %v1574_v52 }
 0x30e   :  { %v6189_v57 = vcombine.high %v1571_v35, %v1575_v53 }
 0x30f   :  { %4709 = vmatpush1.bf16.msra.mxu0 %v6130_v58  ;;  %v1582_v58 = vld [vmem:[#allocation9 + $0xd30] sm:$0xff] }
 0x310   :  { %4873 = vmatpush1.bf16.msra.mxu1 %v6132_v63  ;;  %4710 = vmatprep.subr.bf16.mxu0 %v6139_v59  ;;  %v1579_v63 = vld [vmem:[#allocation9 + $0xd18] sm:$0xff]  ;;  %v6195_v6 = vcombine.high %v1578_v25, %v1582_v58 }
 0x311   :  { %4874 = vmatprep.subr.bf16.mxu1 %v6141_v61  ;;  %v1583_v59 = vld [vmem:[#allocation9 + $0xd38] sm:$0xff]  ;;  %v6188_v61 = vcombine.low %v1571_v35, %v1575_v53  ;;  %v1618_v35 = vld [vmem:[#allocation9 + $0xe50] sm:$0xff] }
 0x312   :  { %v6197_v62 = vcombine.high %v1579_v63, %v1583_v59  ;;  %v1622_v53 = vld [vmem:[#allocation9 + $0xe70] sm:$0xff] }
 0x313   :  { %4711 = vmatpush1.bf16.msra.mxu0 %v6138_v7  ;;  %v1587_v7 = vld [vmem:[#allocation9 + $0xd58] sm:$0xff] }
 0x314   :  { %4875 = vmatpush1.bf16.msra.mxu1 %v6140_v60  ;;  %4712 = vmatprep.subr.bf16.mxu0 %v6147_v39  ;;  %v1591_v60 = vld [vmem:[#allocation9 + $0xd78] sm:$0xff]  ;;  %v6194_v39 = vcombine.low %v1578_v25, %v1582_v58  ;;  %v6235_v25 = vcombine.high %v1618_v35, %v1622_v53 }
 0x315   :  { %4876 = vmatprep.subr.bf16.mxu1 %v6149_v1  ;;  %v6196_v1 = vcombine.low %v1579_v63, %v1583_v59  ;;  %v6205_v5 = vcombine.high %v1587_v7, %v1591_v60  ;;  %v1626_v63 = vld [vmem:[#allocation9 + $0xe90] sm:$0xff] }
 0x316   :  { %v1630_v59 = vld [vmem:[#allocation9 + $0xeb0] sm:$0xff] }
 0x317   :  { %4713 = vmatpush1.bf16.msra.mxu0 %v6146_v12  ;;  %v1595_v12 = vld [vmem:[#allocation9 + $0xd98] sm:$0xff] }
 0x318   :  { %4877 = vmatpush1.bf16.msra.mxu1 %v6148_v19  ;;  %4714 = vmatprep.subr.bf16.mxu0 %v6155_v15  ;;  %v1599_v19 = vld [vmem:[#allocation9 + $0xdb8] sm:$0xff]  ;;  %v6202_v15 = vcombine.low %v1586_v3, %v1590_v54  ;;  %v6243_v3 = vcombine.high %v1626_v63, %v1630_v59 }
 0x319   :  { %4878 = vmatprep.subr.bf16.mxu1 %v6157_v16  ;;  %v6204_v16 = vcombine.low %v1587_v7, %v1591_v60  ;;  %v6213_v20 = vcombine.high %v1595_v12, %v1599_v19  ;;  %v6212_v40 = vcombine.low %v1595_v12, %v1599_v19  ;;  %v1634_v7 = vld [vmem:[#allocation9 + $0xed0] sm:$0xff] }
 0x31a   :  { %v1638_v60 = vld [vmem:[#allocation9 + $0xef0] sm:$0xff] }
 0x31b   :  { %4715 = vmatpush1.bf16.msra.mxu0 %v6154_v21  ;;  %v1602_v21 = vld [vmem:[#allocation9 + $0xdd0] sm:$0xff]  ;;  %v6251_v9 = vcombine.high %v1634_v7, %v1638_v60 }
 0x31c   :  { %4879 = vmatpush1.bf16.msra.mxu1 %v6156_v13  ;;  %4725 = vmatprep.subr.bf16.mxu0 %v6163_v27  ;;  %v1606_v13 = vld [vmem:[#allocation9 + $0xdf0] sm:$0xff] }
 0x31d   :  { %4889 = vmatprep.subr.bf16.mxu1 %v6165_v29  ;;  %v6219_v44 = vcombine.high %v1602_v21, %v1606_v13  ;;  %v1642_v12 = vld [vmem:[#allocation9 + $0xf10] sm:$0xff] }
 0x31e   :  { %4717 = vmatmul.mubr.bf16.vlgmr.msra.gmra.mrb[12].mxu0 %v6999_v8  ;;  %v1646_v19 = vld [vmem:[#allocation9 + $0xf30] sm:$0xff] }
 0x31f   :  { %4881 = vmatmul.mubr.bf16.vlgmr.msra.gmra.mrb[12].mxu1 %v6999_v8  ;;  %4726 = vmatpush1.bf16.msra.mxu0 %v6162_v34  ;;  %v6180_v8 = vcombine.low %v1563_v47, %v1567_v2  ;;  %v1610_v47 = vld [vmem:[#allocation9 + $0xe10] sm:$0xff] }
 0x320   :  { %4757 = vmatprep.mubr.bf16.mxu0 %v7001_v11  ;;  %4890 = vmatpush1.bf16.msra.mxu1 %v6164_v37  ;;  %v1614_v2 = vld [vmem:[#allocation9 + $0xe30] sm:$0xff] }
 0x321   :  { %4921 = vmatprep.mubr.bf16.mxu1 %v7001_v11  ;;  %4727 = vmatprep.subr.bf16.mxu0 %v6171_v38  ;;  %v6186_v11 = vcombine.low %v1570_v51, %v1574_v52  ;;  %v6227_v51 = vcombine.high %v1610_v47, %v1614_v2 }
 0x322   :  { %4891 = vmatprep.subr.bf16.mxu1 %v6173_v45  ;;  %v6221_v45 = vcombine.high %v1603_v32, %v1607_v33 }
 0x323   :  { %4728 = vmatpush1.bf16.msra.mxu0 %v6170_v48  ;;  %v1611_v48 = vld [vmem:[#allocation9 + $0xe18] sm:$0xff] }
 0x324   :  { %4892 = vmatpush1.bf16.msra.mxu1 %v6172_v49  ;;  %4729 = vmatprep.subr.bf16.mxu0 %v6179_v50  ;;  %v1615_v49 = vld [vmem:[#allocation9 + $0xe38] sm:$0xff]  ;;  %v6218_v50 = vcombine.low %v1602_v21, %v1606_v13  ;;  %v6259_v21 = vcombine.high %v1642_v12, %v1646_v19 }
 0x325   :  { %4893 = vmatprep.subr.bf16.mxu1 %v6181_v24  ;;  %v6220_v24 = vcombine.low %v1603_v32, %v1607_v33  ;;  %v6229_v52 = vcombine.high %v1611_v48, %v1615_v49  ;;  %v1650_v32 = vld [vmem:[#allocation9 + $0xf50] sm:$0xff] }
 0x326   :  { %v1654_v33 = vld [vmem:[#allocation9 + $0xf70] sm:$0xff] }
 0x327   :  { %4730 = vmatpush1.bf16.msra.mxu0 %v6178_v55  ;;  %v1619_v55 = vld [vmem:[#allocation9 + $0xe58] sm:$0xff] }
 0x328   :  { %4894 = vmatpush1.bf16.msra.mxu1 %v6180_v8  ;;  %4731 = vmatprep.subr.bf16.mxu0 %v6187_v43  ;;  %v1623_v8 = vld [vmem:[#allocation9 + $0xe78] sm:$0xff]  ;;  %v6226_v43 = vcombine.low %v1610_v47, %v1614_v2 }
 0x329   :  { %4895 = vmatprep.subr.bf16.mxu1 %v6189_v57  ;;  %v6228_v57 = vcombine.low %v1611_v48, %v1615_v49  ;;  %v6237_v58 = vcombine.high %v1619_v55, %v1623_v8  ;;  %v1659_v47 = vld [vmem:[#allocation9 + $0xf98] sm:$0xff]  ;;  %v7037_v48 = vld [vmem:[#allocation11] sm:$0xff]  ;;  %v6266_v49 = vcombine.low %v1650_v32, %v1654_v33 }
 0x32a   :  { %v1663_v2 = vld [vmem:[#allocation9 + $0xfb8] sm:$0xff] }
 0x32b   :  { %4732 = vmatpush1.bf16.msra.mxu0 %v6186_v11  ;;  %v1627_v11 = vld [vmem:[#allocation9 + $0xe98] sm:$0xff] }
 0x32c   :  { %4896 = vmatpush1.bf16.msra.mxu1 %v6188_v61  ;;  %4733 = vmatprep.subr.bf16.mxu0 %v6195_v6  ;;  %v1631_v61 = vld [vmem:[#allocation9 + $0xeb8] sm:$0xff]  ;;  %v6234_v6 = vcombine.low %v1618_v35, %v1622_v53  ;;  %v1670_v35 = vld [vmem:[#allocation9 + $0xff0] sm:$0xff]  ;;  %v1681_v53 = vrot.slane %v7037_v48, %v127_v26 }
 0x32d   :  { %4897 = vmatprep.subr.bf16.mxu1 %v6197_v62  ;;  %v6236_v62 = vcombine.low %v1619_v55, %v1623_v8  ;;  %v6245_v54 = vcombine.high %v1627_v11, %v1631_v61  ;;  %v1667_v55 = vld [vmem:[#allocation9 + $0xfd8] sm:$0xff] }
 0x32e   :  { %v1671_v8 = vld [vmem:[#allocation9 + $0xff8] sm:$0xff] }
 0x32f   :  { %4734 = vmatpush1.bf16.msra.mxu0 %v6194_v39  ;;  %v1635_v39 = vld [vmem:[#allocation9 + $0xed8] sm:$0xff] }
 0x330   :  { %4898 = vmatpush1.bf16.msra.mxu1 %v6196_v1  ;;  %4735 = vmatprep.subr.bf16.mxu0 %v6203_v4  ;;  %v1639_v1 = vld [vmem:[#allocation9 + $0xef8] sm:$0xff]  ;;  %v6242_v4 = vcombine.low %v1626_v63, %v1630_v59  ;;  %v6285_v63 = vcombine.high %v1667_v55, %v1671_v8 }
 0x331   :  { %v7029_v17 = vpop.f32.mrb[8].mxu0  ;;  %v7031_v18 = vpop.f32.mrb[8].mxu1  ;;  %4899 = vmatprep.subr.bf16.mxu1 %v6205_v5  ;;  %v6244_v5 = vcombine.low %v1627_v11, %v1631_v61  ;;  %v6253_v10 = vcombine.high %v1635_v39, %v1639_v1  ;;  %v6284_v61 = vcombine.low %v1667_v55, %v1671_v8  ;;  %v6544_v55 = vld [vmem:[#allocation12 + $0x180] sm:$0xff]   ;;  %v6545_v8 = vld [vmem:[#allocation12 + $0x148] sm:$0xff]  }
 0x332   :  { %v7033_v27 = vpop.f32.mrb[9].mxu0  ;;  %v7035_v29 = vpop.f32.mrb[9].mxu1 }
 0x333   :  { %v4435_v34 = vpop.f32.mrb[10].mxu0  ;;  %v4599_v36 = vpop.f32.mrb[10].mxu1  ;;  %4736 = vmatpush1.bf16.msra.mxu0 %v6202_v15  ;;  %v1643_v15 = vld [vmem:[#allocation9 + $0xf18] sm:$0xff]  ;;  %v6440_v59 = vadd.f32 %v7033_v27, %v1681_v53 }
 0x334   :  { %4900 = vmatpush1.bf16.msra.mxu1 %v6204_v16  ;;  %v4436_v37 = vpop.f32.mrb[11].mxu0  ;;  %v4600_v38 = vpop.f32.mrb[11].mxu1  ;;  %4737 = vmatprep.subr.bf16.mxu0 %v6211_v42  ;;  %v1647_v16 = vld [vmem:[#allocation9 + $0xf38] sm:$0xff]  ;;  %v6250_v42 = vcombine.low %v1634_v7, %v1638_v60  ;;  %v6512_v7 = vld [vmem:[#allocation12 + $0x80] sm:$0xff]   ;;  %v6513_v60 = vld [vmem:[#allocation12 + $0x48] sm:$0xff]  }
 0x335   :  { %4901 = vmatprep.subr.bf16.mxu1 %v6213_v20  ;;  %v6252_v20 = vcombine.low %v1635_v39, %v1639_v1  ;;  %v6261_v13 = vcombine.high %v1643_v15, %v1647_v16  ;;  %v1651_v34 = vld [vmem:[#allocation9 + $0xf58] sm:$0xff]  ;;  %v6260_v37 = vcombine.low %v1643_v15, %v1647_v16  ;;  %v6267_v38 = vcombine.high %v1650_v32, %v1654_v33  ;;  %v6515_v1 = vld [vmem:[#allocation12 + $0x8] sm:$0xff]   ;;  %v6522_v15 = vld [vmem:[#allocation12 + $0xd8] sm:$0xff]  }
 0x336   :  { %v1655_v36 = vld [vmem:[#allocation9 + $0xf78] sm:$0xff]  ;;  %v6524_v16 = vld [vmem:[#allocation12 + $0x98] sm:$0xff]   ;;  %v6529_v32 = vld [vmem:[#allocation12 + $0x68] sm:$0xff]  }
 0x337   :  { %4738 = vmatpush1.bf16.msra.mxu0 %v6210_v28  ;;  %v6258_v28 = vcombine.low %v1642_v12, %v1646_v19  ;;  %v6520_v12 = vld [vmem:[#allocation12 + $0x90] sm:$0xff]   ;;  %v6521_v19 = vld [vmem:[#allocation12 + $0x58] sm:$0xff]   ;;  %v6530_v33 = vld [vmem:[#allocation12 + $0xe8] sm:$0xff]  }
 0x338   :  { %4902 = vmatpush1.bf16.msra.mxu1 %v6212_v40  ;;  %4739 = vmatprep.subr.bf16.mxu0 %v6219_v44  ;;  %v6269_v40 = vcombine.high %v1651_v34, %v1655_v36  ;;  %v1658_v44 = vld [vmem:[#allocation9 + $0xf90] sm:$0xff] }
 0x339   :  { %4903 = vmatprep.subr.bf16.mxu1 %v6221_v45  ;;  %v1662_v45 = vld [vmem:[#allocation9 + $0xfb0] sm:$0xff] }
 0x33b   :  { %4740 = vmatpush1.bf16.msra.mxu0 %v6218_v50  ;;  %v6268_v50 = vcombine.low %v1651_v34, %v1655_v36  ;;  %v6531_v34 = vld [vmem:[#allocation12 + $0x28] sm:$0xff]   ;;  %v1677_v36 = vrot.slane %v7037_v48, %v123_v23 }
 0x33c   :  { %4904 = vmatpush1.bf16.msra.mxu1 %v6220_v24  ;;  %4741 = vmatprep.subr.bf16.mxu0 %v6227_v51  ;;  %v6275_v24 = vcombine.high %v1658_v44, %v1662_v45  ;;  %v6277_v51 = vcombine.high %v1659_v47, %v1663_v2 }
 0x33d   :  { %4905 = vmatprep.subr.bf16.mxu1 %v6229_v52  ;;  %v1666_v52 = vld [vmem:[#allocation9 + $0xfd0] sm:$0xff] }
 0x33e   :  { %v6282_v26 = vcombine.low %v1666_v52, %v1670_v35 }
 0x33f   :  { %4742 = vmatpush1.bf16.msra.mxu0 %v6226_v43  ;;  %v1689_v43 = vrot.slane %v7037_v48, %v135_v41  ;;  %v6510_v41 = vld [vmem:[#allocation12 + $0xc0] sm:$0xff]  }
 0x340   :  { %4906 = vmatpush1.bf16.msra.mxu1 %v6228_v57  ;;  %4743 = vmatprep.subr.bf16.mxu0 %v6235_v25  ;;  %v6274_v57 = vcombine.low %v1658_v44, %v1662_v45  ;;  %v6276_v25 = vcombine.low %v1659_v47, %v1663_v2  ;;  %v6535_v44 = vld [vmem:[#allocation12 + $0x30] sm:$0xff]   ;;  %v6439_v45 = vadd.f32 %v7029_v17, %v1677_v36  ;;  %v6537_v2 = vld [vmem:[#allocation12 + $0x78] sm:$0xff]   ;;  %v6543_v17 = vld [vmem:[#allocation12 + $0x100] sm:$0xff]  }
 0x341   :  { %4907 = vmatprep.subr.bf16.mxu1 %v6237_v58  ;;  %v6283_v58 = vcombine.high %v1666_v52, %v1670_v35  ;;  %v6442_v11 = vadd.f32 %v7035_v29, %v1689_v43  ;;  %v6514_v29 = vld [vmem:[#allocation12 + $0xc8] sm:$0xff]   ;;  %v6536_v47 = vld [vmem:[#allocation12 + $0xb0] sm:$0xff]   ;;  %v6542_v35 = vld [vmem:[#allocation12 + $0x1c0] sm:$0xff]  }
 0x342   :  { %v6546_v43 = vld [vmem:[#allocation12 + $0x1c8] sm:$0xff]  }
 0x343   :  { %4744 = vmatpush1.bf16.msra.mxu0 %v6234_v6  ;;  %v6509_v6 = vld [vmem:[#allocation12 + $0x40] sm:$0xff]  }
 0x344   :  { %4908 = vmatpush1.bf16.msra.mxu1 %v6236_v62  ;;  %4745 = vmatprep.subr.bf16.mxu0 %v6243_v3  ;;  %v4931_v62 = vmax.f32 %v6440_v59, 0.0  ;;  %v4933_v3 = vmax.f32 %v6442_v11, 0.0  ;;  %v6551_v59 = vld [vmem:[#allocation12 + $0x110] sm:$0xff]  }
 0x345   :  { %4909 = vmatprep.subr.bf16.mxu1 %v6245_v54  ;;  %v6511_v54 = vld [vmem:[#allocation12] sm:$0xff]   ;;  %v6552_v11 = vld [vmem:[#allocation12 + $0x190] sm:$0xff]  }
 0x346   :  { %v4939_v27 = vpack.c.bf16 %v4931_v62, %v4931_v62  ;;  %v4941_v39 = vpack.c.bf16 %v4933_v3, %v4933_v3  ;;  %v6557_v62 = vld [vmem:[#allocation12 + $0x160] sm:$0xff]  }
 0x347   :  { %4746 = vmatpush1.bf16.msra.mxu0 %v6242_v4  ;;  %v6516_v4 = vld [vmem:[#allocation12 + $0x88] sm:$0xff]   ;;  %v6558_v3 = vld [vmem:[#allocation12 + $0x1e0] sm:$0xff]  }
 0x348   :  { %4910 = vmatpush1.bf16.msra.mxu1 %v6244_v5  ;;  %4747 = vmatprep.subr.bf16.mxu0 %v6251_v9  ;;  %v6517_v5 = vld [vmem:[#allocation12 + $0x50] sm:$0xff]  }
 0x349   :  { %4911 = vmatprep.subr.bf16.mxu1 %v6253_v10  ;;  %v6518_v9 = vld [vmem:[#allocation12 + $0xd0] sm:$0xff]  }
 0x34a   :  { %v6519_v10 = vld [vmem:[#allocation12 + $0x10] sm:$0xff]  }
 0x34b   :  { %4748 = vmatpush1.bf16.msra.mxu0 %v6250_v42  ;;  %v6525_v42 = vld [vmem:[#allocation12 + $0x60] sm:$0xff]  }
 0x34c   :  { %4912 = vmatpush1.bf16.msra.mxu1 %v6252_v20  ;;  %4749 = vmatprep.subr.bf16.mxu0 %v6259_v21  ;;  %v6526_v20 = vld [vmem:[#allocation12 + $0xe0] sm:$0xff]  }
 0x34d   :  { %4913 = vmatprep.subr.bf16.mxu1 %v6261_v13  ;;  %v6527_v21 = vld [vmem:[#allocation12 + $0x20] sm:$0xff]  }
 0x34e   :  { %v6528_v13 = vld [vmem:[#allocation12 + $0xa0] sm:$0xff]  }
 0x34f   :  { %4750 = vmatpush1.bf16.msra.mxu0 %v6258_v28  ;;  %v6532_v28 = vld [vmem:[#allocation12 + $0xa8] sm:$0xff]  }
 0x350   :  { %4914 = vmatpush1.bf16.msra.mxu1 %v6260_v37  ;;  %4751 = vmatprep.subr.bf16.mxu0 %v6267_v38  ;;  %v6533_v37 = vld [vmem:[#allocation12 + $0x70] sm:$0xff]   ;;  %v1685_v38 = vrot.slane %v7037_v48, %v131_v31  ;;  %v6540_v31 = vld [vmem:[#allocation12 + $0xb8] sm:$0xff]  }
 0x351   :  { %4915 = vmatprep.subr.bf16.mxu1 %v6269_v40  ;;  %v6534_v40 = vld [vmem:[#allocation12 + $0xf0] sm:$0xff]  }
 0x352   :  { %v6441_v23 = vadd.f32 %v7031_v18, %v1685_v38 }
 0x353   :  { %4752 = vmatpush1.bf16.msra.mxu0 %v6266_v49  ;;  %v6538_v49 = vld [vmem:[#allocation12 + $0xf8] sm:$0xff]  }
 0x354   :  { %4916 = vmatpush1.bf16.msra.mxu1 %v6268_v50  ;;  %4753 = vmatprep.subr.bf16.mxu0 %v6275_v24  ;;  %v6539_v50 = vld [vmem:[#allocation12 + $0x38] sm:$0xff]   ;;  %v4930_v24 = vmax.f32 %v6439_v45, 0.0  ;;  %v4932_v52 = vmax.f32 %v6441_v23, 0.0 }
 0x355   :  { %4917 = vmatprep.subr.bf16.mxu1 %v6277_v51  ;;  %v6541_v51 = vld [vmem:[#allocation12 + $0x140] sm:$0xff]  }
 0x356   :  { %v4938_v53 = vpack.c.bf16 %v4930_v24, %v4930_v24  ;;  %v4940_v18 = vpack.c.bf16 %v4932_v52, %v4932_v52 }
 0x357   :  { %4754 = vmatpush1.bf16.msra.mxu0 %v6274_v57  ;;  %v6547_v57 = vld [vmem:[#allocation12 + $0x108] sm:$0xff]  }
 0x358   :  { %4918 = vmatpush1.bf16.msra.mxu1 %v6276_v25  ;;  %4755 = vmatprep.subr.bf16.mxu0 %v6283_v58  ;;  %v6548_v25 = vld [vmem:[#allocation12 + $0x188] sm:$0xff]   ;;  %v6549_v58 = vld [vmem:[#allocation12 + $0x150] sm:$0xff]  }
 0x359   :  { %4919 = vmatprep.subr.bf16.mxu1 %v6285_v63  ;;  %v6550_v63 = vld [vmem:[#allocation12 + $0x1d0] sm:$0xff]  }
 0x35b   :  { %4756 = vmatpush1.bf16.msra.mxu0 %v6282_v26  ;;  %v6553_v26 = vld [vmem:[#allocation12 + $0x158] sm:$0xff]  }
 0x35c   :  { %4920 = vmatpush1.bf16.msra.mxu1 %v6284_v61  ;;  %6351 = vmatprep.subr.bf16.mxu0 %v6509_v6  ;;  %v6554_v61 = vld [vmem:[#allocation12 + $0x1d8] sm:$0xff]  }
 0x35d   :  { %6373 = vmatprep.subr.bf16.mxu1 %v6510_v41  ;;  %v6555_v6 = vld [vmem:[#allocation12 + $0x118] sm:$0xff]  }
 0x35e   :  { %4758 = vmatmul.mubr.bf16.vlgmr.msra.gmra.mrb[12].mxu0 %v7011_v56  ;;  %v6556_v41 = vld [vmem:[#allocation12 + $0x198] sm:$0xff]  }
 0x35f   :  { %4922 = vmatmul.mubr.bf16.vlgmr.msra.gmra.mrb[12].mxu1 %v7011_v56  ;;  %6352 = vmatpush3.bf16.msra.mxu0 %v6511_v54  ;;  %v6523_v56 = vld [vmem:[#allocation12 + $0x18] sm:$0xff]   ;;  %v6559_v54 = vld [vmem:[#allocation12 + $0x120] sm:$0xff]  }
 0x360   :  { %5497 = vmatprep.mubr.bf16.mxu0 %v4939_v27  ;;  %6374 = vmatpush3.bf16.msra.mxu1 %v6512_v7  ;;  %v6560_v7 = vld [vmem:[#allocation12 + $0x1a0] sm:$0xff]   ;;  %v6562_v27 = vld [vmem:[#allocation12 + $0x1e8] sm:$0xff]  }
 0x361   :  { %5537 = vmatprep.mubr.bf16.mxu1 %v4941_v39  ;;  %6353 = vmatprep.subr.bf16.mxu0 %v6513_v60  ;;  %v6561_v60 = vld [vmem:[#allocation12 + $0x168] sm:$0xff]  }
 0x362   :  { %6375 = vmatprep.subr.bf16.mxu1 %v6514_v29  ;;  %v6563_v29 = vld [vmem:[#allocation12 + $0x128] sm:$0xff]  }
 0x363   :  { %6354 = vmatpush3.bf16.msra.mxu0 %v6515_v1  ;;  %v6564_v39 = vld [vmem:[#allocation12 + $0x1a8] sm:$0xff]   ;;  %v6565_v1 = vld [vmem:[#allocation12 + $0x170] sm:$0xff]  }
 0x364   :  { %6376 = vmatpush3.bf16.msra.mxu1 %v6516_v4  ;;  %6355 = vmatprep.subr.bf16.mxu0 %v6517_v5  ;;  %v6566_v4 = vld [vmem:[#allocation12 + $0x1f0] sm:$0xff]  }
 0x365   :  { %6377 = vmatprep.subr.bf16.mxu1 %v6518_v9  ;;  %v6567_v5 = vld [vmem:[#allocation12 + $0x130] sm:$0xff]  }
 0x366   :  { %v6568_v9 = vld [vmem:[#allocation12 + $0x1b0] sm:$0xff]  }
 0x367   :  { %6356 = vmatpush3.bf16.msra.mxu0 %v6519_v10  ;;  %v6569_v10 = vld [vmem:[#allocation12 + $0x178] sm:$0xff]  }
 0x368   :  { %6378 = vmatpush3.bf16.msra.mxu1 %v6520_v12  ;;  %6357 = vmatprep.subr.bf16.mxu0 %v6521_v19  ;;  %v6570_v12 = vld [vmem:[#allocation12 + $0x1f8] sm:$0xff]  }
 0x369   :  { %6379 = vmatprep.subr.bf16.mxu1 %v6522_v15  ;;  %v6571_v19 = vld [vmem:[#allocation12 + $0x138] sm:$0xff]  }
 0x36a   :  { %v6572_v15 = vld [vmem:[#allocation12 + $0x1b8] sm:$0xff]  }
 0x36b   :  { %6358 = vmatpush3.bf16.msra.mxu0 %v6523_v56  ;;  %v1693_v56 = vrot.slane %v7037_v48, %v139_v14 }
 0x36c   :  { %6380 = vmatpush3.bf16.msra.mxu1 %v6524_v16  ;;  %6359 = vmatprep.subr.bf16.mxu0 %v6525_v42  ;;  %v1701_v16 = vrot.slane %v7037_v48, %v147_v0  ;;  %v1697_v42 = vrot.slane %v7037_v48, %v143_v46 }
 0x36d   :  { %6381 = vmatprep.subr.bf16.mxu1 %v6526_v20  ;;  %v1705_v20 = vrot.slane %v7037_v48, %v151_v30 }
 0x36f   :  { %6360 = vmatpush3.bf16.msra.mxu0 %v6527_v21 }
 0x370   :  { %6382 = vmatpush3.bf16.msra.mxu1 %v6528_v13  ;;  %6361 = vmatprep.subr.bf16.mxu0 %v6529_v32 }
 0x371   :  { %6383 = vmatprep.subr.bf16.mxu1 %v6530_v33 }
 0x373   :  { %6362 = vmatpush3.bf16.msra.mxu0 %v6531_v34 }
 0x374   :  { %6384 = vmatpush3.bf16.msra.mxu1 %v6532_v28  ;;  %6363 = vmatprep.subr.bf16.mxu0 %v6533_v37 }
 0x375   :  { %6385 = vmatprep.subr.bf16.mxu1 %v6534_v40 }
 0x377   :  { %6364 = vmatpush3.bf16.msra.mxu0 %v6535_v44 }
 0x378   :  { %6386 = vmatpush3.bf16.msra.mxu1 %v6536_v47  ;;  %6365 = vmatprep.subr.bf16.mxu0 %v6537_v2 }
 0x379   :  { %6387 = vmatprep.subr.bf16.mxu1 %v6538_v49 }
 0x37b   :  { %6366 = vmatpush3.bf16.msra.mxu0 %v6539_v50  ;;  %v6286_v50 = vld [vmem:[#allocation14] ss:$0 sm:$0xff] }
 0x37c   :  { %6388 = vmatpush3.bf16.msra.mxu1 %v6540_v31  ;;  %6395 = vmatprep.subr.bf16.mxu0 %v6541_v51 }
 0x37d   :  { %6417 = vmatprep.subr.bf16.mxu1 %v6542_v35 }
 0x37e   :  { %5498 = vmatmul.mubr.bf16.vlgmr.msra.gmra.mrb[16].mxu0 %v4938_v53 }
 0x37f   :  { %5538 = vmatmul.mubr.bf16.vlgmr.msra.gmra.mrb[16].mxu1 %v4940_v18  ;;  %6396 = vmatpush3.bf16.msra.mxu0 %v6543_v17 }
 0x380   :  { %6418 = vmatpush3.bf16.msra.mxu1 %v6544_v55  ;;  %6397 = vmatprep.subr.bf16.mxu0 %v6545_v8 }
 0x381   :  { %6419 = vmatprep.subr.bf16.mxu1 %v6546_v43 }
 0x383   :  { %6398 = vmatpush3.bf16.msra.mxu0 %v6547_v57 }
 0x384   :  { %6420 = vmatpush3.bf16.msra.mxu1 %v6548_v25  ;;  %6399 = vmatprep.subr.bf16.mxu0 %v6549_v58 }
 0x385   :  { %6421 = vmatprep.subr.bf16.mxu1 %v6550_v63 }
 0x387   :  { %6400 = vmatpush3.bf16.msra.mxu0 %v6551_v59 }
 0x388   :  { %6422 = vmatpush3.bf16.msra.mxu1 %v6552_v11  ;;  %6401 = vmatprep.subr.bf16.mxu0 %v6553_v26 }
 0x389   :  { %6423 = vmatprep.subr.bf16.mxu1 %v6554_v61 }
 0x38b   :  { %6402 = vmatpush3.bf16.msra.mxu0 %v6555_v6 }
 0x38c   :  { %6424 = vmatpush3.bf16.msra.mxu1 %v6556_v41  ;;  %6403 = vmatprep.subr.bf16.mxu0 %v6557_v62 }
 0x38d   :  { %6425 = vmatprep.subr.bf16.mxu1 %v6558_v3 }
 0x38f   :  { %6404 = vmatpush3.bf16.msra.mxu0 %v6559_v54 }
 0x390   :  { %6426 = vmatpush3.bf16.msra.mxu1 %v6560_v7  ;;  %6405 = vmatprep.subr.bf16.mxu0 %v6561_v60 }
 0x391   :  { %6427 = vmatprep.subr.bf16.mxu1 %v6562_v27 }
 0x393   :  { %6406 = vmatpush3.bf16.msra.mxu0 %v6563_v29 }
 0x394   :  { %6428 = vmatpush3.bf16.msra.mxu1 %v6564_v39  ;;  %6407 = vmatprep.subr.bf16.mxu0 %v6565_v1 }
 0x395   :  { %6429 = vmatprep.subr.bf16.mxu1 %v6566_v4 }
 0x397   :  { %6408 = vmatpush3.bf16.msra.mxu0 %v6567_v5 }
 0x398   :  { %6430 = vmatpush3.bf16.msra.mxu1 %v6568_v9  ;;  %6409 = vmatprep.subr.bf16.mxu0 %v6569_v10 }
 0x399   :  { %6431 = vmatprep.subr.bf16.mxu1 %v6570_v12 }
 0x39b   :  { %6410 = vmatpush3.bf16.msra.mxu0 %v6571_v19 }
 0x39c   :  { %6432 = vmatpush3.bf16.msra.mxu1 %v6572_v15 }
 0x431   :  { %v4759_v21 = vpop.f32.mrb[12].mxu0 }
 0x432   :  { %v6443_v13 = vadd.f32 %v4759_v21, %v1693_v56  ;;  %v4923_v32 = vpop.f32.mrb[12].mxu1  ;;  %v4761_v33 = vpop.f32.mrb[13].mxu0 }
 0x433   :  { %v6445_v34 = vadd.f32 %v4923_v32, %v1701_v16  ;;  %v6444_v36 = vadd.f32 %v4761_v33, %v1697_v42  ;;  %v4925_v28 = vpop.f32.mrb[13].mxu1  ;;  %v4763_v14 = vpop.f32.mrb[14].mxu0 }
 0x434   :  { %v4934_v37 = vmax.f32 %v6443_v13, 0.0  ;;  %v6446_v38 = vadd.f32 %v4925_v28, %v1705_v20  ;;  %v4927_v40 = vpop.f32.mrb[14].mxu1  ;;  %v4764_v0 = vpop.f32.mrb[15].mxu0 }
 0x435   :  { %v4936_v44 = vmax.f32 %v6445_v34, 0.0  ;;  %v4935_v45 = vmax.f32 %v6444_v36, 0.0  ;;  %v4928_v47 = vpop.f32.mrb[15].mxu1 }
 0x436   :  { %v4937_v46 = vmax.f32 %v6446_v38, 0.0  ;;  %v4942_v22 = vpack.c.bf16 %v4934_v37, %v4934_v37 }
 0x437   :  { %v4943_v2 = vpack.c.bf16 %v4935_v45, %v4935_v45  ;;  %v4944_v30 = vpack.c.bf16 %v4936_v44, %v4936_v44 }
 0x438   :  { %v4945_v23 = vpack.c.bf16 %v4937_v46, %v4937_v46 }
 0x439   :  { %5577 = vmatprep.mubr.bf16.mxu0 %v4943_v2 }
 0x43a   :  { %5617 = vmatprep.mubr.bf16.mxu1 %v4945_v23  ;;  %5578 = vmatmul.mubr.bf16.vlgmr.msra.gmra.mrb[20].mxu0 %v4942_v22 }
 0x43b   :  { %5618 = vmatmul.mubr.bf16.vlgmr.msra.gmra.mrb[20].mxu1 %v4944_v30 }
 0x451   :  { %v6367_v48 = vpop.f32.mrb[16].mxu0 }
 0x452   :  { %v6389_v49 = vpop.f32.mrb[16].mxu1  ;;  %v6368_v24 = vpop.f32.mrb[17].mxu0 }
 0x453   :  { %v6369_v31 = vadd.f32 %v6368_v24, %v6367_v48  ;;  %v6390_v51 = vpop.f32.mrb[17].mxu1  ;;  %v6370_v52 = vpop.f32.mrb[18].mxu0 }
 0x454   :  { %v6391_v35 = vadd.f32 %v6390_v51, %v6389_v49  ;;  %v6392_v17 = vpop.f32.mrb[18].mxu1  ;;  %v6371_v53 = vpop.f32.mrb[19].mxu0 }
 0x455   :  { %v5500_v55 = vadd.f32 %v6369_v31, %v6286_v50  ;;  %v6393_v8 = vpop.f32.mrb[19].mxu1 }
 0x457   :  { %v5540_v18 = vadd.f32 %v6391_v35, %v5500_v55 }
 0x50d   :  { %v6411_v43 = vpop.f32.mrb[20].mxu0 }
 0x50e   :  { %v6433_v57 = vpop.f32.mrb[20].mxu1  ;;  %v6412_v25 = vpop.f32.mrb[21].mxu0 }
 0x50f   :  { %v6413_v58 = vadd.f32 %v6412_v25, %v6411_v43  ;;  %v6434_v63 = vpop.f32.mrb[21].mxu1  ;;  %v6414_v59 = vpop.f32.mrb[22].mxu0 }
 0x510   :  { %v6435_v11 = vadd.f32 %v6434_v63, %v6433_v57  ;;  %v6436_v26 = vpop.f32.mrb[22].mxu1  ;;  %v6415_v61 = vpop.f32.mrb[23].mxu0 }
 0x511   :  { %v5580_v6 = vadd.f32 %v6413_v58, %v5540_v18  ;;  %v6437_v41 = vpop.f32.mrb[23].mxu1 }
 0x513   :  { %v5620_v62 = vadd.f32 %v6435_v11, %v5580_v6 }
 0x515   :  { %5625 = vst [vmem:[#allocation15] sm:$0xff] %v5620_v62 }
 0x516   :  { %6739 = shalt.err (!%p6736_p4)
}
 0x517   :  { %s6740_s11 = scalar_lea.hbm %s7088_s7, 128 }
 0x518   :  { %p6741_p5 = scmp.ne.s32.totalorder %s7088_s7, %s6740_s11  ;;  %p6744_p6 = scmp.lt.u32.totalorder %s6740_s11, %s7088_s7 }
 0x51a   :  { %p6746_p7 = pnand %p6744_p6, %p6741_p5 }
 0x51c   :  { %6749 = shalt.err (!%p6746_p7)
}
 0x51d   :  { %5635 = dma.vmem_to_hbm [thread:$0]  %s5633_s13, 128, %s7088_s7, [#allocation5]  }
 0x51e   :  { %6758 = dma.done.wait [#allocation5], 128  }
 0x51f   :  { %6759 = vsyncadd [#allocation5], 4294967168 }
 0x520   :  { %5639 = vsyncpa [#allocation4], 1 }
 0x521   :  { %5640 = vsyncpa [#allocation7], 1 }
 0x522   :  { %5641 = vsyncpa [#allocation10], 1 }
 0x523   :  { %5642 = vsyncpa [#allocation13], 1 }
 0x524   :  { %5643 = vsyncpa [#allocation5], 1 }

</bundles_post_ra>
